<compile_context>
chip_gen: v7x
topology: tpu7x:2x2x1
jax: 0.10.0
libtpu: 0.0.40
codegen_flags: <defaults>
</compile_context>

<pallas_src>
import functools
import math

import jax
import jax.numpy as jnp
import numpy as np
from jax import lax
from jax.experimental import pallas as pl
from jax.experimental.pallas import tpu as pltpu


# ----------------------------- in-kernel helpers -----------------------------

def _layer_norm(x, gamma, beta, eps=1e-5):
    # x: (T, H) f32; gamma/beta: (1, H) f32
    mu = jnp.mean(x, axis=-1, keepdims=True)
    xc = x - mu
    var = jnp.mean(xc * xc, axis=-1, keepdims=True)
    return xc * lax.rsqrt(var + eps) * gamma + beta


def _split_heads(x, num_heads, head_dim):
    # (T, H) -> (NH, T, hd): single reshape + major-dim transpose (one relayout).
    t = x.shape[0]
    return jnp.transpose(x.reshape(t, num_heads, head_dim), (1, 0, 2))


def _merge_heads(x):
    # (NH, T, hd) -> (T, H)
    nh, t, hd = x.shape
    return jnp.transpose(x, (1, 0, 2)).reshape(t, nh * hd)


def _attention(q_in, kv_ref, mask, wq, bq, wo, bo, num_heads, head_dim):
    """Attention with pre-projected, head-batched K/V held in VMEM scratch.

    q_in: (Tq, H) bf16 (query-side input; scale already folded into wq/bq)
    kv_ref: VMEM scratch (2, NH, Tk, hd) bf16 -> [K, V]
    mask: additive f32, broadcastable to (Tq, Tk)
    wq/wo: (H, H) bf16; bq/bo: (1, H) f32
    """
    f32, bf16 = jnp.float32, jnp.bfloat16

    q = jnp.dot(q_in, wq, preferred_element_type=f32) + bq            # (Tq, H)
    qh = _split_heads(q.astype(bf16), num_heads, head_dim)            # (NH, Tq, hd)
    kh = kv_ref[0]                                                     # (NH, Tk, hd)
    vh = kv_ref[1]                                                     # (NH, Tk, hd)

    # Scores (NH, Tq, Tk): head-batched dot contracting head_dim (implicit K^T).
    s = jnp.einsum('nqd,nkd->nqk', qh, kh, preferred_element_type=f32)
    s = s + mask                                                       # broadcast over heads

    # Numerically-stable softmax; reciprocal goes to the EUP slot (~free).
    s = s - jnp.max(s, axis=-1, keepdims=True)
    p = jnp.exp(s)
    p = p * pl.reciprocal(jnp.sum(p, axis=-1, keepdims=True), approx=True)

    ctx = jnp.einsum('nqk,nkd->nqd', p.astype(bf16), vh, preferred_element_type=f32)
    ctx = _merge_heads(ctx)                                            # (Tq, H) f32

    return jnp.dot(ctx.astype(bf16), wo, preferred_element_type=f32) + bo


# --------------------------------- kernel ------------------------------------

def decoder_block_kernel(dq_ref, dpad_ref, dk_ref, enc_ref, epad_ref,
                         w_self_ref, b_self_ref, w_cross_ref, b_cross_ref,
                         w1_ref, b1_ref, w2_ref, b2_ref,
                         ln_g_ref, ln_b_ref,
                         out_ref,
                         kv_self_ref, kv_cross_ref,
                         *, num_heads, head_dim):
    f32, bf16 = jnp.float32, jnp.bfloat16

    dq = dq_ref[0]        # (TQ, H) bf16 decoder-query tile
    dpad = dpad_ref[0]    # (1, Tk) f32 additive decoder key-padding mask
    epad = epad_ref[0]    # (1, S)  f32 additive encoder key-padding mask

    tq = dq.shape[0]
    tk = dk_ref.shape[1]

    # ---- hoisted K/V projections: computed once per batch (q tile 0), reused after ----
    @pl.when(pl.program_id(1) == 0)
    def _():
        dk = dk_ref[0]    # (Tk, H) bf16 — all decoder keys
        enc = enc_ref[0]  # (S,  H) bf16 — encoder states
        # Key scale is already folded into w/b index 1 in the wrapper.
        k_s = jnp.dot(dk, w_self_ref[1], preferred_element_type=f32) + b_self_ref[1]
        v_s = jnp.dot(dk, w_self_ref[2], preferred_element_type=f32) + b_self_ref[2]
        kv_self_ref[0] = _split_heads(k_s.astype(bf16), num_heads, head_dim)
        kv_self_ref[1] = _split_heads(v_s.astype(bf16), num_heads, head_dim)
        k_c = jnp.dot(enc, w_cross_ref[1], preferred_element_type=f32) + b_cross_ref[1]
        v_c = jnp.dot(enc, w_cross_ref[2], preferred_element_type=f32) + b_cross_ref[2]
        kv_cross_ref[0] = _split_heads(k_c.astype(bf16), num_heads, head_dim)
        kv_cross_ref[1] = _split_heads(v_c.astype(bf16), num_heads, head_dim)

    # Causal + key-padding additive self-attention mask, generated on the VPU
    # (no dense (B,T,T) mask traffic from HBM).  Assumes Tq == Tk globally
    # (standard training-time decoder self-attention; asserted in the wrapper).
    q0 = pl.program_id(1) * tq
    q_pos = q0 + lax.broadcasted_iota(jnp.int32, (tq, tk), 0)
    k_pos = lax.broadcasted_iota(jnp.int32, (tq, tk), 1)
    dmask = jnp.where(k_pos <= q_pos, 0.0, -10000.0).astype(f32) + dpad   # (TQ, Tk)
    # TODO(synk): for long sequences, tile the key axis and skip fully-masked causal
    #             tiles via pl.when with an online (flash-style) softmax.

    dq_f32 = dq.astype(f32)

    # ---- post-LN ordering (pre_ln=False, the module default) ----
    # Self-Attn -> Residual -> LN1
    sa = _attention(dq, kv_self_ref, dmask,
                    w_self_ref[0], b_self_ref[0], w_self_ref[3], b_self_ref[3],
                    num_heads, head_dim)
    sa = _layer_norm(sa + dq_f32, ln_g_ref[0], ln_b_ref[0])

    # Cross-Attn -> Residual -> LN2  (encoder mask = key padding, broadcast over Tq)
    ca = _attention(sa.astype(bf16), kv_cross_ref, epad,
                    w_cross_ref[0], b_cross_ref[0], w_cross_ref[3], b_cross_ref[3],
                    num_heads, head_dim)
    ca = _layer_norm(ca + sa, ln_g_ref[1], ln_b_ref[1])

    # PositionWiseFF (relu) -> Residual -> LN3
    # TODO(synk): tile the inner dim I with a reduction grid axis for production sizes.
    h = jnp.dot(ca.astype(bf16), w1_ref[...], preferred_element_type=f32) + b1_ref[...]
    h = jnp.maximum(h, 0.0)
    ff = jnp.dot(h.astype(bf16), w2_ref[...], preferred_element_type=f32) + b2_ref[...]
    out_ref[0] = _layer_norm(ff + ca, ln_g_ref[2], ln_b_ref[2])


# -------------------------------- wrapper ------------------------------------

def _single_buffered_spec(block_shape, index_map):
    """Single-buffer grid-invariant blocks (weights/biases/LN) to halve their VMEM use."""
    try:
        return pl.BlockSpec(block_shape, index_map, pipeline_mode=pl.Buffered(1))
    except (TypeError, AttributeError):
        return pl.BlockSpec(block_shape, index_map)


def _vmem_limit_bytes():
    """Generation-aware scoped-VMEM request: capacity minus headroom, capped."""
    mib = 1024 * 1024
    try:
        cap = int(pltpu.get_tpu_info().vmem_capacity_bytes)
    except Exception:
        cap = 64 * mib   # conservative: v7x physical VMEM per core
    return int(min(max(cap - 16 * mib, 32 * mib), 100 * mib))


def transformer_decoder_block(dec_q, dec_key_pad, dec_keys, enc_states, enc_key_pad,
                              params, *, num_heads, q_tile=None):
    """Fused post-LN decoder block.

    dec_q:       (B, T, H)  decoder queries
    dec_key_pad: (B, T)     additive key-padding mask for decoder keys (0 / -1e4);
                            the causal part is generated inside the kernel.
    dec_keys:    (B, T, H)  decoder keys
    enc_states:  (B, S, H)  encoder states
    enc_key_pad: (B, S)     additive key-padding mask for encoder keys (0 / -1e4)
    """
    B, T, H = dec_q.shape
    Tk = dec_keys.shape[1]
    S = enc_states.shape[1]
    I = params["w1"].shape[1]
    head_dim = H // num_heads
    assert H % num_heads == 0
    # In-kernel causal mask assumes query positions index the same sequence as keys.
    assert Tk == T, "causal self-attention path assumes Tq == Tk (no KV cache)"

    if q_tile is None:
        # Prefer large lane-dense tiles; MXU M-dim and per-grid-step overhead both
        # favour >=128 rows.  Fall back to the full sequence for short T.
        q_tile = T
        for cand in (512, 256, 128):
            if T % cand == 0:
                q_tile = cand
                break
    assert T % q_tile == 0
    nq = T // q_tile

    f32, bf16 = jnp.float32, jnp.bfloat16

    # Fold the NeMo 1/sqrt(sqrt(head_dim)) q/k scale into Wq/bq and Wk/bk.
    scale = 1.0 / math.sqrt(math.sqrt(head_dim))
    qk_scale = jnp.array([scale, scale, 1.0, 1.0], dtype=f32).reshape(4, 1, 1)

    # Matmul weights as bf16 (half the HBM traffic / VMEM residency); biases and
    # LayerNorm parameters stay f32.
    w_self = (params["w_self"] * qk_scale).astype(bf16)
    b_self = (params["b_self"] * qk_scale).astype(f32)
    w_cross = (params["w_cross"] * qk_scale).astype(bf16)
    b_cross = (params["b_cross"] * qk_scale).astype(f32)
    w1 = params["w1"].astype(bf16)
    w2 = params["w2"].astype(bf16)

    # bf16 activations: halves the HBM->VMEM DMA; stats/residuals stay f32 in-kernel.
    dec_q_b = dec_q.astype(bf16)
    dec_keys_b = dec_keys.astype(bf16)
    enc_b = enc_states.astype(bf16)

    dpad = dec_key_pad.astype(f32).reshape(B, 1, Tk)
    epad = enc_key_pad.astype(f32).reshape(B, 1, S)

    in_specs = [
        pl.BlockSpec((1, q_tile, H), lambda b, q: (b, q, 0)),             # decoder_query tile
        pl.BlockSpec((1, 1, Tk),     lambda b, q: (b, 0, 0)),             # decoder key padding
        pl.BlockSpec((1, Tk, H),     lambda b, q: (b, 0, 0)),             # decoder_keys (full)
        pl.BlockSpec((1, S, H),      lambda b, q: (b, 0, 0)),             # encoder_states (full)
        pl.BlockSpec((1, 1, S),      lambda b, q: (b, 0, 0)),             # encoder key padding
        _single_buffered_spec((4, H, H), lambda b, q: (0, 0, 0)),         # self-attn W (bf16)
        _single_buffered_spec((4, 1, H), lambda b, q: (0, 0, 0)),         # self-attn b
        _single_buffered_spec((4, H, H), lambda b, q: (0, 0, 0)),         # cross-attn W (bf16)
        _single_buffered_spec((4, 1, H), lambda b, q: (0, 0, 0)),         # cross-attn b
        _single_buffered_spec((H, I),    lambda b, q: (0, 0)),            # FFN dense_in W (bf16)
        _single_buffered_spec((1, I),    lambda b, q: (0, 0)),            # FFN dense_in b
        _single_buffered_spec((I, H),    lambda b, q: (0, 0)),            # FFN dense_out W (bf16)
        _single_buffered_spec((1, H),    lambda b, q: (0, 0)),            # FFN dense_out b
        _single_buffered_spec((3, 1, H), lambda b, q: (0, 0, 0)),         # LN gamma (LN1..3)
        _single_buffered_spec((3, 1, H), lambda b, q: (0, 0, 0)),         # LN beta  (LN1..3)
    ]

    kernel = functools.partial(decoder_block_kernel,
                               num_heads=num_heads, head_dim=head_dim)

    return pl.pallas_call(
        kernel,
        out_shape=jax.ShapeDtypeStruct((B, T, H), f32),
        grid_spec=pltpu.PrefetchScalarGridSpec(
            num_scalar_prefetch=0,
            grid=(B, nq),
            in_specs=in_specs,
            out_specs=pl.BlockSpec((1, q_tile, H), lambda b, q: (b, q, 0)),
            scratch_shapes=[
                pltpu.VMEM((2, num_heads, Tk, head_dim), bf16),   # self-attn K/V
                pltpu.VMEM((2, num_heads, S, head_dim), bf16),    # cross-attn K/V
            ]),
        compiler_params=pltpu.CompilerParams(
            # q axis carries the per-batch K/V scratch dependence -> "arbitrary";
            # the batch axis alone fills both TensorCores when B >= 2.
            dimension_semantics=("parallel", "arbitrary"),
            vmem_limit_bytes=_vmem_limit_bytes()),
    )(dec_q_b, dpad, dec_keys_b, enc_b, epad,
      w_self, b_self, w_cross, b_cross,
      w1, params["b1"], w2, params["b2"],
      params["ln_g"], params["ln_b"])


# ------------------------- pure-JAX reference (check) -------------------------

def _mha_ref(q_in, k_in, v_in, mask, w, b, nh, dh):
    scale = 1.0 / math.sqrt(math.sqrt(dh))
    q = (q_in @ w[0] + b[0]) * scale
    k = (k_in @ w[1] + b[1]) * scale
    v = v_in @ w[2] + b[2]
    B, Tq, H = q.shape
    Tk = k.shape[1]
    q = q.reshape(B, Tq, nh, dh).transpose(0, 2, 1, 3)
    k = k.reshape(B, Tk, nh, dh).transpose(0, 2, 1, 3)
    v = v.reshape(B, Tk, nh, dh).transpose(0, 2, 1, 3)
    s = jnp.einsum("bhqd,bhkd->bhqk", q, k) + mask[:, None]
    p = jax.nn.softmax(s, axis=-1)
    ctx = jnp.einsum("bhqk,bhkd->bhqd", p, v).transpose(0, 2, 1, 3).reshape(B, Tq, H)
    return ctx @ w[3] + b[3]


def _ln_ref(x, g, bta, eps=1e-5):
    mu = jnp.mean(x, axis=-1, keepdims=True)
    var = jnp.mean((x - mu) ** 2, axis=-1, keepdims=True)
    return (x - mu) * lax.rsqrt(var + eps) * g + bta


def decoder_block_ref(dq, dec_key_pad, dk, enc, enc_key_pad, p, nh):
    B, T, H = dq.shape
    S = enc.shape[1]
    dh = H // nh
    causal = jnp.where(jnp.arange(T)[:, None] >= jnp.arange(T)[None, :], 0.0, -10000.0)
    dmask = causal[None, :, :] + dec_key_pad[:, None, :]             # (B, T, T)
    emask = jnp.broadcast_to(enc_key_pad[:, None, :], (B, T, S))     # (B, T, S)
    sa = _mha_ref(dq, dk, dk, dmask, p["w_self"], p["b_self"], nh, dh) + dq
    sa = _ln_ref(sa, p["ln_g"][0], p["ln_b"][0])
    ca = _mha_ref(sa, enc, enc, emask, p["w_cross"], p["b_cross"], nh, dh) + sa
    ca = _ln_ref(ca, p["ln_g"][1], p["ln_b"][1])
    ff = jnp.maximum(ca @ p["w1"] + p["b1"], 0.0) @ p["w2"] + p["b2"] + ca
    return _ln_ref(ff, p["ln_g"][2], p["ln_b"][2])


# ----------------------------------- main -------------------------------------

if __name__ == "__main__":
    # Small but lane-dense shapes: H multiple of 128 and head_dim = 128 so the
    # score/context contractions use the full MXU depth.
    B, T, S, H, I, NH = 2, 16, 16, 256, 512, 2

    key = jax.random.PRNGKey(0)
    keys = jax.random.split(key, 16)

    def nrm(k, shape, s=0.02):
        return jax.random.normal(k, shape, dtype=jnp.float32) * s

    params = {
        "w_self":  nrm(keys[0], (4, H, H)),
        "b_self":  nrm(keys[1], (4, 1, H)),
        "w_cross": nrm(keys[2], (4, H, H)),
        "b_cross": nrm(keys[3], (4, 1, H)),
        "w1":      nrm(keys[4], (H, I)),
        "b1":      nrm(keys[5], (1, I)),
        "w2":      nrm(keys[6], (I, H)),
        "b2":      nrm(keys[7], (1, H)),
        "ln_g":    1.0 + nrm(keys[8], (3, 1, H), 0.1),
        "ln_b":    nrm(keys[9], (3, 1, H), 0.05),
    }

    dec_q = jax.random.normal(keys[10], (B, T, H), dtype=jnp.float32)
    dec_keys = dec_q  # standard decoder self-attention: keys == queries
    enc_states = jax.random.normal(keys[11], (B, S, H), dtype=jnp.float32)

    # Additive key-padding vectors (0 = attend, -1e4 = masked).  The causal part of
    # the decoder self-attention mask is generated inside the kernel.
    dec_key_pad = jnp.zeros((B, T), dtype=jnp.float32).at[1, T - 1].set(-10000.0)
    enc_key_pad = jnp.zeros((B, S), dtype=jnp.float32).at[1, S - 2:].set(-10000.0)

    # q_tile=8 only to exercise the multi-tile / hoisted-K-V path at this toy size;
    # the default heuristic picks 128/256-row tiles for realistic sequence lengths.
    out = transformer_decoder_block(dec_q, dec_key_pad, dec_keys, enc_states,
                                    enc_key_pad, params, num_heads=NH, q_tile=8)
    out = jax.block_until_ready(out)

    ref = decoder_block_ref(dec_q, dec_key_pad, dec_keys, enc_states, enc_key_pad,
                            params, NH)
    np.testing.assert_allclose(np.asarray(out), np.asarray(ref),
                               rtol=3e-2, atol=3e-2)

    print("KERNEL_OK")
</pallas_src>

<mosaic_0001>
module attributes {stable_mosaic.version = 11 : i64} {
  func.func @decoder_block_kernel(%arg0: i32, %arg1: i32, %arg2: memref<1x8x256xbf16, #tpu.memory_space<vmem>>, %arg3: memref<1x1x16xf32, #tpu.memory_space<vmem>>, %arg4: memref<1x16x256xbf16, #tpu.memory_space<vmem>>, %arg5: memref<1x16x256xbf16, #tpu.memory_space<vmem>>, %arg6: memref<1x1x16xf32, #tpu.memory_space<vmem>>, %arg7: memref<4x256x256xbf16, #tpu.memory_space<vmem>>, %arg8: memref<4x1x256xf32, #tpu.memory_space<vmem>>, %arg9: memref<4x256x256xbf16, #tpu.memory_space<vmem>>, %arg10: memref<4x1x256xf32, #tpu.memory_space<vmem>>, %arg11: memref<256x512xbf16, #tpu.memory_space<vmem>>, %arg12: memref<1x512xf32, #tpu.memory_space<vmem>>, %arg13: memref<512x256xbf16, #tpu.memory_space<vmem>>, %arg14: memref<1x256xf32, #tpu.memory_space<vmem>>, %arg15: memref<3x1x256xf32, #tpu.memory_space<vmem>>, %arg16: memref<3x1x256xf32, #tpu.memory_space<vmem>>, %arg17: memref<1x8x256xf32, #tpu.memory_space<vmem>>, %arg18: memref<2x2x16x128xbf16, #tpu.memory_space<vmem>>, %arg19: memref<2x2x16x128xbf16, #tpu.memory_space<vmem>>) attributes {dimension_semantics = [#tpu.dimension_semantics<parallel>, #tpu.dimension_semantics<arbitrary>], iteration_bounds = array<i64: 2, 2>, scalar_prefetch = 0 : i64, scratch_operands = 2 : i64, tpu.core_type = #tpu.core_type<tc>, window_params = [{transform_indices = @transform_0, window_bounds = array<i64: 1, 8, 256>}, {transform_indices = @transform_1, window_bounds = array<i64: 1, 1, 16>}, {transform_indices = @transform_2, window_bounds = array<i64: 1, 16, 256>}, {transform_indices = @transform_3, window_bounds = array<i64: 1, 16, 256>}, {transform_indices = @transform_4, window_bounds = array<i64: 1, 1, 16>}, {pipeline_mode = #tpu.pipeline_mode<synchronous>, transform_indices = @transform_5, window_bounds = array<i64: 4, 256, 256>}, {pipeline_mode = #tpu.pipeline_mode<synchronous>, transform_indices = @transform_6, window_bounds = array<i64: 4, 1, 256>}, {pipeline_mode = #tpu.pipeline_mode<synchronous>, transform_indices = @transform_7, window_bounds = array<i64: 4, 256, 256>}, {pipeline_mode = #tpu.pipeline_mode<synchronous>, transform_indices = @transform_8, window_bounds = array<i64: 4, 1, 256>}, {pipeline_mode = #tpu.pipeline_mode<synchronous>, transform_indices = @transform_9, window_bounds = array<i64: 256, 512>}, {pipeline_mode = #tpu.pipeline_mode<synchronous>, transform_indices = @transform_10, window_bounds = array<i64: 1, 512>}, {pipeline_mode = #tpu.pipeline_mode<synchronous>, transform_indices = @transform_11, window_bounds = array<i64: 512, 256>}, {pipeline_mode = #tpu.pipeline_mode<synchronous>, transform_indices = @transform_12, window_bounds = array<i64: 1, 256>}, {pipeline_mode = #tpu.pipeline_mode<synchronous>, transform_indices = @transform_13, window_bounds = array<i64: 3, 1, 256>}, {pipeline_mode = #tpu.pipeline_mode<synchronous>, transform_indices = @transform_14, window_bounds = array<i64: 3, 1, 256>}, {transform_indices = @transform_15, window_bounds = array<i64: 1, 8, 256>}]} {
    %c0 = arith.constant 0 : index
    %c0_0 = arith.constant 0 : index
    %c0_1 = arith.constant 0 : index
    %0 = vector.load %arg2[%c0, %c0_0, %c0_1] : memref<1x8x256xbf16, #tpu.memory_space<vmem>>, vector<1x8x256xbf16>
    %1 = vector.shape_cast %0 : vector<1x8x256xbf16> to vector<8x256xbf16>
    %c0_2 = arith.constant 0 : index
    %c0_3 = arith.constant 0 : index
    %c0_4 = arith.constant 0 : index
    %2 = vector.load %arg3[%c0_2, %c0_3, %c0_4] : memref<1x1x16xf32, #tpu.memory_space<vmem>>, vector<1x1x16xf32>
    %3 = vector.shape_cast %2 : vector<1x1x16xf32> to vector<1x16xf32>
    %c0_5 = arith.constant 0 : index
    %c0_6 = arith.constant 0 : index
    %c0_7 = arith.constant 0 : index
    %4 = vector.load %arg6[%c0_5, %c0_6, %c0_7] : memref<1x1x16xf32, #tpu.memory_space<vmem>>, vector<1x1x16xf32>
    %5 = vector.shape_cast %4 : vector<1x1x16xf32> to vector<1x16xf32>
    %c0_i32 = arith.constant 0 : i32
    %6 = arith.cmpi eq, %arg1, %c0_i32 : i32
    %7 = arith.extui %6 : i1 to i32
    %c0_i32_8 = arith.constant 0 : i32
    %8 = arith.cmpi ne, %7, %c0_i32_8 : i32
    scf.if %8 {
      %c0_106 = arith.constant 0 : index
      %c0_107 = arith.constant 0 : index
      %c0_108 = arith.constant 0 : index
      %194 = vector.load %arg4[%c0_106, %c0_107, %c0_108] : memref<1x16x256xbf16, #tpu.memory_space<vmem>>, vector<1x16x256xbf16>
      %195 = vector.shape_cast %194 : vector<1x16x256xbf16> to vector<16x256xbf16>
      %c0_109 = arith.constant 0 : index
      %c0_110 = arith.constant 0 : index
      %c0_111 = arith.constant 0 : index
      %196 = vector.load %arg5[%c0_109, %c0_110, %c0_111] : memref<1x16x256xbf16, #tpu.memory_space<vmem>>, vector<1x16x256xbf16>
      %197 = vector.shape_cast %196 : vector<1x16x256xbf16> to vector<16x256xbf16>
      %c1_112 = arith.constant 1 : index
      %c0_113 = arith.constant 0 : index
      %c0_114 = arith.constant 0 : index
      %198 = vector.load %arg7[%c1_112, %c0_113, %c0_114] : memref<4x256x256xbf16, #tpu.memory_space<vmem>>, vector<1x256x256xbf16>
      %199 = vector.shape_cast %198 : vector<1x256x256xbf16> to vector<256x256xbf16>
      %cst_115 = arith.constant dense<0.000000e+00> : vector<16x256xf32>
      %200 = tpu.matmul %195, %199, %cst_115 {dimension_numbers = #tpu.dot_dimension_numbers<[1], [0], [0], [1], [0, 0, 1, 1], [], []>} : vector<16x256xbf16>, vector<256x256xbf16>, vector<16x256xf32> -> vector<16x256xf32>
      %c1_116 = arith.constant 1 : index
      %c0_117 = arith.constant 0 : index
      %c0_118 = arith.constant 0 : index
      %201 = vector.load %arg8[%c1_116, %c0_117, %c0_118] : memref<4x1x256xf32, #tpu.memory_space<vmem>>, vector<1x1x256xf32>
      %202 = vector.shape_cast %201 : vector<1x1x256xf32> to vector<1x256xf32>
      %203 = vector.broadcast %202 : vector<1x256xf32> to vector<16x256xf32>
      %204 = arith.addf %200, %203 : vector<16x256xf32>
      %c2_119 = arith.constant 2 : index
      %c0_120 = arith.constant 0 : index
      %c0_121 = arith.constant 0 : index
      %205 = vector.load %arg7[%c2_119, %c0_120, %c0_121] : memref<4x256x256xbf16, #tpu.memory_space<vmem>>, vector<1x256x256xbf16>
      %206 = vector.shape_cast %205 : vector<1x256x256xbf16> to vector<256x256xbf16>
      %cst_122 = arith.constant dense<0.000000e+00> : vector<16x256xf32>
      %207 = tpu.matmul %195, %206, %cst_122 {dimension_numbers = #tpu.dot_dimension_numbers<[1], [0], [0], [1], [0, 0, 1, 1], [], []>} : vector<16x256xbf16>, vector<256x256xbf16>, vector<16x256xf32> -> vector<16x256xf32>
      %c2_123 = arith.constant 2 : index
      %c0_124 = arith.constant 0 : index
      %c0_125 = arith.constant 0 : index
      %208 = vector.load %arg8[%c2_123, %c0_124, %c0_125] : memref<4x1x256xf32, #tpu.memory_space<vmem>>, vector<1x1x256xf32>
      %209 = vector.shape_cast %208 : vector<1x1x256xf32> to vector<1x256xf32>
      %210 = vector.broadcast %209 : vector<1x256xf32> to vector<16x256xf32>
      %211 = arith.addf %207, %210 : vector<16x256xf32>
      %212 = arith.truncf %204 : vector<16x256xf32> to vector<16x256xbf16>
      %213 = vector.shape_cast %212 : vector<16x256xbf16> to vector<16x2x128xbf16>
      %214 = tpu.transpose %213, [1, 0, 2] : vector<16x2x128xbf16> -> vector<2x16x128xbf16>
      %c0_126 = arith.constant 0 : index
      %c0_127 = arith.constant 0 : index
      %c0_128 = arith.constant 0 : index
      %c0_129 = arith.constant 0 : index
      %215 = vector.load %arg18[%c0_126, %c0_127, %c0_128, %c0_129] : memref<2x2x16x128xbf16, #tpu.memory_space<vmem>>, vector<1x2x16x128xbf16>
      %216 = vector.shape_cast %215 : vector<1x2x16x128xbf16> to vector<2x16x128xbf16>
      %217 = vector.shape_cast %214 : vector<2x16x128xbf16> to vector<1x2x16x128xbf16>
      tpu.vector_store %arg18[%c0_126, %c0_127, %c0_128, %c0_129], %217 {strides = array<i32>} : memref<2x2x16x128xbf16, #tpu.memory_space<vmem>>, vector<1x2x16x128xbf16>,
      %218 = arith.truncf %211 : vector<16x256xf32> to vector<16x256xbf16>
      %219 = vector.shape_cast %218 : vector<16x256xbf16> to vector<16x2x128xbf16>
      %220 = tpu.transpose %219, [1, 0, 2] : vector<16x2x128xbf16> -> vector<2x16x128xbf16>
      %c1_130 = arith.constant 1 : index
      %c0_131 = arith.constant 0 : index
      %c0_132 = arith.constant 0 : index
      %c0_133 = arith.constant 0 : index
      %221 = vector.load %arg18[%c1_130, %c0_131, %c0_132, %c0_133] : memref<2x2x16x128xbf16, #tpu.memory_space<vmem>>, vector<1x2x16x128xbf16>
      %222 = vector.shape_cast %221 : vector<1x2x16x128xbf16> to vector<2x16x128xbf16>
      %223 = vector.shape_cast %220 : vector<2x16x128xbf16> to vector<1x2x16x128xbf16>
      tpu.vector_store %arg18[%c1_130, %c0_131, %c0_132, %c0_133], %223 {strides = array<i32>} : memref<2x2x16x128xbf16, #tpu.memory_space<vmem>>, vector<1x2x16x128xbf16>,
      %c1_134 = arith.constant 1 : index
      %c0_135 = arith.constant 0 : index
      %c0_136 = arith.constant 0 : index
      %224 = vector.load %arg9[%c1_134, %c0_135, %c0_136] : memref<4x256x256xbf16, #tpu.memory_space<vmem>>, vector<1x256x256xbf16>
      %225 = vector.shape_cast %224 : vector<1x256x256xbf16> to vector<256x256xbf16>
      %cst_137 = arith.constant dense<0.000000e+00> : vector<16x256xf32>
      %226 = tpu.matmul %197, %225, %cst_137 {dimension_numbers = #tpu.dot_dimension_numbers<[1], [0], [0], [1], [0, 0, 1, 1], [], []>} : vector<16x256xbf16>, vector<256x256xbf16>, vector<16x256xf32> -> vector<16x256xf32>
      %c1_138 = arith.constant 1 : index
      %c0_139 = arith.constant 0 : index
      %c0_140 = arith.constant 0 : index
      %227 = vector.load %arg10[%c1_138, %c0_139, %c0_140] : memref<4x1x256xf32, #tpu.memory_space<vmem>>, vector<1x1x256xf32>
      %228 = vector.shape_cast %227 : vector<1x1x256xf32> to vector<1x256xf32>
      %229 = vector.broadcast %228 : vector<1x256xf32> to vector<16x256xf32>
      %230 = arith.addf %226, %229 : vector<16x256xf32>
      %c2_141 = arith.constant 2 : index
      %c0_142 = arith.constant 0 : index
      %c0_143 = arith.constant 0 : index
      %231 = vector.load %arg9[%c2_141, %c0_142, %c0_143] : memref<4x256x256xbf16, #tpu.memory_space<vmem>>, vector<1x256x256xbf16>
      %232 = vector.shape_cast %231 : vector<1x256x256xbf16> to vector<256x256xbf16>
      %cst_144 = arith.constant dense<0.000000e+00> : vector<16x256xf32>
      %233 = tpu.matmul %197, %232, %cst_144 {dimension_numbers = #tpu.dot_dimension_numbers<[1], [0], [0], [1], [0, 0, 1, 1], [], []>} : vector<16x256xbf16>, vector<256x256xbf16>, vector<16x256xf32> -> vector<16x256xf32>
      %c2_145 = arith.constant 2 : index
      %c0_146 = arith.constant 0 : index
      %c0_147 = arith.constant 0 : index
      %234 = vector.load %arg10[%c2_145, %c0_146, %c0_147] : memref<4x1x256xf32, #tpu.memory_space<vmem>>, vector<1x1x256xf32>
      %235 = vector.shape_cast %234 : vector<1x1x256xf32> to vector<1x256xf32>
      %236 = vector.broadcast %235 : vector<1x256xf32> to vector<16x256xf32>
      %237 = arith.addf %233, %236 : vector<16x256xf32>
      %238 = arith.truncf %230 : vector<16x256xf32> to vector<16x256xbf16>
      %239 = vector.shape_cast %238 : vector<16x256xbf16> to vector<16x2x128xbf16>
      %240 = tpu.transpose %239, [1, 0, 2] : vector<16x2x128xbf16> -> vector<2x16x128xbf16>
      %c0_148 = arith.constant 0 : index
      %c0_149 = arith.constant 0 : index
      %c0_150 = arith.constant 0 : index
      %c0_151 = arith.constant 0 : index
      %241 = vector.load %arg19[%c0_148, %c0_149, %c0_150, %c0_151] : memref<2x2x16x128xbf16, #tpu.memory_space<vmem>>, vector<1x2x16x128xbf16>
      %242 = vector.shape_cast %241 : vector<1x2x16x128xbf16> to vector<2x16x128xbf16>
      %243 = vector.shape_cast %240 : vector<2x16x128xbf16> to vector<1x2x16x128xbf16>
      tpu.vector_store %arg19[%c0_148, %c0_149, %c0_150, %c0_151], %243 {strides = array<i32>} : memref<2x2x16x128xbf16, #tpu.memory_space<vmem>>, vector<1x2x16x128xbf16>,
      %244 = arith.truncf %237 : vector<16x256xf32> to vector<16x256xbf16>
      %245 = vector.shape_cast %244 : vector<16x256xbf16> to vector<16x2x128xbf16>
      %246 = tpu.transpose %245, [1, 0, 2] : vector<16x2x128xbf16> -> vector<2x16x128xbf16>
      %c1_152 = arith.constant 1 : index
      %c0_153 = arith.constant 0 : index
      %c0_154 = arith.constant 0 : index
      %c0_155 = arith.constant 0 : index
      %247 = vector.load %arg19[%c1_152, %c0_153, %c0_154, %c0_155] : memref<2x2x16x128xbf16, #tpu.memory_space<vmem>>, vector<1x2x16x128xbf16>
      %248 = vector.shape_cast %247 : vector<1x2x16x128xbf16> to vector<2x16x128xbf16>
      %249 = vector.shape_cast %246 : vector<2x16x128xbf16> to vector<1x2x16x128xbf16>
      tpu.vector_store %arg19[%c1_152, %c0_153, %c0_154, %c0_155], %249 {strides = array<i32>} : memref<2x2x16x128xbf16, #tpu.memory_space<vmem>>, vector<1x2x16x128xbf16>,
    } else {
    }
    %c8_i32 = arith.constant 8 : i32
    %9 = arith.muli %arg1, %c8_i32 : i32
    %10 = tpu.iota {dimensions = array<i32: 0>} : vector<8x16xi32>
    %11 = vector.broadcast %9 : i32 to vector<8x16xi32>
    %12 = arith.addi %11, %10 : vector<8x16xi32>
    %13 = tpu.iota {dimensions = array<i32: 1>} : vector<8x16xi32>
    %14 = arith.cmpi sle, %13, %12 : vector<8x16xi32>
    %cst = arith.constant 0.000000e+00 : f32
    %cst_9 = arith.constant -1.000000e+04 : f32
    %15 = vector.broadcast %cst : f32 to vector<8x16xf32>
    %16 = vector.broadcast %cst_9 : f32 to vector<8x16xf32>
    %17 = arith.select %14, %15, %16 : vector<8x16xi1>, vector<8x16xf32>
    %18 = vector.broadcast %3 : vector<1x16xf32> to vector<8x16xf32>
    %19 = arith.addf %17, %18 : vector<8x16xf32>
    %20 = arith.extf %1 : vector<8x256xbf16> to vector<8x256xf32>
    %c0_10 = arith.constant 0 : index
    %c0_11 = arith.constant 0 : index
    %c0_12 = arith.constant 0 : index
    %21 = vector.load %arg7[%c0_10, %c0_11, %c0_12] : memref<4x256x256xbf16, #tpu.memory_space<vmem>>, vector<1x256x256xbf16>
    %22 = vector.shape_cast %21 : vector<1x256x256xbf16> to vector<256x256xbf16>
    %c0_13 = arith.constant 0 : index
    %c0_14 = arith.constant 0 : index
    %c0_15 = arith.constant 0 : index
    %23 = vector.load %arg8[%c0_13, %c0_14, %c0_15] : memref<4x1x256xf32, #tpu.memory_space<vmem>>, vector<1x1x256xf32>
    %24 = vector.shape_cast %23 : vector<1x1x256xf32> to vector<1x256xf32>
    %c3 = arith.constant 3 : index
    %c0_16 = arith.constant 0 : index
    %c0_17 = arith.constant 0 : index
    %25 = vector.load %arg7[%c3, %c0_16, %c0_17] : memref<4x256x256xbf16, #tpu.memory_space<vmem>>, vector<1x256x256xbf16>
    %26 = vector.shape_cast %25 : vector<1x256x256xbf16> to vector<256x256xbf16>
    %c3_18 = arith.constant 3 : index
    %c0_19 = arith.constant 0 : index
    %c0_20 = arith.constant 0 : index
    %27 = vector.load %arg8[%c3_18, %c0_19, %c0_20] : memref<4x1x256xf32, #tpu.memory_space<vmem>>, vector<1x1x256xf32>
    %28 = vector.shape_cast %27 : vector<1x1x256xf32> to vector<1x256xf32>
    %cst_21 = arith.constant dense<0.000000e+00> : vector<8x256xf32>
    %29 = tpu.matmul %1, %22, %cst_21 {dimension_numbers = #tpu.dot_dimension_numbers<[1], [0], [0], [1], [0, 0, 1, 1], [], []>} : vector<8x256xbf16>, vector<256x256xbf16>, vector<8x256xf32> -> vector<8x256xf32>
    %30 = vector.broadcast %24 : vector<1x256xf32> to vector<8x256xf32>
    %31 = arith.addf %29, %30 : vector<8x256xf32>
    %32 = arith.truncf %31 : vector<8x256xf32> to vector<8x256xbf16>
    %33 = vector.shape_cast %32 : vector<8x256xbf16> to vector<8x2x128xbf16>
    %34 = tpu.transpose %33, [1, 0, 2] : vector<8x2x128xbf16> -> vector<2x8x128xbf16>
    %c0_22 = arith.constant 0 : index
    %c0_23 = arith.constant 0 : index
    %c0_24 = arith.constant 0 : index
    %c0_25 = arith.constant 0 : index
    %35 = vector.load %arg18[%c0_22, %c0_23, %c0_24, %c0_25] : memref<2x2x16x128xbf16, #tpu.memory_space<vmem>>, vector<1x2x16x128xbf16>
    %36 = vector.shape_cast %35 : vector<1x2x16x128xbf16> to vector<2x16x128xbf16>
    %c1 = arith.constant 1 : index
    %c0_26 = arith.constant 0 : index
    %c0_27 = arith.constant 0 : index
    %c0_28 = arith.constant 0 : index
    %37 = vector.load %arg18[%c1, %c0_26, %c0_27, %c0_28] : memref<2x2x16x128xbf16, #tpu.memory_space<vmem>>, vector<1x2x16x128xbf16>
    %38 = vector.shape_cast %37 : vector<1x2x16x128xbf16> to vector<2x16x128xbf16>
    "tpu.trace_start"() <{level = 10 : i32, message = "nqd,nkd->nqk"}> : () -> ()
    %cst_29 = arith.constant dense<0.000000e+00> : vector<2x8x16xf32>
    %39 = tpu.matmul %34, %36, %cst_29 {dimension_numbers = #tpu.dot_dimension_numbers<[2], [2], [1], [1], [0, 0, 0, 1, 1, 1], [0], [0]>} : vector<2x8x128xbf16>, vector<2x16x128xbf16>, vector<2x8x16xf32> -> vector<2x8x16xf32>
    "tpu.trace_stop"() : () -> ()
    %40 = vector.shape_cast %19 : vector<8x16xf32> to vector<1x8x16xf32>
    %41 = vector.broadcast %40 : vector<1x8x16xf32> to vector<2x8x16xf32>
    %42 = arith.addf %39, %41 : vector<2x8x16xf32>
    %cst_30 = arith.constant dense<0xFF800000> : vector<2x8xf32>
    %43 = vector.multi_reduction <maximumf>, %42, %cst_30 [2] : vector<2x8x16xf32> to vector<2x8xf32>
    %44 = vector.shape_cast %43 : vector<2x8xf32> to vector<2x8x1xf32>
    %45 = vector.broadcast %44 : vector<2x8x1xf32> to vector<2x8x16xf32>
    %46 = arith.subf %42, %45 : vector<2x8x16xf32>
    %47 = math.exp %46 : vector<2x8x16xf32>
    %cst_31 = arith.constant dense<0.000000e+00> : vector<2x8xf32>
    %48 = vector.multi_reduction <add>, %47, %cst_31 [2] : vector<2x8x16xf32> to vector<2x8xf32>
    %49 = vector.shape_cast %48 : vector<2x8xf32> to vector<2x8x1xf32>
    %50 = tpu.reciprocal %49 {approx = true} : vector<2x8x1xf32> -> vector<2x8x1xf32>
    %51 = vector.broadcast %50 : vector<2x8x1xf32> to vector<2x8x16xf32>
    %52 = arith.mulf %47, %51 : vector<2x8x16xf32>
    %53 = arith.truncf %52 : vector<2x8x16xf32> to vector<2x8x16xbf16>
    "tpu.trace_start"() <{level = 10 : i32, message = "nqk,nkd->nqd"}> : () -> ()
    %cst_32 = arith.constant dense<0.000000e+00> : vector<2x8x128xf32>
    %54 = tpu.matmul %53, %38, %cst_32 {dimension_numbers = #tpu.dot_dimension_numbers<[2], [1], [1], [2], [0, 0, 0, 1, 1, 2], [0], [0]>} : vector<2x8x16xbf16>, vector<2x16x128xbf16>, vector<2x8x128xf32> -> vector<2x8x128xf32>
    "tpu.trace_stop"() : () -> ()
    %55 = tpu.transpose %54, [1, 0, 2] : vector<2x8x128xf32> -> vector<8x2x128xf32>
    %56 = vector.shape_cast %55 : vector<8x2x128xf32> to vector<8x256xf32>
    %57 = arith.truncf %56 : vector<8x256xf32> to vector<8x256xbf16>
    %cst_33 = arith.constant dense<0.000000e+00> : vector<8x256xf32>
    %58 = tpu.matmul %57, %26, %cst_33 {dimension_numbers = #tpu.dot_dimension_numbers<[1], [0], [0], [1], [0, 0, 1, 1], [], []>} : vector<8x256xbf16>, vector<256x256xbf16>, vector<8x256xf32> -> vector<8x256xf32>
    %59 = vector.broadcast %28 : vector<1x256xf32> to vector<8x256xf32>
    %60 = arith.addf %58, %59 : vector<8x256xf32>
    %61 = arith.addf %60, %20 : vector<8x256xf32>
    %c0_34 = arith.constant 0 : index
    %c0_35 = arith.constant 0 : index
    %c0_36 = arith.constant 0 : index
    %62 = vector.load %arg15[%c0_34, %c0_35, %c0_36] : memref<3x1x256xf32, #tpu.memory_space<vmem>>, vector<1x1x256xf32>
    %63 = vector.shape_cast %62 : vector<1x1x256xf32> to vector<1x256xf32>
    %c0_37 = arith.constant 0 : index
    %c0_38 = arith.constant 0 : index
    %c0_39 = arith.constant 0 : index
    %64 = vector.load %arg16[%c0_37, %c0_38, %c0_39] : memref<3x1x256xf32, #tpu.memory_space<vmem>>, vector<1x1x256xf32>
    %65 = vector.shape_cast %64 : vector<1x1x256xf32> to vector<1x256xf32>
    %cst_40 = arith.constant dense<0.000000e+00> : vector<8xf32>
    %66 = vector.multi_reduction <add>, %61, %cst_40 [1] : vector<8x256xf32> to vector<8xf32>
    %67 = vector.shape_cast %66 : vector<8xf32> to vector<8x1xf32>
    %cst_41 = arith.constant 2.560000e+02 : f32
    %68 = vector.broadcast %cst_41 : f32 to vector<8x1xf32>
    %69 = arith.divf %67, %68 : vector<8x1xf32>
    %70 = vector.broadcast %69 : vector<8x1xf32> to vector<8x256xf32>
    %71 = arith.subf %61, %70 : vector<8x256xf32>
    %72 = arith.mulf %71, %71 : vector<8x256xf32>
    %cst_42 = arith.constant dense<0.000000e+00> : vector<8xf32>
    %73 = vector.multi_reduction <add>, %72, %cst_42 [1] : vector<8x256xf32> to vector<8xf32>
    %74 = vector.shape_cast %73 : vector<8xf32> to vector<8x1xf32>
    %cst_43 = arith.constant 2.560000e+02 : f32
    %75 = vector.broadcast %cst_43 : f32 to vector<8x1xf32>
    %76 = arith.divf %74, %75 : vector<8x1xf32>
    %cst_44 = arith.constant 9.99999974E-6 : f32
    %77 = vector.broadcast %cst_44 : f32 to vector<8x1xf32>
    %78 = arith.addf %76, %77 : vector<8x1xf32>
    %79 = math.rsqrt %78 : vector<8x1xf32>
    %80 = vector.broadcast %79 : vector<8x1xf32> to vector<8x256xf32>
    %81 = arith.mulf %71, %80 : vector<8x256xf32>
    %82 = vector.broadcast %63 : vector<1x256xf32> to vector<8x256xf32>
    %83 = arith.mulf %81, %82 : vector<8x256xf32>
    %84 = vector.broadcast %65 : vector<1x256xf32> to vector<8x256xf32>
    %85 = arith.addf %83, %84 : vector<8x256xf32>
    %86 = arith.truncf %85 : vector<8x256xf32> to vector<8x256xbf16>
    %c0_45 = arith.constant 0 : index
    %c0_46 = arith.constant 0 : index
    %c0_47 = arith.constant 0 : index
    %87 = vector.load %arg9[%c0_45, %c0_46, %c0_47] : memref<4x256x256xbf16, #tpu.memory_space<vmem>>, vector<1x256x256xbf16>
    %88 = vector.shape_cast %87 : vector<1x256x256xbf16> to vector<256x256xbf16>
    %c0_48 = arith.constant 0 : index
    %c0_49 = arith.constant 0 : index
    %c0_50 = arith.constant 0 : index
    %89 = vector.load %arg10[%c0_48, %c0_49, %c0_50] : memref<4x1x256xf32, #tpu.memory_space<vmem>>, vector<1x1x256xf32>
    %90 = vector.shape_cast %89 : vector<1x1x256xf32> to vector<1x256xf32>
    %c3_51 = arith.constant 3 : index
    %c0_52 = arith.constant 0 : index
    %c0_53 = arith.constant 0 : index
    %91 = vector.load %arg9[%c3_51, %c0_52, %c0_53] : memref<4x256x256xbf16, #tpu.memory_space<vmem>>, vector<1x256x256xbf16>
    %92 = vector.shape_cast %91 : vector<1x256x256xbf16> to vector<256x256xbf16>
    %c3_54 = arith.constant 3 : index
    %c0_55 = arith.constant 0 : index
    %c0_56 = arith.constant 0 : index
    %93 = vector.load %arg10[%c3_54, %c0_55, %c0_56] : memref<4x1x256xf32, #tpu.memory_space<vmem>>, vector<1x1x256xf32>
    %94 = vector.shape_cast %93 : vector<1x1x256xf32> to vector<1x256xf32>
    %cst_57 = arith.constant dense<0.000000e+00> : vector<8x256xf32>
    %95 = tpu.matmul %86, %88, %cst_57 {dimension_numbers = #tpu.dot_dimension_numbers<[1], [0], [0], [1], [0, 0, 1, 1], [], []>} : vector<8x256xbf16>, vector<256x256xbf16>, vector<8x256xf32> -> vector<8x256xf32>
    %96 = vector.broadcast %90 : vector<1x256xf32> to vector<8x256xf32>
    %97 = arith.addf %95, %96 : vector<8x256xf32>
    %98 = arith.truncf %97 : vector<8x256xf32> to vector<8x256xbf16>
    %99 = vector.shape_cast %98 : vector<8x256xbf16> to vector<8x2x128xbf16>
    %100 = tpu.transpose %99, [1, 0, 2] : vector<8x2x128xbf16> -> vector<2x8x128xbf16>
    %c0_58 = arith.constant 0 : index
    %c0_59 = arith.constant 0 : index
    %c0_60 = arith.constant 0 : index
    %c0_61 = arith.constant 0 : index
    %101 = vector.load %arg19[%c0_58, %c0_59, %c0_60, %c0_61] : memref<2x2x16x128xbf16, #tpu.memory_space<vmem>>, vector<1x2x16x128xbf16>
    %102 = vector.shape_cast %101 : vector<1x2x16x128xbf16> to vector<2x16x128xbf16>
    %c1_62 = arith.constant 1 : index
    %c0_63 = arith.constant 0 : index
    %c0_64 = arith.constant 0 : index
    %c0_65 = arith.constant 0 : index
    %103 = vector.load %arg19[%c1_62, %c0_63, %c0_64, %c0_65] : memref<2x2x16x128xbf16, #tpu.memory_space<vmem>>, vector<1x2x16x128xbf16>
    %104 = vector.shape_cast %103 : vector<1x2x16x128xbf16> to vector<2x16x128xbf16>
    "tpu.trace_start"() <{level = 10 : i32, message = "nqd,nkd->nqk"}> : () -> ()
    %cst_66 = arith.constant dense<0.000000e+00> : vector<2x8x16xf32>
    %105 = tpu.matmul %100, %102, %cst_66 {dimension_numbers = #tpu.dot_dimension_numbers<[2], [2], [1], [1], [0, 0, 0, 1, 1, 1], [0], [0]>} : vector<2x8x128xbf16>, vector<2x16x128xbf16>, vector<2x8x16xf32> -> vector<2x8x16xf32>
    "tpu.trace_stop"() : () -> ()
    %106 = vector.shape_cast %5 : vector<1x16xf32> to vector<1x1x16xf32>
    %107 = vector.broadcast %106 : vector<1x1x16xf32> to vector<2x8x16xf32>
    %108 = arith.addf %105, %107 : vector<2x8x16xf32>
    %cst_67 = arith.constant dense<0xFF800000> : vector<2x8xf32>
    %109 = vector.multi_reduction <maximumf>, %108, %cst_67 [2] : vector<2x8x16xf32> to vector<2x8xf32>
    %110 = vector.shape_cast %109 : vector<2x8xf32> to vector<2x8x1xf32>
    %111 = vector.broadcast %110 : vector<2x8x1xf32> to vector<2x8x16xf32>
    %112 = arith.subf %108, %111 : vector<2x8x16xf32>
    %113 = math.exp %112 : vector<2x8x16xf32>
    %cst_68 = arith.constant dense<0.000000e+00> : vector<2x8xf32>
    %114 = vector.multi_reduction <add>, %113, %cst_68 [2] : vector<2x8x16xf32> to vector<2x8xf32>
    %115 = vector.shape_cast %114 : vector<2x8xf32> to vector<2x8x1xf32>
    %116 = tpu.reciprocal %115 {approx = true} : vector<2x8x1xf32> -> vector<2x8x1xf32>
    %117 = vector.broadcast %116 : vector<2x8x1xf32> to vector<2x8x16xf32>
    %118 = arith.mulf %113, %117 : vector<2x8x16xf32>
    %119 = arith.truncf %118 : vector<2x8x16xf32> to vector<2x8x16xbf16>
    "tpu.trace_start"() <{level = 10 : i32, message = "nqk,nkd->nqd"}> : () -> ()
    %cst_69 = arith.constant dense<0.000000e+00> : vector<2x8x128xf32>
    %120 = tpu.matmul %119, %104, %cst_69 {dimension_numbers = #tpu.dot_dimension_numbers<[2], [1], [1], [2], [0, 0, 0, 1, 1, 2], [0], [0]>} : vector<2x8x16xbf16>, vector<2x16x128xbf16>, vector<2x8x128xf32> -> vector<2x8x128xf32>
    "tpu.trace_stop"() : () -> ()
    %121 = tpu.transpose %120, [1, 0, 2] : vector<2x8x128xf32> -> vector<8x2x128xf32>
    %122 = vector.shape_cast %121 : vector<8x2x128xf32> to vector<8x256xf32>
    %123 = arith.truncf %122 : vector<8x256xf32> to vector<8x256xbf16>
    %cst_70 = arith.constant dense<0.000000e+00> : vector<8x256xf32>
    %124 = tpu.matmul %123, %92, %cst_70 {dimension_numbers = #tpu.dot_dimension_numbers<[1], [0], [0], [1], [0, 0, 1, 1], [], []>} : vector<8x256xbf16>, vector<256x256xbf16>, vector<8x256xf32> -> vector<8x256xf32>
    %125 = vector.broadcast %94 : vector<1x256xf32> to vector<8x256xf32>
    %126 = arith.addf %124, %125 : vector<8x256xf32>
    %127 = arith.addf %126, %85 : vector<8x256xf32>
    %c1_71 = arith.constant 1 : index
    %c0_72 = arith.constant 0 : index
    %c0_73 = arith.constant 0 : index
    %128 = vector.load %arg15[%c1_71, %c0_72, %c0_73] : memref<3x1x256xf32, #tpu.memory_space<vmem>>, vector<1x1x256xf32>
    %129 = vector.shape_cast %128 : vector<1x1x256xf32> to vector<1x256xf32>
    %c1_74 = arith.constant 1 : index
    %c0_75 = arith.constant 0 : index
    %c0_76 = arith.constant 0 : index
    %130 = vector.load %arg16[%c1_74, %c0_75, %c0_76] : memref<3x1x256xf32, #tpu.memory_space<vmem>>, vector<1x1x256xf32>
    %131 = vector.shape_cast %130 : vector<1x1x256xf32> to vector<1x256xf32>
    %cst_77 = arith.constant dense<0.000000e+00> : vector<8xf32>
    %132 = vector.multi_reduction <add>, %127, %cst_77 [1] : vector<8x256xf32> to vector<8xf32>
    %133 = vector.shape_cast %132 : vector<8xf32> to vector<8x1xf32>
    %cst_78 = arith.constant 2.560000e+02 : f32
    %134 = vector.broadcast %cst_78 : f32 to vector<8x1xf32>
    %135 = arith.divf %133, %134 : vector<8x1xf32>
    %136 = vector.broadcast %135 : vector<8x1xf32> to vector<8x256xf32>
    %137 = arith.subf %127, %136 : vector<8x256xf32>
    %138 = arith.mulf %137, %137 : vector<8x256xf32>
    %cst_79 = arith.constant dense<0.000000e+00> : vector<8xf32>
    %139 = vector.multi_reduction <add>, %138, %cst_79 [1] : vector<8x256xf32> to vector<8xf32>
    %140 = vector.shape_cast %139 : vector<8xf32> to vector<8x1xf32>
    %cst_80 = arith.constant 2.560000e+02 : f32
    %141 = vector.broadcast %cst_80 : f32 to vector<8x1xf32>
    %142 = arith.divf %140, %141 : vector<8x1xf32>
    %cst_81 = arith.constant 9.99999974E-6 : f32
    %143 = vector.broadcast %cst_81 : f32 to vector<8x1xf32>
    %144 = arith.addf %142, %143 : vector<8x1xf32>
    %145 = math.rsqrt %144 : vector<8x1xf32>
    %146 = vector.broadcast %145 : vector<8x1xf32> to vector<8x256xf32>
    %147 = arith.mulf %137, %146 : vector<8x256xf32>
    %148 = vector.broadcast %129 : vector<1x256xf32> to vector<8x256xf32>
    %149 = arith.mulf %147, %148 : vector<8x256xf32>
    %150 = vector.broadcast %131 : vector<1x256xf32> to vector<8x256xf32>
    %151 = arith.addf %149, %150 : vector<8x256xf32>
    %152 = arith.truncf %151 : vector<8x256xf32> to vector<8x256xbf16>
    %c0_82 = arith.constant 0 : index
    %c0_83 = arith.constant 0 : index
    %153 = vector.load %arg11[%c0_82, %c0_83] : memref<256x512xbf16, #tpu.memory_space<vmem>>, vector<256x512xbf16>
    %cst_84 = arith.constant dense<0.000000e+00> : vector<8x512xf32>
    %154 = tpu.matmul %152, %153, %cst_84 {dimension_numbers = #tpu.dot_dimension_numbers<[1], [0], [0], [1], [0, 0, 1, 1], [], []>} : vector<8x256xbf16>, vector<256x512xbf16>, vector<8x512xf32> -> vector<8x512xf32>
    %c0_85 = arith.constant 0 : index
    %c0_86 = arith.constant 0 : index
    %155 = vector.load %arg12[%c0_85, %c0_86] : memref<1x512xf32, #tpu.memory_space<vmem>>, vector<1x512xf32>
    %156 = vector.broadcast %155 : vector<1x512xf32> to vector<8x512xf32>
    %157 = arith.addf %154, %156 : vector<8x512xf32>
    %cst_87 = arith.constant 0.000000e+00 : f32
    %158 = vector.broadcast %cst_87 : f32 to vector<8x512xf32>
    %159 = arith.maximumf %157, %158 : vector<8x512xf32>
    %160 = arith.truncf %159 : vector<8x512xf32> to vector<8x512xbf16>
    %c0_88 = arith.constant 0 : index
    %c0_89 = arith.constant 0 : index
    %161 = vector.load %arg13[%c0_88, %c0_89] : memref<512x256xbf16, #tpu.memory_space<vmem>>, vector<512x256xbf16>
    %cst_90 = arith.constant dense<0.000000e+00> : vector<8x256xf32>
    %162 = tpu.matmul %160, %161, %cst_90 {dimension_numbers = #tpu.dot_dimension_numbers<[1], [0], [0], [1], [0, 0, 1, 1], [], []>} : vector<8x512xbf16>, vector<512x256xbf16>, vector<8x256xf32> -> vector<8x256xf32>
    %c0_91 = arith.constant 0 : index
    %c0_92 = arith.constant 0 : index
    %163 = vector.load %arg14[%c0_91, %c0_92] : memref<1x256xf32, #tpu.memory_space<vmem>>, vector<1x256xf32>
    %164 = vector.broadcast %163 : vector<1x256xf32> to vector<8x256xf32>
    %165 = arith.addf %162, %164 : vector<8x256xf32>
    %166 = arith.addf %165, %151 : vector<8x256xf32>
    %c2 = arith.constant 2 : index
    %c0_93 = arith.constant 0 : index
    %c0_94 = arith.constant 0 : index
    %167 = vector.load %arg15[%c2, %c0_93, %c0_94] : memref<3x1x256xf32, #tpu.memory_space<vmem>>, vector<1x1x256xf32>
    %168 = vector.shape_cast %167 : vector<1x1x256xf32> to vector<1x256xf32>
    %c2_95 = arith.constant 2 : index
    %c0_96 = arith.constant 0 : index
    %c0_97 = arith.constant 0 : index
    %169 = vector.load %arg16[%c2_95, %c0_96, %c0_97] : memref<3x1x256xf32, #tpu.memory_space<vmem>>, vector<1x1x256xf32>
    %170 = vector.shape_cast %169 : vector<1x1x256xf32> to vector<1x256xf32>
    %cst_98 = arith.constant dense<0.000000e+00> : vector<8xf32>
    %171 = vector.multi_reduction <add>, %166, %cst_98 [1] : vector<8x256xf32> to vector<8xf32>
    %172 = vector.shape_cast %171 : vector<8xf32> to vector<8x1xf32>
    %cst_99 = arith.constant 2.560000e+02 : f32
    %173 = vector.broadcast %cst_99 : f32 to vector<8x1xf32>
    %174 = arith.divf %172, %173 : vector<8x1xf32>
    %175 = vector.broadcast %174 : vector<8x1xf32> to vector<8x256xf32>
    %176 = arith.subf %166, %175 : vector<8x256xf32>
    %177 = arith.mulf %176, %176 : vector<8x256xf32>
    %cst_100 = arith.constant dense<0.000000e+00> : vector<8xf32>
    %178 = vector.multi_reduction <add>, %177, %cst_100 [1] : vector<8x256xf32> to vector<8xf32>
    %179 = vector.shape_cast %178 : vector<8xf32> to vector<8x1xf32>
    %cst_101 = arith.constant 2.560000e+02 : f32
    %180 = vector.broadcast %cst_101 : f32 to vector<8x1xf32>
    %181 = arith.divf %179, %180 : vector<8x1xf32>
    %cst_102 = arith.constant 9.99999974E-6 : f32
    %182 = vector.broadcast %cst_102 : f32 to vector<8x1xf32>
    %183 = arith.addf %181, %182 : vector<8x1xf32>
    %184 = math.rsqrt %183 : vector<8x1xf32>
    %185 = vector.broadcast %184 : vector<8x1xf32> to vector<8x256xf32>
    %186 = arith.mulf %176, %185 : vector<8x256xf32>
    %187 = vector.broadcast %168 : vector<1x256xf32> to vector<8x256xf32>
    %188 = arith.mulf %186, %187 : vector<8x256xf32>
    %189 = vector.broadcast %170 : vector<1x256xf32> to vector<8x256xf32>
    %190 = arith.addf %188, %189 : vector<8x256xf32>
    %c0_103 = arith.constant 0 : index
    %c0_104 = arith.constant 0 : index
    %c0_105 = arith.constant 0 : index
    %191 = vector.load %arg17[%c0_103, %c0_104, %c0_105] : memref<1x8x256xf32, #tpu.memory_space<vmem>>, vector<1x8x256xf32>
    %192 = vector.shape_cast %191 : vector<1x8x256xf32> to vector<8x256xf32>
    %193 = vector.shape_cast %190 : vector<8x256xf32> to vector<1x8x256xf32>
    tpu.vector_store %arg17[%c0_103, %c0_104, %c0_105], %193 {strides = array<i32>} : memref<1x8x256xf32, #tpu.memory_space<vmem>>, vector<1x8x256xf32>,
    return
  }
  func.func @transform_0(%arg0: i32, %arg1: i32) -> (i32, i32, i32) {
    %c0_i32 = arith.constant 0 : i32
    %c0_i32_0 = arith.constant 0 : i32
    return %arg0, %arg1, %c0_i32 : i32, i32, i32
  }
  func.func @transform_1(%arg0: i32, %arg1: i32) -> (i32, i32, i32) {
    %c0_i32 = arith.constant 0 : i32
    %c0_i32_0 = arith.constant 0 : i32
    %c0_i32_1 = arith.constant 0 : i32
    return %arg0, %c0_i32, %c0_i32_0 : i32, i32, i32
  }
  func.func @transform_2(%arg0: i32, %arg1: i32) -> (i32, i32, i32) {
    %c0_i32 = arith.constant 0 : i32
    %c0_i32_0 = arith.constant 0 : i32
    %c0_i32_1 = arith.constant 0 : i32
    return %arg0, %c0_i32, %c0_i32_0 : i32, i32, i32
  }
  func.func @transform_3(%arg0: i32, %arg1: i32) -> (i32, i32, i32) {
    %c0_i32 = arith.constant 0 : i32
    %c0_i32_0 = arith.constant 0 : i32
    %c0_i32_1 = arith.constant 0 : i32
    return %arg0, %c0_i32, %c0_i32_0 : i32, i32, i32
  }
  func.func @transform_4(%arg0: i32, %arg1: i32) -> (i32, i32, i32) {
    %c0_i32 = arith.constant 0 : i32
    %c0_i32_0 = arith.constant 0 : i32
    %c0_i32_1 = arith.constant 0 : i32
    return %arg0, %c0_i32, %c0_i32_0 : i32, i32, i32
  }
  func.func @transform_5(%arg0: i32, %arg1: i32) -> (i32, i32, i32) {
    %c0_i32 = arith.constant 0 : i32
    %c0_i32_0 = arith.constant 0 : i32
    %c0_i32_1 = arith.constant 0 : i32
    %c0_i32_2 = arith.constant 0 : i32
    return %c0_i32, %c0_i32_0, %c0_i32_1 : i32, i32, i32
  }
  func.func @transform_6(%arg0: i32, %arg1: i32) -> (i32, i32, i32) {
    %c0_i32 = arith.constant 0 : i32
    %c0_i32_0 = arith.constant 0 : i32
    %c0_i32_1 = arith.constant 0 : i32
    %c0_i32_2 = arith.constant 0 : i32
    return %c0_i32, %c0_i32_0, %c0_i32_1 : i32, i32, i32
  }
  func.func @transform_7(%arg0: i32, %arg1: i32) -> (i32, i32, i32) {
    %c0_i32 = arith.constant 0 : i32
    %c0_i32_0 = arith.constant 0 : i32
    %c0_i32_1 = arith.constant 0 : i32
    %c0_i32_2 = arith.constant 0 : i32
    return %c0_i32, %c0_i32_0, %c0_i32_1 : i32, i32, i32
  }
  func.func @transform_8(%arg0: i32, %arg1: i32) -> (i32, i32, i32) {
    %c0_i32 = arith.constant 0 : i32
    %c0_i32_0 = arith.constant 0 : i32
    %c0_i32_1 = arith.constant 0 : i32
    %c0_i32_2 = arith.constant 0 : i32
    return %c0_i32, %c0_i32_0, %c0_i32_1 : i32, i32, i32
  }
  func.func @transform_9(%arg0: i32, %arg1: i32) -> (i32, i32) {
    %c0_i32 = arith.constant 0 : i32
    %c0_i32_0 = arith.constant 0 : i32
    %c0_i32_1 = arith.constant 0 : i32
    return %c0_i32, %c0_i32_0 : i32, i32
  }
  func.func @transform_10(%arg0: i32, %arg1: i32) -> (i32, i32) {
    %c0_i32 = arith.constant 0 : i32
    %c0_i32_0 = arith.constant 0 : i32
    %c0_i32_1 = arith.constant 0 : i32
    return %c0_i32, %c0_i32_0 : i32, i32
  }
  func.func @transform_11(%arg0: i32, %arg1: i32) -> (i32, i32) {
    %c0_i32 = arith.constant 0 : i32
    %c0_i32_0 = arith.constant 0 : i32
    %c0_i32_1 = arith.constant 0 : i32
    return %c0_i32, %c0_i32_0 : i32, i32
  }
  func.func @transform_12(%arg0: i32, %arg1: i32) -> (i32, i32) {
    %c0_i32 = arith.constant 0 : i32
    %c0_i32_0 = arith.constant 0 : i32
    %c0_i32_1 = arith.constant 0 : i32
    return %c0_i32, %c0_i32_0 : i32, i32
  }
  func.func @transform_13(%arg0: i32, %arg1: i32) -> (i32, i32, i32) {
    %c0_i32 = arith.constant 0 : i32
    %c0_i32_0 = arith.constant 0 : i32
    %c0_i32_1 = arith.constant 0 : i32
    %c0_i32_2 = arith.constant 0 : i32
    return %c0_i32, %c0_i32_0, %c0_i32_1 : i32, i32, i32
  }
  func.func @transform_14(%arg0: i32, %arg1: i32) -> (i32, i32, i32) {
    %c0_i32 = arith.constant 0 : i32
    %c0_i32_0 = arith.constant 0 : i32
    %c0_i32_1 = arith.constant 0 : i32
    %c0_i32_2 = arith.constant 0 : i32
    return %c0_i32, %c0_i32_0, %c0_i32_1 : i32, i32, i32
  }
  func.func @transform_15(%arg0: i32, %arg1: i32) -> (i32, i32, i32) {
    %c0_i32 = arith.constant 0 : i32
    %c0_i32_0 = arith.constant 0 : i32
    return %arg0, %arg1, %c0_i32 : i32, i32, i32
  }
}

</mosaic_0001>

<bundles_post_ra>
// kernel: tpu_custom_call.1
= control target key start
LH: loop header
LB: loop body
LE: loop exit
PB: predicated region body
PF: predicated region fallthrough
CT: control target
= control target key end

     0   :  { %s8635_s0 = inlined_call_operand.hbm [shape: bf16[2,16,256], index: 0, kind: input, shape index: {}]   ;;  %s8636_s1 = inlined_call_operand.hbm [shape: f32[2,1,16], index: 1, kind: input, shape index: {}]   ;;  %s8637_s2 = inlined_call_operand.hbm [shape: bf16[2,16,256], index: 2, kind: input, shape index: {}]   ;;  %s8638_s3 = inlined_call_operand.hbm [shape: bf16[2,16,256], index: 3, kind: input, shape index: {}]   ;;  %s8639_s4 = inlined_call_operand.hbm [shape: f32[2,1,16], index: 4, kind: input, shape index: {}]   ;;  %s8640_s5 = inlined_call_operand.hbm [shape: bf16[4,256,256], index: 5, kind: input, shape index: {}]   ;;  %s8641_s6 = inlined_call_operand.vmem [shape: f32[4,1,256], index: 6, kind: input, shape index: {}]   ;;  %s8642_s7 = inlined_call_operand.hbm [shape: bf16[4,256,256], index: 7, kind: input, shape index: {}]   ;;  %s8643_s8 = inlined_call_operand.vmem [shape: f32[4,1,256], index: 8, kind: input, shape index: {}]   ;;  %s8644_s9 = inlined_call_operand.hbm [shape: bf16[256,512], index: 9, kind: input, shape index: {}]   ;;  %s8645_s10 = inlined_call_operand.vmem [shape: f32[1,512], index: 10, kind: input, shape index: {}]   ;;  %s8646_s11 = inlined_call_operand.hbm [shape: bf16[512,256], index: 11, kind: input, shape index: {}]   ;;  %s8647_s12 = inlined_call_operand.vmem [shape: f32[1,256], index: 12, kind: input, shape index: {}]   ;;  %s8648_s13 = inlined_call_operand.vmem [shape: f32[3,1,256], index: 13, kind: input, shape index: {}]   ;;  %s8649_s14 = inlined_call_operand.vmem [shape: f32[3,1,256], index: 14, kind: input, shape index: {}]   ;;  %s8650_s15 = inlined_call_operand.hbm [shape: f32[2,16,256], index: 15, kind: output, shape index: {}]  }
   0x1   :  { %8698 = sst [smem:[#allocation41_spill]] %s8635_s0 }
   0x2   :  { %8699 = sst [smem:[#allocation42_spill]] %s8636_s1 }
   0x3   :  { %8700 = sst [smem:[#allocation43_spill]] %s8638_s3 }
   0x4   :  { %8701 = sst [smem:[#allocation44_spill]] %s8639_s4 }
   0x5   :  { %8702 = sst [smem:[#allocation45_spill]] %s8640_s5 }
   0x6   :  { %8703 = sst [smem:[#allocation46_spill]] %s8641_s6 }
   0x7   :  { %8704 = sst [smem:[#allocation47_spill]] %s8642_s7 }
   0x8   :  { %8705 = sst [smem:[#allocation48_spill]] %s8643_s8 }
   0x9   :  { %8706 = sst [smem:[#allocation49_spill]] %s8644_s9 }
   0xa   :  { %8707 = sst [smem:[#allocation50_spill]] %s8645_s10 }
   0xb   :  { %8708 = sst [smem:[#allocation51_spill]] %s8646_s11 }
   0xc   :  { %8709 = sst [smem:[#allocation52_spill]] %s8647_s12 }
   0xd   :  { %8710 = sst [smem:[#allocation53_spill]] %s8648_s13 }
   0xe   :  { %8711 = sst [smem:[#allocation54_spill]] %s8649_s14 }
   0xf   :  { %8712 = sst [smem:[#allocation55_spill]] %s8650_s15 }
  0x10   :  { %20 = vsyncpa [#allocation5], 0 }
  0x11   :  { %22 = vsyncpa [#allocation5 + $0x1], 0 }
  0x12   :  { %23 = vsyncpa [#allocation8], 0 }
  0x13   :  { %25 = vsyncpa [#allocation8 + $0x1], 0 }
  0x14   :  { %26 = vsyncpa [#allocation11], 0 }
  0x15   :  { %28 = vsyncpa [#allocation11 + $0x1], 0 }
  0x16   :  { %29 = vsyncpa [#allocation14], 0 }
  0x17   :  { %30 = vsyncpa [#allocation17], 0 }
  0x18   :  { %31 = vsyncpa [#allocation6], 0 }
  0x19   :  { %33 = vsyncpa [#allocation6 + $0x1], 0  ;;  %s7706_s18 = smov 0   ;;  %s7708_s19 = smov 0  }
  0x1a   :  { %s7710_s20 = smov 0   ;;  %s7712_s21 = smov 0  }
  0x1b   :  { %s7714_s22 = smov 0   ;;  %s7716_s23 = smov 0  }
  0x1c   :  { %s7718_s24 = smov 0   ;;  %s7720_s25 = smov 0  }
  0x1d   :  { %s7722_s26 = smov 0   ;;  %s7724_s27 = smov 0  }
  0x1e   :  { %s7726_s28 = smov 0  }
  0x1f LB: > { %8713 = sst [smem:[#allocation26_spill]] %s7565_s19  ;;  %s7762_s29 = sadd.s32 4294967295, %s7601_s28   ;;  %s7601_s28 = sphi %s7726_s28, %s39_s28   ;;  %s7597_s27 = sphi %s7724_s27, %s8810_s27   ;;  %s7593_s26 = sphi %s7722_s26, %s8809_s26   ;;  %s7589_s25 = sphi %s7720_s25, %s8808_s25   ;;  %s7585_s24 = sphi %s7718_s24, %s8807_s24   ;;  %s7581_s23 = sphi %s7716_s23, %s8806_s23   ;;  %s7577_s22 = sphi %s7714_s22, %s8805_s22   ;;  %s7573_s21 = sphi %s7712_s21, %s8801_s21   ;;  %s7569_s20 = sphi %s7710_s20, %s8804_s20   ;;  %s7565_s19 = sphi %s7708_s19, %s8800_s19   ;;  %s7561_s18 = sphi %s7706_s18, %s8799_s18  }
  0x20   : > { %8714 = sst [smem:[#allocation27_spill]] %s7569_s20  ;;  %p5894_p0 = scmp.ge.s32.totalorder %s7601_s28, 1 }
  0x21   : > { %8715 = sst [smem:[#allocation28_spill]] %s7573_s21  ;;  %p8659_p1 = scmp.eq.s32.totalorder %s7762_s29, 0 }
  0x22   : > { %8716 = sst [smem:[#allocation29_spill]] %s7577_s22  ;;  %p426_p2 = scmp.lt.s32.totalorder %s7601_s28, 5 }
  0x23   : > { %8717 = sst [smem:[#allocation30_spill]] %s7585_s24  ;;  %s7603_s16 = smov [#allocation13]  }
  0x24   : > { %8718 = sst [smem:[#allocation31_spill]] %s7589_s25  ;;  %p7767_p3 = pnand %p5894_p0, %p426_p2 }
  0x25   : > { %8719 = sst [smem:[#allocation32_spill]] %s7762_s29  ;;  %s438_s17 = sshll.u32 %s7603_s16, 4  ;;  %s439_s17 = int_to_ptr.vmem [resolvable:$true] %s438_s17 }
  0x26   : > { %s8720_s30 = scalar_select %p7767_p3, 1, 0 }
  0x27   : > { %p6449_p4 = pneg %p7767_p3  ;;  %s7604_s25 = smov [#allocation16]  }
  0x28   : > { %8721 = sst [smem:[#allocation33_spill]] %s8720_s30  ;;  %s470_s12 = sshll.u32 %s7604_s25, 4  ;;  %s7779_s12 = int_to_ptr.vmem [resolvable:$true] %s470_s12 }
  0x29   : > { %p7775_p5 = pnand %p6449_p4, %p8659_p1  ;;  %s8723_s5 = sld [smem:[#allocation45_spill]] }
  0x2b   : > { %s8722_s15 = scalar_select %p7775_p5, 1, 0 }
  0x2c   : > { %p7789_p7 = pneg %p7775_p5 }
  0x2e   : > { %s8724_s16 = scalar_select %p7789_p7, 1, 0 }
  0x2f   : > { %s7201_s13 = scalar_lea.hbm %s8723_s5, 16384 }
  0x30   : > { %p7202_p6 = scmp.ne.s32.totalorder %s8723_s5, %s7201_s13  ;;  %p7208_p10 = scmp.lt.u32.totalorder %s7201_s13, %s8723_s5 }
  0x32   : > { %p7204_p8 = pnand %p7789_p7, %p7202_p6 }
  0x34   : > { %p7205_p9 = pneg %p7204_p8 }
  0x36   : > { %p7210_p11 = pnand %p7208_p10, %p7205_p9 }
  0x38   : > { %7213 = shalt.err (!%p7210_p11)
}
  0x39   : > { %s7214_s10 = scalar_lea.vmem %s439_s17, 16384  ;;  %p7222_p2 = scmp.lt.s32.totalorder %s439_s17, %s439_s17 }
  0x3a   : > { %p7215_p12 = scmp.ne.s32.totalorder %s439_s17, %s7214_s10  ;;  %p7223_p4 = scmp.lt.s32.totalorder %s7214_s10, %s7214_s10 }
  0x3c   : > { %p7217_p13 = pnand %p7215_p12, %p7789_p7  ;;  %p7224_p1 = por %p7223_p4, %p7222_p2 }
  0x3e   : > { %p7218_p0 = pneg %p7217_p13 }
  0x40   : > { %p7225_p3 = pnand %p7224_p1, %p7218_p0 }
  0x42   : > { %7228 = shalt.err (!%p7225_p3)
}
  0x43   : > { %s8664_s6 = smov 128   ;;  %s8666_s8 = smov 8  }
  0x44   : > { %6452 = dma.hbm_to_vmem [thread:$0]  (!%p7775_p5), %s8723_s5, 16384, %s439_s17, [#allocation14], %s8664_s6, %s8664_s6, %s8666_s8  }
  0x45   : > { %s8725_s9 = sld [smem:[#allocation49_spill]] }
  0x4b   : > { %s7229_s30 = scalar_lea.hbm %s8725_s9, 8192 }
  0x4c   : > { %p7230_p1 = scmp.ne.s32.totalorder %s8725_s9, %s7229_s30  ;;  %p7236_p8 = scmp.lt.u32.totalorder %s7229_s30, %s8725_s9 }
  0x4e   : > { %p7232_p3 = pnand %p7230_p1, %p7789_p7 }
  0x50   : > { %p7233_p6 = pneg %p7232_p3 }
  0x52   : > { %p7238_p9 = pnand %p7236_p8, %p7233_p6 }
  0x54   : > { %7241 = shalt.err (!%p7238_p9)
}
  0x55   : > { %s7242_s17 = scalar_lea.vmem %s7779_s12, 8192  ;;  %p7250_p13 = scmp.lt.s32.totalorder %s7779_s12, %s7779_s12 }
  0x56   : > { %p7243_p10 = scmp.ne.s32.totalorder %s7779_s12, %s7242_s17  ;;  %p7251_p0 = scmp.lt.s32.totalorder %s7242_s17, %s7242_s17 }
  0x58   : > { %p7245_p11 = pnand %p7243_p10, %p7789_p7  ;;  %p7252_p2 = por %p7251_p0, %p7250_p13 }
  0x5a   : > { %p7246_p12 = pneg %p7245_p11 }
  0x5c   : > { %p7253_p4 = pnand %p7252_p2, %p7246_p12 }
  0x5e   : > { %7256 = shalt.err (!%p7253_p4)
}
  0x5f   : > { %s7607_s0 = smov 256   ;;  %s7608_s21 = smov 16  }
  0x60   : > { %6458 = dma.hbm_to_vmem [thread:$0]  (!%p7775_p5), %s8725_s9, 8192, %s7779_s12, [#allocation17], %s7607_s0, %s7607_s0, %s7608_s21  }
  0x61   : > { %p8670_p1 = scmp.eq.s32.totalorder %s7601_s28, 0  ;;  %p93_p3 = scmp.ne.s32.totalorder %s7569_s20, %s7565_s19 }
  0x62   : > { %p99_p6 = scmp.ne.s32.totalorder %s7565_s19, %s7561_s18  ;;  %p8669_p8 = scmp.lt.s32.totalorder %s7601_s28, 4 }
  0x63   : > { %s8671_s14 = sand.u32 1, %s7601_s28   ;;  %p95_p9 = por %p93_p3, %p8670_p1 }
  0x64   : > { %p8726_p10 = scmp.eq.s32.totalorder %s7762_s29, 0  ;;  %s7848_s25 = sand.u32 1, %s7569_s20  }
  0x65   : > { %8729 = sst [smem:[#allocation35_spill]] %s7848_s25  ;;  %s8668_s10 = sshll.u32 %s7597_s27, 4 }
  0x66   : > { %p7843_p11 = por %p99_p6, %p8726_p10  ;;  %s8730_s1 = sld [smem:[#allocation42_spill]] }
  0x67   : > { %s533_s18 = scalar_lea.vmem [#allocation7], %s7848_s25  ;;  %p7863_p12 = pnand %p8669_p8, %p95_p9 }
  0x68   : > { %s8727_s24 = scalar_select %p7843_p11, 1, 0 }
  0x69   : > { %s540_s21 = sshll.u32 %s533_s18, 4  ;;  %s7870_s13 = scalar_lea.sflag [#allocation8], %s8671_s14  ;;  %s7859_s21 = int_to_ptr.vmem [resolvable:$true] %s540_s21 }
  0x6a   : > { %8728 = sst [smem:[#allocation34_spill]] %s8727_s24  ;;  %p7876_p0 = pneg %p7863_p12 }
  0x6b   : > { %s8731_s22 = scalar_select %p7863_p12, 1, 0 }
  0x6c   : > { %s7856_s0 = scalar_lea.hbm %s8730_s1, %s8668_s10  ;;  %s7262_s8 = scalar_lea.hbm %s8730_s1, 32 }
  0x6d   : > { %s7257_s12 = scalar_lea.hbm %s7856_s0, 16  ;;  %p7263_p3 = scmp.lt.u32.totalorder %s7856_s0, %s8730_s1 }
  0x6e   : > { %p7258_p13 = scmp.ne.s32.totalorder %s7856_s0, %s7257_s12  ;;  %p7264_p6 = scmp.lt.u32.totalorder %s7262_s8, %s7257_s12 }
  0x6f   : > { %s8732_s17 = scalar_select %p7876_p0, 1, 0 }
  0x70   : > { %p7260_p2 = pnand %p7876_p0, %p7258_p13  ;;  %p7265_p9 = por %p7264_p6, %p7263_p3 }
  0x71   : > { %p7266_p10 = scmp.lt.u32.totalorder %s7257_s12, %s7856_s0 }
  0x72   : > { %p7261_p4 = pneg %p7260_p2 }
  0x73   : > { %p7267_p8 = por %p7266_p10, %p7265_p9 }
  0x75   : > { %p7268_p1 = pnand %p7267_p8, %p7261_p4 }
  0x77   : > { %7271 = shalt.err (!%p7268_p1)
}
  0x78   : > { %s7272_s14 = scalar_lea.vmem %s7859_s21, 16  ;;  %s7609_s6 = smov [#allocation7]  }
  0x79   : > { %p7273_p13 = scmp.ne.s32.totalorder %s7859_s21, %s7272_s14  ;;  %s7277_s18 = sshll.u32 %s7609_s6, 4  ;;  %s7278_s18 = int_to_ptr.vmem [resolvable:$false] %s7277_s18 }
  0x7a   : > { %s7279_s10 = scalar_lea.vmem %s7278_s18, 32  ;;  %p7280_p5 = scmp.lt.s32.totalorder %s7859_s21, %s7278_s18 }
  0x7b   : > { %p7275_p2 = pnand %p7273_p13, %p7876_p0  ;;  %p7281_p7 = scmp.lt.s32.totalorder %s7279_s10, %s7272_s14 }
  0x7d   : > { %p7276_p11 = pneg %p7275_p2  ;;  %p7282_p3 = por %p7281_p7, %p7280_p5 }
  0x7f   : > { %p7283_p6 = pnand %p7282_p3, %p7276_p11 }
  0x81   : > { %7286 = shalt.err (!%p7283_p6)
}
  0x82   : > { %6468 = dma.hbm_to_vmem [thread:$0]  (!%p7863_p12), %s7856_s0, 16, %s7859_s21, %s7870_s13  }
  0x83   : > { %s8733_s8 = sshll.u32 %s7848_s25, 4  ;;  %s8734_s6 = sshll.u32 %s7597_s27, 4 }
  0x84   : > { %s551_s30 = scalar_lea.vmem [#allocation9], %s8733_s8  ;;  %s8735_s4 = sld [smem:[#allocation44_spill]] }
  0x85   : > { %s558_s12 = sshll.u32 %s551_s30, 4  ;;  %s6355_s1 = sshll.u32 %s7597_s27, 8  ;;  %s7909_s12 = int_to_ptr.vmem [resolvable:$true] %s558_s12 }
  0x86   : > { %s7915_s24 = scalar_lea.hbm %s8637_s2, %s6355_s1  ;;  %s8737_s3 = sld [smem:[#allocation43_spill]] }
  0x87   : > { %s8738_s21 = smov %s8733_s8 }
  0x88   : > { %s572_s8 = scalar_lea.vmem [#allocation10], %s8738_s21 }
  0x89   : > { %s579_s30 = sshll.u32 %s572_s8, 4  ;;  %s7924_s30 = int_to_ptr.vmem [resolvable:$true] %s579_s30 }
  0x8a   : > { %s7907_s10 = scalar_lea.hbm %s8735_s4, %s8734_s6  ;;  %s8739_s6 = sand.u32 1, %s7601_s28  }
  0x8b   : > { %8736 = sst [smem:[#allocation36_spill]] %s7907_s10  ;;  %s7928_s14 = scalar_lea.sflag [#allocation11], %s8739_s6 }
  0x8c   : > { %s7920_s0 = scalar_lea.hbm %s8737_s3, %s6355_s1  ;;  %s7292_s19 = scalar_lea.hbm %s8737_s3, 512 }
  0x8d   : > { %s7287_s5 = scalar_lea.hbm %s7920_s0, 256  ;;  %p7293_p8 = scmp.lt.u32.totalorder %s7920_s0, %s8737_s3 }
  0x8e   : > { %p7288_p5 = scmp.ne.s32.totalorder %s7920_s0, %s7287_s5  ;;  %p7294_p11 = scmp.lt.u32.totalorder %s7292_s19, %s7287_s5 }
  0x8f   : > { %p7296_p9 = scmp.lt.u32.totalorder %s7287_s5, %s7920_s0 }
  0x90   : > { %p7290_p7 = pnand %p7288_p5, %p7876_p0  ;;  %p7295_p4 = por %p7294_p11, %p7293_p8 }
  0x92   : > { %p7291_p1 = pneg %p7290_p7  ;;  %p7297_p10 = por %p7296_p9, %p7295_p4 }
  0x94   : > { %p7298_p13 = pnand %p7297_p10, %p7291_p1 }
  0x96   : > { %7301 = shalt.err (!%p7298_p13)
}
  0x97   : > { %s7302_s21 = scalar_lea.vmem %s7924_s30, 256  ;;  %s7610_s8 = smov [#allocation10]  }
  0x98   : > { %p7303_p2 = scmp.ne.s32.totalorder %s7924_s30, %s7302_s21  ;;  %s7307_s6 = sshll.u32 %s7610_s8, 4  ;;  %s7308_s6 = int_to_ptr.vmem [resolvable:$false] %s7307_s6 }
  0x99   : > { %s7309_s9 = scalar_lea.vmem %s7308_s6, 512  ;;  %p7310_p5 = scmp.lt.s32.totalorder %s7924_s30, %s7308_s6 }
  0x9a   : > { %p7305_p3 = pnand %p7303_p2, %p7876_p0  ;;  %p7311_p7 = scmp.lt.s32.totalorder %s7309_s9, %s7302_s21 }
  0x9c   : > { %p7306_p6 = pneg %p7305_p3  ;;  %p7312_p8 = por %p7311_p7, %p7310_p5 }
  0x9e   : > { %p7313_p11 = pnand %p7312_p8, %p7306_p6 }
  0xa0   : > { %7316 = shalt.err (!%p7313_p11)
}
  0xa1   : > { %s8740_s5 = smov 8   ;;  %s8741_s1 = smov 128  }
  0xa2   : > { %6474 = dma.hbm_to_vmem [thread:$0]  (!%p7863_p12), %s7920_s0, 256, %s7924_s30, %s7928_s14, %s8741_s1, %s8741_s1, %s8740_s5  }
  0xa3   : > { %s7611_s19 = smov [#allocation15]   ;;  %s7612_s18 = smov [#allocation18]  }
  0xa4   : > { %s454_s20 = sshll.u32 %s7611_s19, 4  ;;  %s486_s8 = sshll.u32 %s7612_s18, 4  ;;  %s455_s20 = int_to_ptr.vmem [resolvable:$true] %s454_s20  ;;  %s487_s8 = int_to_ptr.vmem [resolvable:$true] %s486_s8 }
  0xa5   : > { %s8742_s7 = sld [smem:[#allocation47_spill]]  ;;  %p8743_p4 = scmp.ne.s32.totalorder %s8724_s16, 0 }
  0xab   : > { %s7317_s9 = scalar_lea.hbm %s8742_s7, 16384 }
  0xac   : > { %p7318_p1 = scmp.ne.s32.totalorder %s8742_s7, %s7317_s9  ;;  %p7324_p13 = scmp.lt.u32.totalorder %s7317_s9, %s8742_s7 }
  0xae   : > { %p7320_p9 = pnand %p7318_p1, %p8743_p4 }
  0xb0   : > { %p7321_p10 = pneg %p7320_p9 }
  0xb2   : > { %p7326_p2 = pnand %p7324_p13, %p7321_p10 }
  0xb4   : > { %7329 = shalt.err (!%p7326_p2)
}
  0xb5   : > { %s7330_s0 = scalar_lea.vmem %s455_s20, 16384  ;;  %p7338_p7 = scmp.lt.s32.totalorder %s455_s20, %s455_s20 }
  0xb6   : > { %p7331_p3 = scmp.ne.s32.totalorder %s455_s20, %s7330_s0  ;;  %p7339_p8 = scmp.lt.s32.totalorder %s7330_s0, %s7330_s0 }
  0xb8   : > { %p7333_p6 = pnand %p7331_p3, %p8743_p4  ;;  %p7340_p11 = por %p7339_p8, %p7338_p7 }
  0xba   : > { %p7334_p5 = pneg %p7333_p6 }
  0xbc   : > { %p7341_p12 = pnand %p7340_p11, %p7334_p5 }
  0xbe   : > { %7344 = shalt.err (!%p7341_p12)
}
  0xbf   : > { %p8744_p1 = scmp.ne.s32.totalorder %s8722_s15, 0  ;;  %s8745_s11 = sld [smem:[#allocation51_spill]] }
  0xc1   : > { %6455 = dma.hbm_to_vmem [thread:$0]  (!%p8744_p1), %s8742_s7, 16384, %s455_s20, [#allocation14], %s8741_s1, %s8741_s1, %s8740_s5  }
  0xc5   : > { %s7345_s30 = scalar_lea.hbm %s8745_s11, 8192 }
  0xc6   : > { %p7346_p9 = scmp.ne.s32.totalorder %s8745_s11, %s7345_s30  ;;  %p7352_p13 = scmp.lt.u32.totalorder %s7345_s30, %s8745_s11 }
  0xc8   : > { %p7348_p12 = pnand %p7346_p9, %p8743_p4 }
  0xca   : > { %p7349_p10 = pneg %p7348_p12 }
  0xcc   : > { %p7354_p2 = pnand %p7352_p13, %p7349_p10 }
  0xce   : > { %7357 = shalt.err (!%p7354_p2)
}
  0xcf   : > { %s7358_s9 = scalar_lea.vmem %s487_s8, 8192  ;;  %p7366_p7 = scmp.lt.s32.totalorder %s487_s8, %s487_s8 }
  0xd0   : > { %p7359_p3 = scmp.ne.s32.totalorder %s487_s8, %s7358_s9  ;;  %p7367_p8 = scmp.lt.s32.totalorder %s7358_s9, %s7358_s9 }
  0xd2   : > { %p7361_p6 = pnand %p7359_p3, %p8743_p4  ;;  %p7368_p11 = por %p7367_p8, %p7366_p7 }
  0xd4   : > { %p7362_p5 = pneg %p7361_p6 }
  0xd6   : > { %p7369_p0 = pnand %p7368_p11, %p7362_p5 }
  0xd8   : > { %7372 = shalt.err (!%p7369_p0)
}
  0xd9   : > { %s8746_s16 = sld [smem:[#allocation29_spill]]  ;;  %s8747_s3 = sld [smem:[#allocation28_spill]] }
  0xda   : > { %6461 = dma.hbm_to_vmem [thread:$0]  (!%p8744_p1), %s8745_s11, 8192, %s487_s8, [#allocation17], %s8741_s1, %s8741_s1, %s8740_s5  }
  0xdb   : > { %s5893_s15 = sadd.s32 4294967294, %s7601_s28   ;;  %s48_s4 = sadd.s32 1, %s7593_s26 }
  0xdc   : > { %s51_s25 = sadd.s32 1, %s7597_s27  ;;  %p49_p0 = scmp.ge.s32.totalorder %s48_s4, 2 }
  0xdd   : > { %s60_s10 = sadd.s32 1, %s7581_s23  ;;  %s8749_s30 = sld [smem:[#allocation27_spill]] }
  0xde   : > { %s8812_s4 = smov (%p49_p0, %s48_s4), 0  ;;  %s8814_s25 = smov (!%p49_p0, %s51_s25), %s7597_s27 }
  0xdf   : > { %p67_p4 = scmp.ne.s32.totalorder %s7581_s23, %s8746_s16  ;;  %p73_p9 = scmp.ne.s32.totalorder %s8746_s16, %s8747_s3 }
  0xe0   : > { %8748 = sst [smem:[#allocation37_spill]] %s8812_s4  ;;  %s56_s19 = ssub.s32 %s7593_s26, %s8812_s4 }
  0xe1   : > { %p8750_p12 = scmp.eq.s32.totalorder %s7601_s28, 0  ;;  %p53_p10 = scmp.ge.s32.totalorder %s8814_s25, 2 }
  0xe2   : > { %p8752_p13 = scmp.eq.s32.totalorder %s7762_s29, 0  ;;  %p413_p3 = scmp.eq.s32.totalorder %s7762_s29, 3 }
  0xe3   : > { %p8012_p1 = por %p8750_p12, %p67_p4  ;;  %p419_p6 = scmp.eq.s32.totalorder %s5893_s15, 3 }
  0xe4   : > { %p8018_p2 = por %p8752_p13, %p73_p9  ;;  %s8816_s25 = smov (%p53_p10, %s8814_s25), 0 }
  0xe5   : > { %8754 = sst [smem:[#allocation38_spill]] %s8816_s25  ;;  %p8025_p5 = por %p413_p3, %p67_p4 }
  0xe6   : > { %s8753_s18 = scalar_select %p8018_p2, 1, 0 }
  0xe7   : > { %s8755_s6 = scalar_select %p8025_p5, 1, 0 }
  0xe8   : > { %p8029_p7 = por %p419_p6, %p73_p9  ;;  %s55_s9 = ssub.s32 %s7597_s27, %s8816_s25 }
  0xe9   : > { %8756 = sst [smem:[#allocation39_spill]] %s8755_s6  ;;  %s509_s20 = sand.u32 1, %s7581_s23  }
  0xea   : > { %s8757_s21 = scalar_select %p8029_p7, 1, 0 }
  0xeb   : > { %s57_s0 = sor.u32 %s56_s19, %s55_s9  ;;  %p84_p8 = scmp.eq.s32.totalorder %s55_s9, 0 }
  0xec   : > { %8758 = sst [smem:[#allocation40_spill]] %s8757_s21  ;;  %p58_p11 = scmp.eq.s32.totalorder %s57_s0, 0 }
  0xed   : > { %s8759_s16 = sadd.s32 1, %s8749_s30  ;;  %s5900_s15 = sshll.u32 %s509_s20, 3 }
  0xee   : > { %s8818_s30 = smov (!%p84_p8, %s8749_s30), %s8759_s16  ;;  %s5901_s7 = sshll.u32 %s7593_s26, 1 }
  0xef   : > { %s8042_s3 = scalar_select %p58_p11, %s7581_s23, %s60_s10  }
  0xf0   : > { %s5902_s11 = sshll.u32 %s7597_s27, 2  ;;  %s513_s4 = scalar_lea.vmem [#allocation4], %s5900_s15 }
  0xf1   : > { %s519_s25 = sadd.s32 %s5902_s11, %s5901_s7  ;;  %s523_s21 = sshll.u32 %s513_s4, 4  ;;  %s8048_s21 = int_to_ptr.vmem [resolvable:$true] %s523_s21 }
  0xf2   : > { %s5903_s6 = sshll.u32 %s519_s25, 6  ;;  %s8760_s0 = sld [smem:[#allocation41_spill]] }
  0xf3   : > { %p8761_p0 = scmp.lt.s32.totalorder %s7601_s28, 4  ;;  %s7373_s16 = scalar_lea.hbm %s7915_s24, 256 }
  0xf4   : > { %p7374_p9 = scmp.ne.s32.totalorder %s7915_s24, %s7373_s16  ;;  %p8763_p12 = scmp.ne.s32.totalorder %s8732_s17, 0 }
  0xf5   : > { %p8059_p4 = pnand %p8761_p0, %p8012_p1  ;;  %s7378_s4 = scalar_lea.hbm %s8637_s2, 512 }
  0xf6   : > { %p7376_p10 = pnand %p7374_p9, %p8763_p12  ;;  %p7379_p3 = scmp.lt.u32.totalorder %s7915_s24, %s8637_s2 }
  0xf7   : > { %p7380_p6 = scmp.lt.u32.totalorder %s7378_s4, %s7373_s16  ;;  %p7382_p11 = scmp.lt.u32.totalorder %s7373_s16, %s7915_s24 }
  0xf8   : > { %s8053_s29 = scalar_lea.hbm %s8760_s0, %s5903_s6  ;;  %p7377_p13 = pneg %p7376_p10 }
  0xf9   : > { %p7381_p8 = por %p7380_p6, %p7379_p3 }
  0xfb   : > { %p7383_p1 = por %p7382_p11, %p7381_p8 }
  0xfd   : > { %p7384_p0 = pnand %p7383_p1, %p7377_p13 }
  0xff   : > { %7387 = shalt.err (!%p7384_p0)
}
 0x100   : > { %s7388_s8 = scalar_lea.vmem %s7909_s12, 256  ;;  %s7613_s6 = smov [#allocation9]  }
 0x101   : > { %p7389_p9 = scmp.ne.s32.totalorder %s7909_s12, %s7388_s8  ;;  %s7393_s19 = sshll.u32 %s7613_s6, 4  ;;  %s7394_s19 = int_to_ptr.vmem [resolvable:$false] %s7393_s19 }
 0x102   : > { %s7395_s9 = scalar_lea.vmem %s7394_s19, 512  ;;  %p7396_p5 = scmp.lt.s32.totalorder %s7909_s12, %s7394_s19 }
 0x103   : > { %p7391_p10 = pnand %p7389_p9, %p8763_p12  ;;  %p7397_p2 = scmp.lt.s32.totalorder %s7395_s9, %s7388_s8 }
 0x105   : > { %p7392_p7 = pneg %p7391_p10  ;;  %p7398_p3 = por %p7397_p2, %p7396_p5 }
 0x107   : > { %p7399_p6 = pnand %p7398_p3, %p7392_p7 }
 0x109   : > { %7402 = shalt.err (!%p7399_p6)
}
 0x10a   : > { %p8764_p13 = scmp.ne.s32.totalorder %s8731_s22, 0  ;;  %s510_s16 = scalar_lea.sflag [#allocation5], %s509_s20 }
 0x10b   : > { %s7403_s7 = scalar_lea.hbm %s8053_s29, 128  ;;  %p7405_p5 = pneg %p8059_p4 }
 0x10c   : > { %6471 = dma.hbm_to_vmem [thread:$0]  (!%p8764_p13), %s7915_s24, 256, %s7909_s12, %s7870_s13, %s8741_s1, %s8741_s1, %s8740_s5  }
 0x10d   : > { %p7404_p2 = scmp.ne.s32.totalorder %s8053_s29, %s7403_s7  ;;  %s7408_s25 = scalar_lea.hbm %s8760_s0, 512 }
 0x10e   : > { %p7409_p11 = scmp.lt.u32.totalorder %s8053_s29, %s8760_s0  ;;  %p7410_p1 = scmp.lt.u32.totalorder %s7408_s25, %s7403_s7 }
 0x10f   : > { %p7406_p7 = pnand %p7405_p5, %p7404_p2  ;;  %p7412_p9 = scmp.lt.u32.totalorder %s7403_s7, %s8053_s29 }
 0x110   : > { %p7411_p0 = por %p7410_p1, %p7409_p11 }
 0x111   : > { %p7407_p8 = pneg %p7406_p7 }
 0x112   : > { %p7413_p10 = por %p7412_p9, %p7411_p0 }
 0x114   : > { %p7414_p3 = pnand %p7413_p10, %p7407_p8 }
 0x116   : > { %7417 = shalt.err (!%p7414_p3)
}
 0x117   : > { %s7418_s13 = scalar_lea.vmem %s8048_s21, 128  ;;  %s7614_s24 = smov [#allocation4]  }
 0x118   : > { %p7419_p6 = scmp.ne.s32.totalorder %s8048_s21, %s7418_s13  ;;  %s7423_s12 = sshll.u32 %s7614_s24, 4  ;;  %s7424_s12 = int_to_ptr.vmem [resolvable:$false] %s7423_s12 }
 0x119   : > { %s7425_s5 = scalar_lea.vmem %s7424_s12, 256  ;;  %p7426_p13 = scmp.lt.s32.totalorder %s8048_s21, %s7424_s12 }
 0x11a   : > { %p7421_p2 = pnand %p7419_p6, %p7405_p5  ;;  %p7427_p11 = scmp.lt.s32.totalorder %s7425_s5, %s7418_s13 }
 0x11c   : > { %p7422_p7 = pneg %p7421_p2  ;;  %p7428_p1 = por %p7427_p11, %p7426_p13 }
 0x11e   : > { %p7429_p0 = pnand %p7428_p1, %p7422_p7 }
 0x120   : > { %7432 = shalt.err (!%p7429_p0)
}
 0x121   : > { %s8765_s1 = sld [smem:[#allocation35_spill]]  ;;  %s8766_s20 = sld [smem:[#allocation36_spill]] }
 0x122   : > { %6465 = dma.hbm_to_vmem [thread:$0]  (!%p8059_p4), %s8053_s29, 128, %s8048_s21, %s510_s16  }
 0x123   : > { %s8767_s10 = sld [smem:[#allocation44_spill]] }
 0x127   : > { %s592_s6 = scalar_lea.vmem [#allocation12], %s8765_s1  ;;  %s7433_s9 = scalar_lea.hbm %s8766_s20, 16 }
 0x128   : > { %s599_s19 = sshll.u32 %s592_s6, 4  ;;  %p7434_p5 = scmp.ne.s32.totalorder %s8766_s20, %s7433_s9  ;;  %s600_s19 = int_to_ptr.vmem [resolvable:$true] %s599_s19 }
 0x129   : > { %s7438_s4 = scalar_lea.hbm %s8767_s10, 32  ;;  %p7439_p9 = scmp.lt.u32.totalorder %s8766_s20, %s8767_s10 }
 0x12a   : > { %p7436_p13 = pnand %p7434_p5, %p8763_p12  ;;  %p7440_p10 = scmp.lt.u32.totalorder %s7438_s4, %s7433_s9 }
 0x12b   : > { %p7442_p6 = scmp.lt.u32.totalorder %s7433_s9, %s8766_s20 }
 0x12c   : > { %p7437_p8 = pneg %p7436_p13  ;;  %p7441_p3 = por %p7440_p10, %p7439_p9 }
 0x12e   : > { %p7443_p4 = por %p7442_p6, %p7441_p3 }
 0x130   : > { %p7444_p2 = pnand %p7443_p4, %p7437_p8 }
 0x132   : > { %7447 = shalt.err (!%p7444_p2)
}
 0x133   : > { %s7448_s29 = scalar_lea.vmem %s600_s19, 16  ;;  %s7615_s21 = smov [#allocation12]  }
 0x134   : > { %p7449_p7 = scmp.ne.s32.totalorder %s600_s19, %s7448_s29  ;;  %s7453_s16 = sshll.u32 %s7615_s21, 4  ;;  %s7454_s16 = int_to_ptr.vmem [resolvable:$false] %s7453_s16 }
 0x135   : > { %s7455_s8 = scalar_lea.vmem %s7454_s16, 32  ;;  %p7456_p0 = scmp.lt.s32.totalorder %s600_s19, %s7454_s16 }
 0x136   : > { %p7451_p11 = pnand %p7449_p7, %p8763_p12  ;;  %p7457_p5 = scmp.lt.s32.totalorder %s7455_s8, %s7448_s29 }
 0x138   : > { %p7452_p1 = pneg %p7451_p11  ;;  %p7458_p13 = por %p7457_p5, %p7456_p0 }
 0x13a   : > { %p7459_p9 = pnand %p7458_p13, %p7452_p1 }
 0x13c   : > { %7462 = shalt.err (!%p7459_p9)
}
 0x13d   : > { %p8768_p10 = scmp.ne.s32.totalorder %s8731_s22, 0  ;;  %s8769_s13 = sld [smem:[#allocation33_spill]] }
 0x13f   : > { %6477 = dma.hbm_to_vmem [thread:$0]  (!%p8768_p10), %s8766_s20, 16, %s600_s19, %s7928_s14  }
 0x143   : > { %p8770_p8 = scmp.ne.s32.totalorder %s8769_s13, 0 }
 0x144   : > { %s8771_s17 = sld [smem:[#allocation29_spill]] (!%p8770_p8)  ;;  %p8772_p12 = scmp.ne.s32.totalorder (!%p8770_p8), %s8753_s18, 0 }
 0x145   : > { %608 = sbr.rel (%p8770_p8) target bundleno = 4669 (0x123d), region = 80 }
 0x14a   : > { %s8137_s24 = sand.u32 (!%p8770_p8), 1, %s8771_s17  }
 0x14b   : > { %s5913_s12 = sshll.u32 (!%p8770_p8), %s8137_s24, 3  ;;  %s611_s5 = scalar_lea.sflag (!%p8770_p8), [#allocation5], %s8137_s24 }
 0x14c   : > { %s614_s1 = scalar_lea.vmem [#allocation4], %s5913_s12 }
 0x14d   : > { %7536 = dma.done.wait (%p8772_p12), %s611_s5, 128  }
 0x14e   : > { %7538 = vsyncadd (%p8772_p12), %s611_s5, 4294967168  ;;  %s8773_s22 = sld [smem:[#allocation32_spill]]  ;;  %s8775_s14 = sld [smem:[#allocation34_spill]] }
 0x14f   : > { %s8774_s6 = sld [smem:[#allocation26_spill]] }
 0x154   : > { %s619_s20 = sand.u32 1, %s8773_s22   ;;  %p8776_p3 = scmp.ne.s32.totalorder %s8775_s14, 0 }
 0x155   : > { %s621_s19 = sand.u32 1, %s8774_s6   ;;  %s620_s9 = scalar_lea.sflag [#allocation8], %s619_s20 }
 0x156   : > { %s622_s7 = scalar_lea.vmem [#allocation7], %s621_s19 }
 0x157   : > { %7540 = dma.done.wait (%p8776_p3), %s620_s9, 272  }
 0x158   : > { %7542 = vsyncadd (%p8776_p3), %s620_s9, 4294967024  ;;  %s5914_s11 = sshll.u32 %s621_s19, 4  ;;  %s637_s4 = scalar_lea.sflag [#allocation11], %s619_s20 }
 0x159   : > { %s8151_s10 = scalar_lea.vmem [#allocation9], %s5914_s11  ;;  %s8153_s25 = scalar_lea.vmem [#allocation10], %s5914_s11 }
 0x15a   : > { %7544 = dma.done.wait (%p8776_p3), %s637_s4, 272  }
 0x15b   : > { %7546 = vsyncadd (%p8776_p3), %s637_s4, 4294967024  ;;  %s648_s18 = scalar_lea.vmem [#allocation12], %s621_s19  ;;  %p8777_p6 = scmp.eq.s32.totalorder %s8773_s22, 0 }
 0x15d   : > { %7548 = dma.done.wait (%p8777_p6), [#allocation14], 32768   ;;  %p8778_p4 = pmov %p8777_p6 }
 0x15f   : > { %7550 = vsyncadd (%p8778_p4), [#allocation14], 4294934528  ;;  %p8779_p2 = pmov %p8778_p4 }
 0x161   : > { %7552 = dma.done.wait (%p8779_p2), [#allocation17], 16384   ;;  %p8780_p7 = pmov %p8779_p2 }
 0x162   : > { %s5920_s15 = sshll.u32 %s8137_s24, 4  ;;  %v8168_v0 = vld [vmem:[%s614_s1] sm:$0xff]  ;;  %s8781_s21 = sld [smem:[#allocation30_spill]] }
 0x163   : > { %7554 = vsyncadd (%p8780_p7), [#allocation17], 4294950912  ;;  %v8170_v1 = vld [vmem:[%s622_s7] ss:$0 sm:$0xff]  ;;  %s8174_s29 = scalar_lea.vmem [#allocation19], %s5920_s15 }
 0x164   : > { %v8172_v2 = vld [vmem:[%s648_s18] ss:$0 sm:$0xff] }
 0x168   : > { %p5921_p11 = scmp.ne.s32.totalorder %s8781_s21, 0 }
 0x169   : > { %v6597_v3 = vld [vmem:[#allocation13 + $0x104] ss:$8 sps:$4 sm:$0xff] (!%p5921_p11)   ;;  %v6601_v5 = vld [vmem:[#allocation13 + $0x100] ss:$8 sps:$4 sm:$0xff] (!%p5921_p11)   ;;  %v6603_v7 = vld [vmem:[#allocation13 + $0x114] ss:$8 sps:$4 sm:$0xff] (!%p5921_p11)  }
 0x16a   : > { %736 = sbr.rel (%p5921_p11) target bundleno = 746 (0x2ea), region = 120  ;;  %v6599_v4 = vld [vmem:[#allocation13 + $0x204] ss:$8 sps:$4 sm:$0xff] (!%p5921_p11)   ;;  %957 = vmatprep.subr.bf16.mxu0 (!%p5921_p11), %v6597_v3  ;;  %v6602_v6 = vld [vmem:[#allocation13 + $0x200] ss:$8 sps:$4 sm:$0xff] (!%p5921_p11)   ;;  %s8782_s13 = sld [smem:[#allocation46_spill]] (!%p5921_p11) }
 0x16b   : > { %1206 = vmatprep.subr.bf16.mxu1 (!%p5921_p11), %v6599_v4  ;;  %958 = vmatpush1.bf16.msra.mxu0 (!%p5921_p11), %v6601_v5  ;;  %v6605_v8 = vld [vmem:[#allocation13 + $0x214] ss:$8 sps:$4 sm:$0xff] (!%p5921_p11)   ;;  %v6607_v9 = vld [vmem:[#allocation13 + $0x110] ss:$8 sps:$4 sm:$0xff] (!%p5921_p11)   ;;  %v6609_v11 = vld [vmem:[#allocation13 + $0x124] ss:$8 sps:$4 sm:$0xff] (!%p5921_p11)  }
 0x16c   : > { %1207 = vmatpush1.bf16.msra.mxu1 (!%p5921_p11), %v6602_v6  ;;  %959 = vmatprep.subr.bf16.mxu0 (!%p5921_p11), %v6603_v7  ;;  %v6608_v10 = vld [vmem:[#allocation13 + $0x210] ss:$8 sps:$4 sm:$0xff] (!%p5921_p11)   ;;  %v6611_v12 = vld [vmem:[#allocation13 + $0x224] ss:$8 sps:$4 sm:$0xff] (!%p5921_p11)   ;;  %v6613_v13 = vld [vmem:[#allocation13 + $0x120] ss:$8 sps:$4 sm:$0xff] (!%p5921_p11)  }
 0x16d   : > { %1208 = vmatprep.subr.bf16.mxu1 (!%p5921_p11), %v6605_v8  ;;  %v6614_v14 = vld [vmem:[#allocation13 + $0x220] ss:$8 sps:$4 sm:$0xff] (!%p5921_p11)   ;;  %v6615_v15 = vld [vmem:[#allocation13 + $0x134] ss:$8 sps:$4 sm:$0xff] (!%p5921_p11)   ;;  %v6619_v17 = vld [vmem:[#allocation13 + $0x130] ss:$8 sps:$4 sm:$0xff] (!%p5921_p11)  }
 0x16e   : > { %v6617_v16 = vld [vmem:[#allocation13 + $0x234] ss:$8 sps:$4 sm:$0xff] (!%p5921_p11)   ;;  %v6620_v18 = vld [vmem:[#allocation13 + $0x230] ss:$8 sps:$4 sm:$0xff] (!%p5921_p11)   ;;  %v6621_v19 = vld [vmem:[#allocation13 + $0x144] ss:$8 sps:$4 sm:$0xff] (!%p5921_p11)  }
 0x16f   : > { %960 = vmatpush1.bf16.msra.mxu0 (!%p5921_p11), %v6607_v9  ;;  %v6623_v20 = vld [vmem:[#allocation13 + $0x244] ss:$8 sps:$4 sm:$0xff] (!%p5921_p11)   ;;  %v6625_v21 = vld [vmem:[#allocation13 + $0x140] ss:$8 sps:$4 sm:$0xff] (!%p5921_p11)   ;;  %v6627_v23 = vld [vmem:[#allocation13 + $0x154] ss:$8 sps:$4 sm:$0xff] (!%p5921_p11)  }
 0x170   : > { %1209 = vmatpush1.bf16.msra.mxu1 (!%p5921_p11), %v6608_v10  ;;  %961 = vmatprep.subr.bf16.mxu0 (!%p5921_p11), %v6609_v11  ;;  %v6626_v22 = vld [vmem:[#allocation13 + $0x240] ss:$8 sps:$4 sm:$0xff] (!%p5921_p11)   ;;  %v6629_v24 = vld [vmem:[#allocation13 + $0x254] ss:$8 sps:$4 sm:$0xff] (!%p5921_p11)   ;;  %v6631_v25 = vld [vmem:[#allocation13 + $0x150] ss:$8 sps:$4 sm:$0xff] (!%p5921_p11)  }
 0x171   : > { %1210 = vmatprep.subr.bf16.mxu1 %v6611_v12  ;;  %v6632_v26 = vld [vmem:[#allocation13 + $0x250] ss:$8 sps:$4 sm:$0xff]   ;;  %v6633_v27 = vld [vmem:[#allocation13 + $0x164] ss:$8 sps:$4 sm:$0xff]   ;;  %v6637_v29 = vld [vmem:[#allocation13 + $0x160] ss:$8 sps:$4 sm:$0xff]  }
 0x172   : > { %v6635_v28 = vld [vmem:[#allocation13 + $0x264] ss:$8 sps:$4 sm:$0xff]   ;;  %v6638_v30 = vld [vmem:[#allocation13 + $0x260] ss:$8 sps:$4 sm:$0xff]   ;;  %v6639_v31 = vld [vmem:[#allocation13 + $0x174] ss:$8 sps:$4 sm:$0xff]  }
 0x173   : > { %962 = vmatpush1.bf16.msra.mxu0 %v6613_v13  ;;  %v6641_v32 = vld [vmem:[#allocation13 + $0x274] ss:$8 sps:$4 sm:$0xff]   ;;  %v6643_v33 = vld [vmem:[#allocation13 + $0x170] ss:$8 sps:$4 sm:$0xff]   ;;  %v6645_v35 = vld [vmem:[#allocation13 + $0x184] ss:$8 sps:$4 sm:$0xff]  }
 0x174   : > { %1211 = vmatpush1.bf16.msra.mxu1 %v6614_v14  ;;  %963 = vmatprep.subr.bf16.mxu0 %v6615_v15  ;;  %v6644_v34 = vld [vmem:[#allocation13 + $0x270] ss:$8 sps:$4 sm:$0xff]   ;;  %v6647_v36 = vld [vmem:[#allocation13 + $0x284] ss:$8 sps:$4 sm:$0xff]   ;;  %v6649_v37 = vld [vmem:[#allocation13 + $0x180] ss:$8 sps:$4 sm:$0xff]  }
 0x175   : > { %1212 = vmatprep.subr.bf16.mxu1 %v6617_v16  ;;  %v6650_v38 = vld [vmem:[#allocation13 + $0x280] ss:$8 sps:$4 sm:$0xff]   ;;  %v6651_v39 = vld [vmem:[#allocation13 + $0x194] ss:$8 sps:$4 sm:$0xff]   ;;  %v6655_v41 = vld [vmem:[#allocation13 + $0x190] ss:$8 sps:$4 sm:$0xff]  }
 0x176   : > { %v6653_v40 = vld [vmem:[#allocation13 + $0x294] ss:$8 sps:$4 sm:$0xff]   ;;  %v6656_v42 = vld [vmem:[#allocation13 + $0x290] ss:$8 sps:$4 sm:$0xff]   ;;  %v6657_v43 = vld [vmem:[#allocation13 + $0x1a4] ss:$8 sps:$4 sm:$0xff]  }
 0x177   : > { %964 = vmatpush1.bf16.msra.mxu0 %v6619_v17  ;;  %v6659_v44 = vld [vmem:[#allocation13 + $0x2a4] ss:$8 sps:$4 sm:$0xff]   ;;  %v6661_v45 = vld [vmem:[#allocation13 + $0x1a0] ss:$8 sps:$4 sm:$0xff]   ;;  %v6663_v47 = vld [vmem:[#allocation13 + $0x1b4] ss:$8 sps:$4 sm:$0xff]  }
 0x178   : > { %1213 = vmatpush1.bf16.msra.mxu1 %v6620_v18  ;;  %965 = vmatprep.subr.bf16.mxu0 %v6621_v19  ;;  %v6662_v46 = vld [vmem:[#allocation13 + $0x2a0] ss:$8 sps:$4 sm:$0xff]   ;;  %v6665_v48 = vld [vmem:[#allocation13 + $0x2b4] ss:$8 sps:$4 sm:$0xff]   ;;  %v6667_v49 = vld [vmem:[#allocation13 + $0x1b0] ss:$8 sps:$4 sm:$0xff]  }
 0x179   : > { %1214 = vmatprep.subr.bf16.mxu1 %v6623_v20  ;;  %v6668_v50 = vld [vmem:[#allocation13 + $0x2b0] ss:$8 sps:$4 sm:$0xff]   ;;  %v6669_v52 = vld [vmem:[#allocation13 + $0x1c4] ss:$8 sps:$4 sm:$0xff]   ;;  %v6673_v54 = vld [vmem:[#allocation13 + $0x1c0] ss:$8 sps:$4 sm:$0xff]  }
 0x17a   : > { %v6695_v51 = vld [vmem:[%s8151_s10 + $0x4] ss:$8 sps:$4 sm:$0xff]   ;;  %v6693_v9 = vld [vmem:[%s8151_s10] ss:$8 sps:$4 sm:$0xff]   ;;  %s8783_s22 = sld [smem:[#allocation48_spill]] }
 0x17b   : > { %966 = vmatpush1.bf16.msra.mxu0 %v6625_v21  ;;  %v6671_v53 = vld [vmem:[#allocation13 + $0x2c4] ss:$8 sps:$4 sm:$0xff]   ;;  %989 = vmatprep.mubr.bf16.mxu0 %v6695_v51  ;;  %v6674_v55 = vld [vmem:[#allocation13 + $0x2c0] ss:$8 sps:$4 sm:$0xff]   ;;  %v6675_v56 = vld [vmem:[#allocation13 + $0x1d4] ss:$8 sps:$4 sm:$0xff]  }
 0x17c   : > { %1215 = vmatpush1.bf16.msra.mxu1 %v6626_v22  ;;  %967 = vmatprep.subr.bf16.mxu0 %v6627_v23  ;;  %v6677_v57 = vld [vmem:[#allocation13 + $0x2d4] ss:$8 sps:$4 sm:$0xff]   ;;  %v6679_v58 = vld [vmem:[#allocation13 + $0x1d0] ss:$8 sps:$4 sm:$0xff]   ;;  %v6681_v60 = vld [vmem:[#allocation13 + $0x1e4] ss:$8 sps:$4 sm:$0xff]  }
 0x17d   : > { %1216 = vmatprep.subr.bf16.mxu1 %v6629_v24  ;;  %1238 = vmatprep.mubr.bf16.mxu1 %v6695_v51  ;;  %v6680_v59 = vld [vmem:[#allocation13 + $0x2d0] ss:$8 sps:$4 sm:$0xff]   ;;  %v6683_v61 = vld [vmem:[#allocation13 + $0x2e4] ss:$8 sps:$4 sm:$0xff]   ;;  %v6685_v62 = vld [vmem:[#allocation13 + $0x1e0] ss:$8 sps:$4 sm:$0xff]  }
 0x17e   : > { %v6686_v63 = vld [vmem:[#allocation13 + $0x2e0] ss:$8 sps:$4 sm:$0xff]   ;;  %v6687_v3 = vld [vmem:[#allocation13 + $0x1f4] ss:$8 sps:$4 sm:$0xff]   ;;  %v6691_v5 = vld [vmem:[#allocation13 + $0x1f0] ss:$8 sps:$4 sm:$0xff]  }
 0x17f   : > { %968 = vmatpush1.bf16.msra.mxu0 %v6631_v25  ;;  %v6689_v4 = vld [vmem:[#allocation13 + $0x2f4] ss:$8 sps:$4 sm:$0xff]   ;;  %v6692_v6 = vld [vmem:[#allocation13 + $0x2f0] ss:$8 sps:$4 sm:$0xff]   ;;  %v6698_v7 = vld [vmem:[#allocation15 + $0x104] ss:$8 sps:$4 sm:$0xff]  }
 0x180   : > { %1217 = vmatpush1.bf16.msra.mxu1 %v6632_v26  ;;  %969 = vmatprep.subr.bf16.mxu0 %v6633_v27  ;;  %v6701_v8 = vld [vmem:[#allocation15 + $0x204] ss:$8 sps:$4 sm:$0xff]   ;;  %v6696_v10 = vld [vmem:[#allocation15 + $0x100] ss:$8 sps:$4 sm:$0xff]   ;;  %v6704_v12 = vld [vmem:[#allocation15 + $0x114] ss:$8 sps:$4 sm:$0xff]  }
 0x181   : > { %1218 = vmatprep.subr.bf16.mxu1 %v6635_v28  ;;  %v6699_v11 = vld [vmem:[#allocation15 + $0x200] ss:$8 sps:$4 sm:$0xff]   ;;  %v6707_v13 = vld [vmem:[#allocation15 + $0x214] ss:$8 sps:$4 sm:$0xff]   ;;  %v6702_v14 = vld [vmem:[#allocation15 + $0x110] ss:$8 sps:$4 sm:$0xff]  }
 0x182   : > { %v6705_v15 = vld [vmem:[#allocation15 + $0x210] ss:$8 sps:$4 sm:$0xff]   ;;  %v6710_v16 = vld [vmem:[#allocation15 + $0x124] ss:$8 sps:$4 sm:$0xff]   ;;  %v6708_v18 = vld [vmem:[#allocation15 + $0x120] ss:$8 sps:$4 sm:$0xff]  }
 0x183   : > { %970 = vmatpush1.bf16.msra.mxu0 %v6637_v29  ;;  %v6713_v17 = vld [vmem:[#allocation15 + $0x224] ss:$8 sps:$4 sm:$0xff]   ;;  %v6711_v19 = vld [vmem:[#allocation15 + $0x220] ss:$8 sps:$4 sm:$0xff]   ;;  %v6716_v20 = vld [vmem:[#allocation15 + $0x134] ss:$8 sps:$4 sm:$0xff]  }
 0x184   : > { %1219 = vmatpush1.bf16.msra.mxu1 %v6638_v30  ;;  %971 = vmatprep.subr.bf16.mxu0 %v6639_v31  ;;  %v6719_v21 = vld [vmem:[#allocation15 + $0x234] ss:$8 sps:$4 sm:$0xff]   ;;  %v6714_v22 = vld [vmem:[#allocation15 + $0x130] ss:$8 sps:$4 sm:$0xff]   ;;  %v6722_v24 = vld [vmem:[#allocation15 + $0x144] ss:$8 sps:$4 sm:$0xff]  }
 0x185   : > { %1220 = vmatprep.subr.bf16.mxu1 %v6641_v32  ;;  %v6717_v23 = vld [vmem:[#allocation15 + $0x230] ss:$8 sps:$4 sm:$0xff]   ;;  %v6725_v25 = vld [vmem:[#allocation15 + $0x244] ss:$8 sps:$4 sm:$0xff]   ;;  %v6720_v26 = vld [vmem:[#allocation15 + $0x140] ss:$8 sps:$4 sm:$0xff]  }
 0x186   : > { %v6723_v27 = vld [vmem:[#allocation15 + $0x240] ss:$8 sps:$4 sm:$0xff]   ;;  %v6728_v28 = vld [vmem:[#allocation15 + $0x154] ss:$8 sps:$4 sm:$0xff]   ;;  %v6726_v30 = vld [vmem:[#allocation15 + $0x150] ss:$8 sps:$4 sm:$0xff]  }
 0x187   : > { %972 = vmatpush1.bf16.msra.mxu0 %v6643_v33  ;;  %v6731_v29 = vld [vmem:[#allocation15 + $0x254] ss:$8 sps:$4 sm:$0xff]   ;;  %v6729_v31 = vld [vmem:[#allocation15 + $0x250] ss:$8 sps:$4 sm:$0xff]   ;;  %v6734_v32 = vld [vmem:[#allocation15 + $0x164] ss:$8 sps:$4 sm:$0xff]  }
 0x188   : > { %1221 = vmatpush1.bf16.msra.mxu1 %v6644_v34  ;;  %973 = vmatprep.subr.bf16.mxu0 %v6645_v35  ;;  %v6737_v33 = vld [vmem:[#allocation15 + $0x264] ss:$8 sps:$4 sm:$0xff]   ;;  %v6732_v35 = vld [vmem:[#allocation15 + $0x160] ss:$8 sps:$4 sm:$0xff]  }
 0x189   : > { %1222 = vmatprep.subr.bf16.mxu1 %v6647_v36  ;;  %v6794_v34 = vld [vmem:[%s8153_s25 + $0x4] ss:$8 sps:$4 sm:$0xff]  }
 0x18a   : > { %v6735_v36 = vld [vmem:[#allocation15 + $0x260] ss:$8 sps:$4 sm:$0xff]  }
 0x18b   : > { %974 = vmatpush1.bf16.msra.mxu0 %v6649_v37  ;;  %v6740_v37 = vld [vmem:[#allocation15 + $0x174] ss:$8 sps:$4 sm:$0xff]   ;;  %v6756_v51 = vld [vmem:[#allocation15 + $0x1a0] ss:$8 sps:$4 sm:$0xff]  }
 0x18c   : > { %1223 = vmatpush1.bf16.msra.mxu1 %v6650_v38  ;;  %975 = vmatprep.subr.bf16.mxu0 %v6651_v39  ;;  %v6743_v38 = vld [vmem:[#allocation15 + $0x274] ss:$8 sps:$4 sm:$0xff]   ;;  %v6738_v39 = vld [vmem:[#allocation15 + $0x170] ss:$8 sps:$4 sm:$0xff]  }
 0x18d   : > { %1224 = vmatprep.subr.bf16.mxu1 %v6653_v40  ;;  %v6741_v40 = vld [vmem:[#allocation15 + $0x270] ss:$8 sps:$4 sm:$0xff]  }
 0x18f   : > { %976 = vmatpush1.bf16.msra.mxu0 %v6655_v41  ;;  %v6746_v41 = vld [vmem:[#allocation15 + $0x184] ss:$8 sps:$4 sm:$0xff]  }
 0x190   : > { %1225 = vmatpush1.bf16.msra.mxu1 %v6656_v42  ;;  %977 = vmatprep.subr.bf16.mxu0 %v6657_v43  ;;  %v6749_v42 = vld [vmem:[#allocation15 + $0x284] ss:$8 sps:$4 sm:$0xff]   ;;  %v6744_v43 = vld [vmem:[#allocation15 + $0x180] ss:$8 sps:$4 sm:$0xff]  }
 0x191   : > { %1226 = vmatprep.subr.bf16.mxu1 %v6659_v44  ;;  %v6747_v44 = vld [vmem:[#allocation15 + $0x280] ss:$8 sps:$4 sm:$0xff]  }
 0x193   : > { %978 = vmatpush1.bf16.msra.mxu0 %v6661_v45  ;;  %v6752_v45 = vld [vmem:[#allocation15 + $0x194] ss:$8 sps:$4 sm:$0xff]  }
 0x194   : > { %1227 = vmatpush1.bf16.msra.mxu1 %v6662_v46  ;;  %979 = vmatprep.subr.bf16.mxu0 %v6663_v47  ;;  %v6755_v46 = vld [vmem:[#allocation15 + $0x294] ss:$8 sps:$4 sm:$0xff]   ;;  %v6750_v47 = vld [vmem:[#allocation15 + $0x190] ss:$8 sps:$4 sm:$0xff]  }
 0x195   : > { %1228 = vmatprep.subr.bf16.mxu1 %v6665_v48  ;;  %v6753_v48 = vld [vmem:[#allocation15 + $0x290] ss:$8 sps:$4 sm:$0xff]  }
 0x197   : > { %980 = vmatpush1.bf16.msra.mxu0 %v6667_v49  ;;  %v6758_v49 = vld [vmem:[#allocation15 + $0x1a4] ss:$8 sps:$4 sm:$0xff]  }
 0x198   : > { %1229 = vmatpush1.bf16.msra.mxu1 %v6668_v50  ;;  %981 = vmatprep.subr.bf16.mxu0 %v6669_v52  ;;  %v6761_v50 = vld [vmem:[#allocation15 + $0x2a4] ss:$8 sps:$4 sm:$0xff]   ;;  %v6759_v52 = vld [vmem:[#allocation15 + $0x2a0] ss:$8 sps:$4 sm:$0xff]  }
 0x199   : > { %1230 = vmatprep.subr.bf16.mxu1 %v6671_v53  ;;  %v6764_v53 = vld [vmem:[#allocation15 + $0x1b4] ss:$8 sps:$4 sm:$0xff]  }
 0x19b   : > { %982 = vmatpush1.bf16.msra.mxu0 %v6673_v54  ;;  %v6767_v54 = vld [vmem:[#allocation15 + $0x2b4] ss:$8 sps:$4 sm:$0xff]  }
 0x19c   : > { %1231 = vmatpush1.bf16.msra.mxu1 %v6674_v55  ;;  %983 = vmatprep.subr.bf16.mxu0 %v6675_v56  ;;  %v6762_v55 = vld [vmem:[#allocation15 + $0x1b0] ss:$8 sps:$4 sm:$0xff]  }
 0x19d   : > { %1232 = vmatprep.subr.bf16.mxu1 %v6677_v57  ;;  %v6765_v56 = vld [vmem:[#allocation15 + $0x2b0] ss:$8 sps:$4 sm:$0xff]   ;;  %v6770_v57 = vld [vmem:[#allocation15 + $0x1c4] ss:$8 sps:$4 sm:$0xff]  }
 0x19f   : > { %984 = vmatpush1.bf16.msra.mxu0 %v6679_v58  ;;  %v6773_v58 = vld [vmem:[#allocation15 + $0x2c4] ss:$8 sps:$4 sm:$0xff]  }
 0x1a0   : > { %1233 = vmatpush1.bf16.msra.mxu1 %v6680_v59  ;;  %985 = vmatprep.subr.bf16.mxu0 %v6681_v60  ;;  %v6768_v59 = vld [vmem:[#allocation15 + $0x1c0] ss:$8 sps:$4 sm:$0xff]  }
 0x1a1   : > { %1234 = vmatprep.subr.bf16.mxu1 %v6683_v61  ;;  %v6771_v60 = vld [vmem:[#allocation15 + $0x2c0] ss:$8 sps:$4 sm:$0xff]   ;;  %v6776_v61 = vld [vmem:[#allocation15 + $0x1d4] ss:$8 sps:$4 sm:$0xff]  }
 0x1a3   : > { %986 = vmatpush1.bf16.msra.mxu0 %v6685_v62  ;;  %v6779_v62 = vld [vmem:[#allocation15 + $0x2d4] ss:$8 sps:$4 sm:$0xff]  }
 0x1a4   : > { %1235 = vmatpush1.bf16.msra.mxu1 %v6686_v63  ;;  %987 = vmatprep.subr.bf16.mxu0 %v6687_v3  ;;  %v6774_v63 = vld [vmem:[#allocation15 + $0x1d0] ss:$8 sps:$4 sm:$0xff]  }
 0x1a5   : > { %1236 = vmatprep.subr.bf16.mxu1 %v6689_v4  ;;  %v6777_v3 = vld [vmem:[#allocation15 + $0x2d0] ss:$8 sps:$4 sm:$0xff]   ;;  %v6782_v4 = vld [vmem:[#allocation15 + $0x1e4] ss:$8 sps:$4 sm:$0xff]  }
 0x1a7   : > { %988 = vmatpush1.bf16.msra.mxu0 %v6691_v5  ;;  %v6785_v5 = vld [vmem:[#allocation15 + $0x2e4] ss:$8 sps:$4 sm:$0xff]  }
 0x1a8   : > { %1237 = vmatpush1.bf16.msra.mxu1 %v6692_v6  ;;  %1904 = vmatprep.subr.bf16.mxu0 %v6698_v7  ;;  %v6780_v6 = vld [vmem:[#allocation15 + $0x1e0] ss:$8 sps:$4 sm:$0xff]  }
 0x1a9   : > { %2153 = vmatprep.subr.bf16.mxu1 %v6701_v8  ;;  %v6783_v7 = vld [vmem:[#allocation15 + $0x2e0] ss:$8 sps:$4 sm:$0xff]   ;;  %v6788_v8 = vld [vmem:[#allocation15 + $0x1f4] ss:$8 sps:$4 sm:$0xff]  }
 0x1aa   : > { %990 = vmatmul.mubr.bf16.vlgmr.msra.gmra.mrb[0].mxu0 %v6693_v9 }
 0x1ab   : > { %1239 = vmatmul.mubr.bf16.vlgmr.msra.gmra.mrb[0].mxu1 %v6693_v9  ;;  %1905 = vmatpush1.bf16.msra.mxu0 %v6696_v10  ;;  %v6791_v9 = vld [vmem:[#allocation15 + $0x2f4] ss:$8 sps:$4 sm:$0xff]   ;;  %v6786_v10 = vld [vmem:[#allocation15 + $0x1f0] ss:$8 sps:$4 sm:$0xff]  }
 0x1ac   : > { %2154 = vmatpush1.bf16.msra.mxu1 %v6699_v11  ;;  %1906 = vmatprep.subr.bf16.mxu0 %v6704_v12  ;;  %v6789_v11 = vld [vmem:[#allocation15 + $0x2f0] ss:$8 sps:$4 sm:$0xff]  }
 0x1ad   : > { %2155 = vmatprep.subr.bf16.mxu1 %v6707_v13  ;;  %1936 = vmatprep.mubr.bf16.mxu0 %v6794_v34  ;;  %v6792_v12 = vld [vmem:[%s8153_s25] ss:$8 sps:$4 sm:$0xff]   ;;  %v777_v13 = vlaneseq }
 0x1ae   : > { %2185 = vmatprep.mubr.bf16.mxu1 %v6794_v34 }
 0x1af   : > { %1907 = vmatpush1.bf16.msra.mxu0 %v6702_v14  ;;  %v778_v14 = vshrl.u32 %v777_v13, 7 }
 0x1b0   : > { %2156 = vmatpush1.bf16.msra.mxu1 %v6705_v15  ;;  %1908 = vmatprep.subr.bf16.mxu0 %v6710_v16  ;;  %v5922_v16 = vld [vmem:[%s8782_s13 + $0x2] sm:$0x3] }
 0x1b1   : > { %2157 = vmatprep.subr.bf16.mxu1 %v6713_v17  ;;  %v8181_v15 = vsub.s32 0, %v778_v14  ;;  %v5957_v17 = vld [vmem:[%s8782_s13 + $0x4] sm:$0x3] }
 0x1b3   : > { %1909 = vmatpush1.bf16.msra.mxu0 %v6708_v18  ;;  %v8189_v18 = vsub.s32 1, %v778_v14 }
 0x1b4   : > { %2158 = vmatpush1.bf16.msra.mxu1 %v6711_v19  ;;  %1910 = vmatprep.subr.bf16.mxu0 %v6716_v20  ;;  %v780_v19 = vrot.slane %v5922_v16, %v8181_v15  ;;  %v1039_v20 = vrot.slane %v5957_v17, %v8181_v15 }
 0x1b5   : > { %2159 = vmatprep.subr.bf16.mxu1 %v6719_v21  ;;  %v7616_v21 = vmov 1983009808  }
 0x1b7   : > { %1911 = vmatpush1.bf16.msra.mxu0 %v6714_v22  ;;  %v1267_v22 = vunpack.c.l.s4 %v7616_v21 }
 0x1b8   : > { %2160 = vmatpush1.bf16.msra.mxu1 %v6717_v23  ;;  %1912 = vmatprep.subr.bf16.mxu0 %v6722_v24  ;;  %v7617_v23 = vmov 1934713408  }
 0x1b9   : > { %2161 = vmatprep.subr.bf16.mxu1 %v6725_v25  ;;  %v1282_v24 = vunpack.c.l.s4 %v7617_v23 }
 0x1bb   : > { %1913 = vmatpush1.bf16.msra.mxu0 %v6720_v26 }
 0x1bc   : > { %2162 = vmatpush1.bf16.msra.mxu1 %v6723_v27  ;;  %1914 = vmatprep.subr.bf16.mxu0 %v6728_v28  ;;  %v784_v27 = vrot.slane %v5922_v16, %v8189_v18  ;;  %v1043_v28 = vrot.slane %v5957_v17, %v8189_v18 }
 0x1bd   : > { %2163 = vmatprep.subr.bf16.mxu1 %v6731_v29 }
 0x1bf   : > { %1915 = vmatpush1.bf16.msra.mxu0 %v6726_v30 }
 0x1c0   : > { %2164 = vmatpush1.bf16.msra.mxu1 %v6729_v31  ;;  %1916 = vmatprep.subr.bf16.mxu0 %v6734_v32 }
 0x1c1   : > { %2165 = vmatprep.subr.bf16.mxu1 %v6737_v33  ;;  %v1268_v33 = vunpack.c.0.s8 %v1267_v22 }
 0x1c3   : > { %1917 = vmatpush1.bf16.msra.mxu0 %v6732_v35 }
 0x1c4   : > { %2166 = vmatpush1.bf16.msra.mxu1 %v6735_v36  ;;  %1918 = vmatprep.subr.bf16.mxu0 %v6740_v37  ;;  %v1283_v36 = vunpack.c.0.s8 %v1282_v24 }
 0x1c5   : > { %2167 = vmatprep.subr.bf16.mxu1 %v6743_v38 }
 0x1c7   : > { %1919 = vmatpush1.bf16.msra.mxu0 %v6738_v39 }
 0x1c8   : > { %2168 = vmatpush1.bf16.msra.mxu1 %v6741_v40  ;;  %1920 = vmatprep.subr.bf16.mxu0 %v6746_v41 }
 0x1c9   : > { %2169 = vmatprep.subr.bf16.mxu1 %v6749_v42 }
 0x1cb   : > { %1921 = vmatpush1.bf16.msra.mxu0 %v6744_v43 }
 0x1cc   : > { %2170 = vmatpush1.bf16.msra.mxu1 %v6747_v44  ;;  %1922 = vmatprep.subr.bf16.mxu0 %v6752_v45 }
 0x1cd   : > { %2171 = vmatprep.subr.bf16.mxu1 %v6755_v46 }
 0x1cf   : > { %1923 = vmatpush1.bf16.msra.mxu0 %v6750_v47  ;;  %v8195_v47 = vsub.s32 %v1268_v33, %v778_v14 }
 0x1d0   : > { %2172 = vmatpush1.bf16.msra.mxu1 %v6753_v48  ;;  %1924 = vmatprep.subr.bf16.mxu0 %v6758_v49  ;;  %v7618_v49 = vmov 0  }
 0x1d1   : > { %2173 = vmatprep.subr.bf16.mxu1 %v6761_v50  ;;  %v8199_v50 = vpack.i.b16 %v7618_v49, %v7618_v49 }
 0x1d3   : > { %1925 = vmatpush1.bf16.msra.mxu0 %v6756_v51 }
 0x1d4   : > { %2174 = vmatpush1.bf16.msra.mxu1 %v6759_v52  ;;  %1926 = vmatprep.subr.bf16.mxu0 %v6764_v53  ;;  %v8201_v52 = vsub.s32 %v1283_v36, %v778_v14 }
 0x1d5   : > { %2175 = vmatprep.subr.bf16.mxu1 %v6767_v54 }
 0x1d7   : > { %1927 = vmatpush1.bf16.msra.mxu0 %v6762_v55 }
 0x1d8   : > { %2176 = vmatpush1.bf16.msra.mxu1 %v6765_v56  ;;  %1928 = vmatprep.subr.bf16.mxu0 %v6770_v57 }
 0x1d9   : > { %2177 = vmatprep.subr.bf16.mxu1 %v6773_v58 }
 0x1db   : > { %1929 = vmatpush1.bf16.msra.mxu0 %v6768_v59 }
 0x1dc   : > { %2178 = vmatpush1.bf16.msra.mxu1 %v6771_v60  ;;  %1930 = vmatprep.subr.bf16.mxu0 %v6776_v61 }
 0x1dd   : > { %2179 = vmatprep.subr.bf16.mxu1 %v6779_v62 }
 0x1df   : > { %1931 = vmatpush1.bf16.msra.mxu0 %v6774_v63 }
 0x1e0   : > { %2180 = vmatpush1.bf16.msra.mxu1 %v6777_v3  ;;  %1932 = vmatprep.subr.bf16.mxu0 %v6782_v4 }
 0x1e1   : > { %2181 = vmatprep.subr.bf16.mxu1 %v6785_v5 }
 0x1e3   : > { %1933 = vmatpush1.bf16.msra.mxu0 %v6780_v6 }
 0x1e4   : > { %2182 = vmatpush1.bf16.msra.mxu1 %v6783_v7  ;;  %1934 = vmatprep.subr.bf16.mxu0 %v6788_v8 }
 0x1e5   : > { %2183 = vmatprep.subr.bf16.mxu1 %v6791_v9 }
 0x1e7   : > { %1935 = vmatpush1.bf16.msra.mxu0 %v6786_v10 }
 0x1e8   : > { %2184 = vmatpush1.bf16.msra.mxu1 %v6789_v11 }
 0x1ea   : > { %1937 = vmatmul.mubr.bf16.vlgmr.msra.gmra.mrb[4].mxu0 %v6792_v12 }
 0x1eb   : > { %2186 = vmatmul.mubr.bf16.vlgmr.msra.gmra.mrb[4].mxu1 %v6792_v12 }
 0x27d   : > { %v991_v25 = vpop.f32.mrb[0].mxu0 }
 0x27e   : > { %v1240_v26 = vpop.f32.mrb[0].mxu1  ;;  %v992_v29 = vadd.f32 %v991_v25, %v780_v19  ;;  %v993_v31 = vpop.f32.mrb[1].mxu0 }
 0x27f   : > { %v1241_v30 = vadd.f32 %v1240_v26, %v1039_v20  ;;  %v1242_v32 = vpop.f32.mrb[1].mxu1  ;;  %v995_v34 = vpop.f32.mrb[2].mxu0  ;;  %v994_v41 = vadd.f32 %v993_v31, %v784_v27 }
 0x280   : > { %v1244_v35 = vpop.f32.mrb[2].mxu1  ;;  %v996_v37 = vadd.f32 %v995_v34, %v780_v19  ;;  %v997_v39 = vpop.f32.mrb[3].mxu0  ;;  %v1243_v42 = vadd.f32 %v1242_v32, %v1043_v28 }
 0x281   : > { %v1245_v38 = vadd.f32 %v1244_v35, %v1039_v20  ;;  %v1246_v40 = vpop.f32.mrb[3].mxu1  ;;  %v998_v43 = vadd.f32 %v997_v39, %v784_v27 }
 0x282   : > { %v1247_v44 = vadd.f32 %v1246_v40, %v1043_v28  ;;  %v1249_v45 = vpack.c.bf16 %v996_v37, %v992_v29 }
 0x283   : > { %v1471_v46 = vpack.c.bf16 %v1245_v38, %v1241_v30  ;;  %v1250_v48 = vpack.c.bf16 %v998_v43, %v994_v41 }
 0x284   : > { %v1472_v51 = vpack.c.bf16 %v1247_v44, %v1243_v42  ;;  %v1255_v53 = vshrl.u32 %v1249_v45, 16 }
 0x285   : > { %v1477_v54 = vshrl.u32 %v1471_v46, 16  ;;  %v1253_v55 = vpack.i.b16 %v1250_v48, %v1249_v45  ;;  %v1256_v56 = vshrl.u32 %v1250_v48, 16 }
 0x286   : > { %v1475_v57 = vpack.i.b16 %v1472_v51, %v1471_v46  ;;  %v1478_v58 = vshrl.u32 %v1472_v51, 16 }
 0x287   : > { %v1257_v59 = vpack.i.b16 %v1256_v56, %v1255_v53  ;;  %v1265_v60 = vcombine.high %v1253_v55, %v8199_v50  ;;  %v1272_v61 = vrot.slane %v1253_v55, %v8195_v47 }
 0x288   : > { %v1479_v62 = vpack.i.b16 %v1478_v58, %v1477_v54  ;;  %v1481_v63 = vcombine.high %v1475_v57, %v8199_v50  ;;  %v1488_v3 = vrot.slane %v1475_v57, %v8195_v47 }
 0x289   : > { %v1279_v4 = vrot.slane %v1265_v60, %v8195_v47  ;;  %v1280_v5 = vcombine.high %v1272_v61, %v7618_v49  ;;  %v1287_v6 = vrot.slane %v1272_v61, %v8201_v52  ;;  %v1314_v7 = vcombine.high %v1257_v59, %v8199_v50 }
 0x28a   : > { %v1321_v8 = vrot.slane %v1257_v59, %v8195_v47  ;;  %v1495_v9 = vrot.slane %v1481_v63, %v8195_v47  ;;  %v1496_v10 = vcombine.high %v1488_v3, %v7618_v49  ;;  %v1503_v11 = vrot.slane %v1488_v3, %v8201_v52 }
 0x28b   : > { %v1294_v12 = vrot.slane %v1280_v5, %v8201_v52  ;;  %v1295_v13 = vcombine.high %v1279_v4, %v7618_v49  ;;  %v1302_v14 = vrot.slane %v1279_v4, %v8201_v52  ;;  %v1328_v16 = vrot.slane %v1314_v7, %v8195_v47 }
 0x28c   : > { %v1329_v17 = vcombine.high %v1321_v8, %v7618_v49  ;;  %v1336_v19 = vrot.slane %v1321_v8, %v8201_v52  ;;  %v1510_v20 = vrot.slane %v1496_v10, %v8201_v52  ;;  %v1511_v21 = vcombine.high %v1495_v9, %v7618_v49 }
 0x28d   : > { %v1309_v22 = vrot.slane %v1295_v13, %v8201_v52  ;;  %v1344_v23 = vcombine.high %v1328_v16, %v7618_v49  ;;  %v1351_v24 = vrot.slane %v1328_v16, %v8201_v52  ;;  %v1363_v25 = vcombine.low %v1287_v6, %v1294_v12 }
 0x28e   : > { %v1343_v26 = vrot.slane %v1329_v17, %v8201_v52  ;;  %v5990_v27 = vcombine.high %v1287_v6, %v1294_v12  ;;  %v1518_v28 = vrot.slane %v1495_v9, %v8201_v52  ;;  %v1525_v29 = vrot.slane %v1511_v21, %v8201_v52 }
 0x28f   : > { %v1358_v30 = vrot.slane %v1344_v23, %v8201_v52  ;;  %v1370_v31 = vrot.slane %v1363_v25, %v8195_v47  ;;  %v1379_v32 = vcombine.low %v1302_v14, %v1309_v22  ;;  %v5991_v33 = vcombine.high %v1302_v14, %v1309_v22 }
 0x290   : > { %v1378_v34 = vrot.slane %v5990_v27, %v8195_v47  ;;  %v1412_v35 = vcombine.low %v1336_v19, %v1343_v26  ;;  %v5992_v36 = vcombine.high %v1336_v19, %v1343_v26  ;;  %v1530_v37 = vcombine.high %v1479_v62, %v8199_v50 }
 0x291   : > { %v1386_v38 = vrot.slane %v1379_v32, %v8195_v47  ;;  %v1394_v39 = vrot.slane %v5991_v33, %v8195_v47  ;;  %v1428_v40 = vcombine.low %v1351_v24, %v1358_v30  ;;  %v5993_v41 = vcombine.high %v1351_v24, %v1358_v30 }
 0x292   : > { %v1395_v42 = vcombine.low %v1370_v31, %v1378_v34  ;;  %v1419_v43 = vrot.slane %v1412_v35, %v8195_v47  ;;  %v1427_v44 = vrot.slane %v5992_v36, %v8195_v47  ;;  %v1537_v45 = vrot.slane %v1479_v62, %v8195_v47 }
 0x293   : > { %v1403_v46 = vcombine.low %v1386_v38, %v1394_v39  ;;  %v1435_v48 = vrot.slane %v1428_v40, %v8195_v47  ;;  %v1443_v51 = vrot.slane %v5993_v41, %v8195_v47  ;;  %v1544_v53 = vrot.slane %v1530_v37, %v8195_v47 }
 0x294   : > { %v1402_v54 = vrot.slane %v1395_v42, %v8201_v52  ;;  %v1444_v55 = vcombine.low %v1419_v43, %v1427_v44  ;;  %v1545_v56 = vcombine.high %v1537_v45, %v7618_v49  ;;  %v1552_v57 = vrot.slane %v1537_v45, %v8201_v52  ;;  %v5998_v43 = vld [vmem:[%s8783_s22 + $0x2] sm:$0x3]  ;;  %v6033_v44 = vld [vmem:[%s8783_s22 + $0x4] sm:$0x3] }
 0x295   : > { %v1410_v58 = vrot.slane %v1403_v46, %v8201_v52  ;;  %v1452_v59 = vcombine.low %v1435_v48, %v1443_v51  ;;  %v1560_v60 = vcombine.high %v1544_v53, %v7618_v49  ;;  %v1567_v61 = vrot.slane %v1544_v53, %v8201_v52 }
 0x296   : > { %v1451_v62 = vrot.slane %v1444_v55, %v8201_v52  ;;  %v1559_v63 = vrot.slane %v1545_v56, %v8201_v52  ;;  %v1579_v3 = vcombine.low %v1503_v11, %v1510_v20  ;;  %v5994_v4 = vcombine.high %v1503_v11, %v1510_v20 }
 0x297   : > { %v1411_v5 = vcombine.low %v1402_v54, %v1410_v58  ;;  %v1459_v6 = vrot.slane %v1452_v59, %v8201_v52  ;;  %v1574_v7 = vrot.slane %v1560_v60, %v8201_v52  ;;  %v1595_v8 = vcombine.low %v1518_v28, %v1525_v29 }
 0x298   : > { %v1586_v9 = vrot.slane %v1579_v3, %v8195_v47  ;;  %v1594_v10 = vrot.slane %v5994_v4, %v8195_v47  ;;  %v5995_v12 = vcombine.high %v1518_v28, %v1525_v29  ;;  %v1628_v13 = vcombine.low %v1552_v57, %v1559_v63 }
 0x299   : > { %v1460_v14 = vcombine.low %v1451_v62, %v1459_v6  ;;  %v1465_v16 = vshrl.u32 %v1411_v5, 16  ;;  %v1602_v17 = vrot.slane %v1595_v8, %v8195_v47  ;;  %v5996_v19 = vcombine.high %v1552_v57, %v1559_v63 }
 0x29a   : > { %v1610_v21 = vrot.slane %v5995_v12, %v8195_v47  ;;  %v1611_v11 = vcombine.low %v1586_v9, %v1594_v10  ;;  %v1635_v20 = vrot.slane %v1628_v13, %v8195_v47  ;;  %v1644_v22 = vcombine.low %v1567_v61, %v1574_v7 }
 0x29b   : > { %v1463_v23 = vpack.i.b16 %v1460_v14, %v1411_v5  ;;  %v1466_v24 = vshrl.u32 %v1460_v14, 16  ;;  %v1643_v25 = vrot.slane %v5996_v19, %v8195_v47  ;;  %v5997_v26 = vcombine.high %v1567_v61, %v1574_v7 }
 0x29c   : > { %v1619_v27 = vcombine.low %v1602_v17, %v1610_v21  ;;  %v1651_v28 = vrot.slane %v1644_v22, %v8195_v47  ;;  %v1618_v33 = vrot.slane %v1611_v11, %v8201_v52  ;;  %v1727_v45 = vrot.slane %v5998_v43, %v8181_v15 }
 0x29d   : > { %v1467_v29 = vpack.i.b16 %v1466_v24, %v1465_v16  ;;  %1469 = vst [vmem:[#allocation2] sm:$0xff] %v1463_v23  ;;  %v1659_v30 = vrot.slane %v5997_v26, %v8195_v47  ;;  %v1660_v31 = vcombine.low %v1635_v20, %v1643_v25  ;;  %v1986_v46 = vrot.slane %v6033_v44, %v8181_v15 }
 0x29e   : > { %v1626_v32 = vrot.slane %v1619_v27, %v8201_v52  ;;  %v1731_v53 = vrot.slane %v5998_v43, %v8189_v18  ;;  %v1990_v54 = vrot.slane %v6033_v44, %v8189_v18 }
 0x29f   : > { %1470 = vst [vmem:[#allocation2 + $0x8] sm:$0xff] %v1467_v29  ;;  %v1668_v34 = vcombine.low %v1651_v28, %v1659_v30  ;;  %v1667_v36 = vrot.slane %v1660_v31, %v8201_v52 }
 0x2a0   : > { %v1627_v35 = vcombine.low %v1618_v33, %v1626_v32 }
 0x2a1   : > { %v1675_v37 = vrot.slane %v1668_v34, %v8201_v52 }
 0x2a2   : > { %v1681_v40 = vshrl.u32 %v1627_v35, 16 }
 0x2a3   : > { %v1676_v38 = vcombine.low %v1667_v36, %v1675_v37 }
 0x2a5   : > { %v1679_v39 = vpack.i.b16 %v1676_v38, %v1627_v35  ;;  %v1682_v41 = vshrl.u32 %v1676_v38, 16 }
 0x2a7   : > { %v1683_v42 = vpack.i.b16 %v1682_v41, %v1681_v40  ;;  %1686 = vst [vmem:[#allocation2 + $0x10] sm:$0xff] %v1679_v39 }
 0x2a9   : > { %1687 = vst [vmem:[#allocation2 + $0x18] sm:$0xff] %v1683_v42 }
 0x2bd   : > { %v1938_v48 = vpop.f32.mrb[4].mxu0 }
 0x2be   : > { %v2187_v51 = vpop.f32.mrb[4].mxu1  ;;  %v1940_v55 = vpop.f32.mrb[5].mxu0  ;;  %v1939_v59 = vadd.f32 %v1938_v48, %v1727_v45 }
 0x2bf   : > { %v2189_v56 = vpop.f32.mrb[5].mxu1  ;;  %v1942_v57 = vpop.f32.mrb[6].mxu0  ;;  %v2188_v60 = vadd.f32 %v2187_v51, %v1986_v46  ;;  %v1941_v4 = vadd.f32 %v1940_v55, %v1731_v53 }
 0x2c0   : > { %v2191_v58 = vpop.f32.mrb[6].mxu1  ;;  %v1943_v61 = vadd.f32 %v1942_v57, %v1727_v45  ;;  %v1944_v63 = vpop.f32.mrb[7].mxu0  ;;  %v2190_v5 = vadd.f32 %v2189_v56, %v1990_v54 }
 0x2c1   : > { %v2192_v62 = vadd.f32 %v2191_v58, %v1986_v46  ;;  %v2193_v3 = vpop.f32.mrb[7].mxu1  ;;  %v1945_v6 = vadd.f32 %v1944_v63, %v1731_v53 }
 0x2c2   : > { %v2194_v15 = vadd.f32 %v2193_v3, %v1990_v54  ;;  %v2196_v7 = vpack.c.bf16 %v1943_v61, %v1939_v59 }
 0x2c3   : > { %v2412_v8 = vpack.c.bf16 %v2192_v62, %v2188_v60  ;;  %v2197_v9 = vpack.c.bf16 %v1945_v6, %v1941_v4 }
 0x2c4   : > { %v2413_v10 = vpack.c.bf16 %v2194_v15, %v2190_v5  ;;  %v2202_v12 = vshrl.u32 %v2196_v7, 16 }
 0x2c5   : > { %v2418_v18 = vshrl.u32 %v2412_v8, 16  ;;  %v2200_v13 = vpack.i.b16 %v2197_v9, %v2196_v7  ;;  %v2203_v14 = vshrl.u32 %v2197_v9, 16 }
 0x2c6   : > { %v2416_v16 = vpack.i.b16 %v2413_v10, %v2412_v8  ;;  %v2419_v17 = vshrl.u32 %v2413_v10, 16 }
 0x2c7   : > { %v2204_v19 = vpack.i.b16 %v2203_v14, %v2202_v12  ;;  %v2206_v21 = vcombine.high %v2200_v13, %v8199_v50  ;;  %v2213_v11 = vrot.slane %v2200_v13, %v8195_v47 }
 0x2c8   : > { %v2420_v20 = vpack.i.b16 %v2419_v17, %v2418_v18  ;;  %v2422_v22 = vcombine.high %v2416_v16, %v8199_v50  ;;  %v2429_v23 = vrot.slane %v2416_v16, %v8195_v47 }
 0x2c9   : > { %v2220_v24 = vrot.slane %v2206_v21, %v8195_v47  ;;  %v2221_v25 = vcombine.high %v2213_v11, %v7618_v49  ;;  %v2228_v26 = vrot.slane %v2213_v11, %v8201_v52  ;;  %v2255_v27 = vcombine.high %v2204_v19, %v8199_v50 }
 0x2ca   : > { %v2262_v28 = vrot.slane %v2204_v19, %v8195_v47  ;;  %v2436_v29 = vrot.slane %v2422_v22, %v8195_v47  ;;  %v2437_v30 = vcombine.high %v2429_v23, %v7618_v49  ;;  %v2444_v31 = vrot.slane %v2429_v23, %v8201_v52 }
 0x2cb   : > { %v2235_v32 = vrot.slane %v2221_v25, %v8201_v52  ;;  %v2236_v33 = vcombine.high %v2220_v24, %v7618_v49  ;;  %v2243_v34 = vrot.slane %v2220_v24, %v8201_v52  ;;  %v2269_v35 = vrot.slane %v2255_v27, %v8195_v47 }
 0x2cc   : > { %v2270_v36 = vcombine.high %v2262_v28, %v7618_v49  ;;  %v2277_v37 = vrot.slane %v2262_v28, %v8201_v52  ;;  %v2451_v38 = vrot.slane %v2437_v30, %v8201_v52  ;;  %v2452_v39 = vcombine.high %v2436_v29, %v7618_v49 }
 0x2cd   : > { %v2250_v40 = vrot.slane %v2236_v33, %v8201_v52  ;;  %v2285_v41 = vcombine.high %v2269_v35, %v7618_v49  ;;  %v2292_v42 = vrot.slane %v2269_v35, %v8201_v52  ;;  %v2304_v43 = vcombine.low %v2228_v26, %v2235_v32 }
 0x2ce   : > { %v2284_v44 = vrot.slane %v2270_v36, %v8201_v52  ;;  %v6066_v45 = vcombine.high %v2228_v26, %v2235_v32  ;;  %v2459_v46 = vrot.slane %v2436_v29, %v8201_v52  ;;  %v2466_v48 = vrot.slane %v2452_v39, %v8201_v52 }
 0x2cf   : > { %v2299_v51 = vrot.slane %v2285_v41, %v8201_v52  ;;  %v2311_v53 = vrot.slane %v2304_v43, %v8195_v47  ;;  %v2320_v54 = vcombine.low %v2243_v34, %v2250_v40  ;;  %v6067_v55 = vcombine.high %v2243_v34, %v2250_v40 }
 0x2d0   : > { %v2319_v56 = vrot.slane %v6066_v45, %v8195_v47  ;;  %v2353_v57 = vcombine.low %v2277_v37, %v2284_v44  ;;  %v6068_v58 = vcombine.high %v2277_v37, %v2284_v44  ;;  %v2471_v59 = vcombine.high %v2420_v20, %v8199_v50 }
 0x2d1   : > { %v2327_v60 = vrot.slane %v2320_v54, %v8195_v47  ;;  %v2335_v61 = vrot.slane %v6067_v55, %v8195_v47  ;;  %v2369_v62 = vcombine.low %v2292_v42, %v2299_v51  ;;  %v6069_v63 = vcombine.high %v2292_v42, %v2299_v51 }
 0x2d2   : > { %v2336_v3 = vcombine.low %v2311_v53, %v2319_v56  ;;  %v2360_v4 = vrot.slane %v2353_v57, %v8195_v47  ;;  %v2368_v5 = vrot.slane %v6068_v58, %v8195_v47  ;;  %v2478_v6 = vrot.slane %v2420_v20, %v8195_v47 }
 0x2d3   : > { %v2344_v15 = vcombine.low %v2327_v60, %v2335_v61  ;;  %v2376_v7 = vrot.slane %v2369_v62, %v8195_v47  ;;  %v2384_v8 = vrot.slane %v6069_v63, %v8195_v47  ;;  %v2485_v50 = vrot.slane %v2471_v59, %v8195_v47 }
 0x2d4   : > { %v2343_v9 = vrot.slane %v2336_v3, %v8201_v52  ;;  %v2385_v10 = vcombine.low %v2360_v4, %v2368_v5  ;;  %v2486_v12 = vcombine.high %v2478_v6, %v7618_v49  ;;  %v2493_v18 = vrot.slane %v2478_v6, %v8201_v52 }
 0x2d5   : > { %v2351_v13 = vrot.slane %v2344_v15, %v8201_v52  ;;  %v2393_v14 = vcombine.low %v2376_v7, %v2384_v8  ;;  %v2501_v16 = vcombine.high %v2485_v50, %v7618_v49  ;;  %v2508_v17 = vrot.slane %v2485_v50, %v8201_v52 }
 0x2d6   : > { %v2392_v19 = vrot.slane %v2385_v10, %v8201_v52  ;;  %v2500_v21 = vrot.slane %v2486_v12, %v8201_v52  ;;  %v2520_v11 = vcombine.low %v2444_v31, %v2451_v38  ;;  %v6070_v20 = vcombine.high %v2444_v31, %v2451_v38 }
 0x2d7   : > { %v2352_v22 = vcombine.low %v2343_v9, %v2351_v13  ;;  %v2400_v23 = vrot.slane %v2393_v14, %v8201_v52  ;;  %v2515_v24 = vrot.slane %v2501_v16, %v8201_v52  ;;  %v2536_v25 = vcombine.low %v2459_v46, %v2466_v48 }
 0x2d8   : > { %v2527_v26 = vrot.slane %v2520_v11, %v8195_v47  ;;  %v2535_v27 = vrot.slane %v6070_v20, %v8195_v47  ;;  %v6071_v28 = vcombine.high %v2459_v46, %v2466_v48  ;;  %v2569_v49 = vcombine.low %v2493_v18, %v2500_v21 }
 0x2d9   : > { %v2401_v29 = vcombine.low %v2392_v19, %v2400_v23  ;;  %v2406_v30 = vshrl.u32 %v2352_v22, 16  ;;  %v2543_v32 = vrot.slane %v2536_v25, %v8195_v47  ;;  %v6072_v33 = vcombine.high %v2493_v18, %v2500_v21 }
 0x2da   : > { %v2551_v34 = vrot.slane %v6071_v28, %v8195_v47  ;;  %v2552_v31 = vcombine.low %v2527_v26, %v2535_v27  ;;  %v2576_v35 = vrot.slane %v2569_v49, %v8195_v47  ;;  %v2585_v36 = vcombine.low %v2508_v17, %v2515_v24 }
 0x2db   : > { %v2404_v37 = vpack.i.b16 %v2401_v29, %v2352_v22  ;;  %v2407_v38 = vshrl.u32 %v2401_v29, 16  ;;  %v2584_v39 = vrot.slane %v6072_v33, %v8195_v47  ;;  %v6073_v40 = vcombine.high %v2508_v17, %v2515_v24 }
 0x2dc   : > { %v2560_v41 = vcombine.low %v2543_v32, %v2551_v34  ;;  %v2592_v42 = vrot.slane %v2585_v36, %v8195_v47  ;;  %v2559_v48 = vrot.slane %v2552_v31, %v8201_v52 }
 0x2dd   : > { %v2408_v43 = vpack.i.b16 %v2407_v38, %v2406_v30  ;;  %2410 = vst [vmem:[#allocation3] sm:$0xff] %v2404_v37  ;;  %v2600_v44 = vrot.slane %v6073_v40, %v8195_v47  ;;  %v2601_v45 = vcombine.low %v2576_v35, %v2584_v39 }
 0x2de   : > { %v2567_v46 = vrot.slane %v2560_v41, %v8201_v52 }
 0x2df   : > { %2411 = vst [vmem:[#allocation3 + $0x8] sm:$0xff] %v2408_v43  ;;  %v2609_v51 = vcombine.low %v2592_v42, %v2600_v44  ;;  %v2608_v54 = vrot.slane %v2601_v45, %v8201_v52 }
 0x2e0   : > { %v2568_v53 = vcombine.low %v2559_v48, %v2567_v46 }
 0x2e1   : > { %v2616_v55 = vrot.slane %v2609_v51, %v8201_v52 }
 0x2e2   : > { %v2622_v58 = vshrl.u32 %v2568_v53, 16 }
 0x2e3   : > { %v2617_v56 = vcombine.low %v2608_v54, %v2616_v55 }
 0x2e5   : > { %v2620_v57 = vpack.i.b16 %v2617_v56, %v2568_v53  ;;  %v2623_v59 = vshrl.u32 %v2617_v56, 16 }
 0x2e7   : > { %v2624_v60 = vpack.i.b16 %v2623_v59, %v2622_v58  ;;  %2627 = vst [vmem:[#allocation3 + $0x10] sm:$0xff] %v2620_v57 }
 0x2e9   : > { %2628 = vst [vmem:[#allocation3 + $0x18] sm:$0xff] %v2624_v60 }
 0x2ea PF: > { %v6795_v47 = vld [vmem:[#allocation13 + $0x4] ss:$8 sps:$4 sm:$0xff]   ;;  %v6078_v61 = vcombine.high %v8168_v0, %v8168_v0  ;;  %v6797_v62 = vld [vmem:[#allocation13] ss:$8 sps:$4 sm:$0xff]   ;;  %v6798_v63 = vld [vmem:[#allocation13 + $0x14] ss:$8 sps:$4 sm:$0xff]   ;;  %v6077_v29 = vcombine.low %v8168_v0, %v8168_v0  ;;  %v2630_v33 = vlaneseq }
 0x2eb   : > { %2893 = vmatprep.subr.bf16.mxu0 %v6795_v47  ;;  %v6800_v3 = vld [vmem:[#allocation13 + $0x10] ss:$8 sps:$4 sm:$0xff]   ;;  %v6801_v52 = vld [vmem:[#allocation13 + $0x24] ss:$8 sps:$4 sm:$0xff]   ;;  %v6803_v4 = vld [vmem:[#allocation13 + $0x20] ss:$8 sps:$4 sm:$0xff]  }
 0x2ec   : > { %2925 = vmatprep.mubr.bf16.mxu0 %v6078_v61  ;;  %2894 = vmatpush1.bf16.msra.mxu0 %v6797_v62  ;;  %v6804_v5 = vld [vmem:[#allocation13 + $0x34] ss:$8 sps:$4 sm:$0xff]   ;;  %v6806_v6 = vld [vmem:[#allocation13 + $0x30] ss:$8 sps:$4 sm:$0xff]   ;;  %v6807_v15 = vld [vmem:[#allocation13 + $0x44] ss:$8 sps:$4 sm:$0xff]  }
 0x2ed   : > { %2895 = vmatprep.subr.bf16.mxu0 %v6798_v63  ;;  %v6809_v7 = vld [vmem:[#allocation13 + $0x40] ss:$8 sps:$4 sm:$0xff]   ;;  %v6810_v8 = vld [vmem:[#allocation13 + $0x54] ss:$8 sps:$4 sm:$0xff]   ;;  %v6812_v50 = vld [vmem:[#allocation13 + $0x50] ss:$8 sps:$4 sm:$0xff]  }
 0x2ee   : > { %v6813_v9 = vld [vmem:[#allocation13 + $0x64] ss:$8 sps:$4 sm:$0xff]   ;;  %v6815_v10 = vld [vmem:[#allocation13 + $0x60] ss:$8 sps:$4 sm:$0xff]   ;;  %v6816_v12 = vld [vmem:[#allocation13 + $0x74] ss:$8 sps:$4 sm:$0xff]  }
 0x2ef   : > { %v6818_v18 = vld [vmem:[#allocation13 + $0x70] ss:$8 sps:$4 sm:$0xff]   ;;  %v6819_v13 = vld [vmem:[#allocation13 + $0x84] ss:$8 sps:$4 sm:$0xff]   ;;  %v6821_v14 = vld [vmem:[#allocation13 + $0x80] ss:$8 sps:$4 sm:$0xff]  }
 0x2f0   : > { %2896 = vmatpush1.bf16.msra.mxu0 %v6800_v3  ;;  %v6822_v16 = vld [vmem:[#allocation13 + $0x94] ss:$8 sps:$4 sm:$0xff]   ;;  %v6824_v17 = vld [vmem:[#allocation13 + $0x90] ss:$8 sps:$4 sm:$0xff]   ;;  %v6825_v19 = vld [vmem:[#allocation13 + $0xa4] ss:$8 sps:$4 sm:$0xff]  }
 0x2f1   : > { %2897 = vmatprep.subr.bf16.mxu0 %v6801_v52  ;;  %v6827_v21 = vld [vmem:[#allocation13 + $0xa0] ss:$8 sps:$4 sm:$0xff]   ;;  %v6828_v11 = vld [vmem:[#allocation13 + $0xb4] ss:$8 sps:$4 sm:$0xff]   ;;  %v6830_v20 = vld [vmem:[#allocation13 + $0xb0] ss:$8 sps:$4 sm:$0xff]  }
 0x2f2   : > { %v6831_v22 = vld [vmem:[#allocation13 + $0xc4] ss:$8 sps:$4 sm:$0xff]   ;;  %v6833_v23 = vld [vmem:[#allocation13 + $0xc0] ss:$8 sps:$4 sm:$0xff]   ;;  %v6834_v24 = vld [vmem:[#allocation13 + $0xd4] ss:$8 sps:$4 sm:$0xff]  }
 0x2f3   : > { %v6836_v25 = vld [vmem:[#allocation13 + $0xd0] ss:$8 sps:$4 sm:$0xff]   ;;  %v6837_v26 = vld [vmem:[#allocation13 + $0xe4] ss:$8 sps:$4 sm:$0xff]   ;;  %v6839_v27 = vld [vmem:[#allocation13 + $0xe0] ss:$8 sps:$4 sm:$0xff]  }
 0x2f4   : > { %2898 = vmatpush1.bf16.msra.mxu0 %v6803_v4  ;;  %v6840_v28 = vld [vmem:[#allocation13 + $0xf4] ss:$8 sps:$4 sm:$0xff]   ;;  %v6842_v49 = vld [vmem:[#allocation13 + $0xf0] ss:$8 sps:$4 sm:$0xff]   ;;  %v7619_v32 = vmov 0.0   ;;  %vm7620_vm0 = vmmov 0  }
 0x2f5   : > { %2899 = vmatprep.subr.bf16.mxu0 %v6804_v5  ;;  %v3072_v30 = vld [vmem:[#allocation2] sm:$0xff]  ;;  %6373 = vmatprep.subr.bf16.mxu1 %v7619_v32  ;;  %v8342_v34 = vshrl.u32 %v2630_v33, 7  ;;  %v7621_v35 = vmov 1983009808   ;;  %s8784_s9 = sld [smem:[#allocation46_spill]]  ;;  %v7623_v47 = vmov 0  }
 0x2f6   : > { %6375 = vmatprep.mubr.msk.bf16.mxu1 %vm7620_vm0, %v7619_v32  ;;  %6374 = vmatpush3.bf16.xpose.msra.mxu1 %v3072_v30  ;;  %v2936_v36 = vunpack.c.l.s4 %v7621_v35  ;;  %v7622_v39 = vmov 1934713408   ;;  %s8785_s7 = sld [smem:[#allocation30_spill]]  ;;  %vm3157_vm2 = vcmask 130048   ;;  %s8786_s15 = sld [smem:[#allocation53_spill]] }
 0x2f7   : > { %6379 = vmatprep.subr.bf16.mxu1 %v7619_v32  ;;  %v8345_v31 = vsub.s32 0, %v8342_v34  ;;  %v8351_v38 = vsub.s32 1, %v8342_v34  ;;  %v2944_v40 = vunpack.c.l.s4 %v7622_v39  ;;  %s8787_s8 = sld [smem:[#allocation54_spill]]  ;;  %s8788_s12 = sld [smem:[#allocation48_spill]] }
 0x2f8   : > { %2900 = vmatpush1.bf16.msra.mxu0 %v6806_v6  ;;  %v2937_v42 = vunpack.c.0.s8 %v2936_v36  ;;  %s8790_s25 = sld [smem:[#allocation52_spill]]  ;;  %s8791_s18 = sld [smem:[#allocation31_spill]] }
 0x2f9   : > { %2901 = vmatprep.subr.bf16.mxu0 %v6807_v15  ;;  %v2945_v44 = vunpack.c.0.s8 %v2944_v40  ;;  %s8792_s22 = sld [smem:[#allocation39_spill]]  ;;  %s5687_s6 = sshll.u32 %s8174_s29, 4  ;;  %s8572_s6 = int_to_ptr.vmem [resolvable:$true] %s5687_s6 }
 0x2fa   : > { %v8356_v48 = vsub.s32 %v2937_v42, %v8342_v34  ;;  %s8793_s19 = sld [smem:[#allocation55_spill]]  ;;  %s5671_s10 = scalar_lea.sflag [#allocation6], %s8137_s24 }
 0x2fb   : > { %v2679_v37 = vld [vmem:[%s8784_s9] sm:$0x3]  ;;  %v8359_v56 = vsub.s32 %v2945_v44, %v8342_v34  ;;  %s7463_s4 = scalar_lea.vmem %s8572_s6, 256 }
 0x2fc   : > { %2902 = vmatpush1.bf16.msra.mxu0 %v6809_v7  ;;  %v2719_v41 = vrot.slane %v2679_v37, %v8345_v31  ;;  %v2723_v43 = vrot.slane %v2679_v37, %v8351_v38  ;;  %s6074_s11 = sshll.u32 %s8785_s7, 3  ;;  %s6350_s13 = sshll.u32 %s8785_s7, 1 }
 0x2fd   : > { %2903 = vmatprep.subr.bf16.mxu0 %v6810_v8  ;;  %p7464_p1 = scmp.ne.s32.totalorder %s8572_s6, %s7463_s4 }
 0x2fe   : > { %s6351_s17 = sshll.u32 %s8791_s18, 2 }
 0x2ff   : > { %s5683_s1 = sadd.s32 %s6351_s17, %s6350_s13  ;;  %p8795_p0 = scmp.ne.s32.totalorder %s8792_s22, 0 }
 0x300   : > { %2904 = vmatpush1.bf16.msra.mxu0 %v6812_v50  ;;  %s6352_s7 = sshll.u32 %s5683_s1, 7 }
 0x301   : > { %2905 = vmatprep.subr.bf16.mxu0 %v6813_v9  ;;  %p7465_p5 = pnand %p7464_p1, %p8795_p0 }
 0x303   : > { %p7466_p13 = pneg %p7465_p5 }
 0x304   : > { %2906 = vmatpush1.bf16.msra.mxu0 %v6815_v10 }
 0x305   : > { %2907 = vmatprep.subr.bf16.mxu0 %v6816_v12 }
 0x308   : > { %2908 = vmatpush1.bf16.msra.mxu0 %v6818_v18 }
 0x309   : > { %2909 = vmatprep.subr.bf16.mxu0 %v6819_v13 }
 0x30c   : > { %2910 = vmatpush1.bf16.msra.mxu0 %v6821_v14 }
 0x30d   : > { %2911 = vmatprep.subr.bf16.mxu0 %v6822_v16 }
 0x310   : > { %2912 = vmatpush1.bf16.msra.mxu0 %v6824_v17 }
 0x311   : > { %2913 = vmatprep.subr.bf16.mxu0 %v6825_v19 }
 0x314   : > { %2914 = vmatpush1.bf16.msra.mxu0 %v6827_v21 }
 0x315   : > { %2915 = vmatprep.subr.bf16.mxu0 %v6828_v11 }
 0x318   : > { %2916 = vmatpush1.bf16.msra.mxu0 %v6830_v20 }
 0x319   : > { %2917 = vmatprep.subr.bf16.mxu0 %v6831_v22 }
 0x31c   : > { %2918 = vmatpush1.bf16.msra.mxu0 %v6833_v23 }
 0x31d   : > { %2919 = vmatprep.subr.bf16.mxu0 %v6834_v24 }
 0x320   : > { %2920 = vmatpush1.bf16.msra.mxu0 %v6836_v25 }
 0x321   : > { %2921 = vmatprep.subr.bf16.mxu0 %v6837_v26 }
 0x324   : > { %2922 = vmatpush1.bf16.msra.mxu0 %v6839_v27 }
 0x325   : > { %2923 = vmatprep.subr.bf16.mxu0 %v6840_v28 }
 0x328   : > { %2924 = vmatpush1.bf16.msra.mxu0 %v6842_v49 }
 0x32b   : > { %2926 = vmatmul.mubr.bf16.vlgmr.msra.gmra.mrb[0].mxu0 %v6077_v29 }
 0x3fe   : > { %v2927_v45 = vpop.f32.mrb[0].mxu0 }
 0x3ff   : > { %v2928_v46 = vadd.f32 %v2927_v45, %v2719_v41  ;;  %v2929_v51 = vpop.f32.mrb[1].mxu0  ;;  %v2632_v45 = vstv %s6074_s11  ;;  %s8789_s11 = sld [smem:[#allocation50_spill]] }
 0x400   : > { %v2930_v53 = vadd.f32 %v2929_v51, %v2723_v43  ;;  %v2931_v54 = vpop.f32.mrb[2].mxu0  ;;  %v3073_v43 = vld [vmem:[#allocation2 + $0x8] sm:$0xff]  ;;  %v2635_v51 = vand.u32 127, %v2630_v33 }
 0x401   : > { %v2934_v55 = vpack.c.bf16 %v2928_v46, %v2928_v46  ;;  %v2932_v57 = vpop.f32.mrb[3].mxu0  ;;  %v2633_v46 = vadd.s32 %v2632_v45, %v8342_v34  ;;  %v6867_v45 = vld [vmem:[#allocation13 + $0x380] ss:$8 sps:$4 sm:$0xff]  }
 0x402   : > { %v2959_v58 = vpack.c.bf16 %v2930_v53, %v2930_v53  ;;  %v7624_v53 = vmov -10000.0  }
 0x403   : > { %v2941_v59 = vrot.slane %v2934_v55, %v8356_v48  ;;  %vm2636_vm1 = vcmp.le.s32.totalorder %v2635_v51, %v2633_v46  ;;  %v6872_v46 = vld [vmem:[#allocation13 + $0x394] ss:$8 sps:$4 sm:$0xff]   ;;  %v6870_v51 = vld [vmem:[#allocation13 + $0x390] ss:$8 sps:$4 sm:$0xff]  }
 0x404   : > { %v2966_v60 = vrot.slane %v2959_v58, %v8356_v48  ;;  %v2637_v54 = vsel %vm2636_vm1, 0.0, %v7624_v53  ;;  %v6875_v53 = vld [vmem:[#allocation13 + $0x3a4] ss:$8 sps:$4 sm:$0xff]  }
 0x405   : > { %v2942_v61 = vcombine.high %v2941_v59, %v7623_v47  ;;  %v2949_v62 = vrot.slane %v2941_v59, %v8359_v56  ;;  %v2644_v55 = vadd.f32 %v8170_v1, %v2637_v54  ;;  %v6873_v54 = vld [vmem:[#allocation13 + $0x3a0] ss:$8 sps:$4 sm:$0xff]  }
 0x406   : > { %v2967_v63 = vcombine.high %v2966_v60, %v7623_v47  ;;  %v2974_v3 = vrot.slane %v2966_v60, %v8359_v56 }
 0x407   : > { %v2956_v52 = vrot.slane %v2942_v61, %v8359_v56  ;;  %v2957_v4 = vcombine.high %v2949_v62, %v7623_v47  ;;  %v2988_v5 = vshrl.u32 %v2949_v62, 16 }
 0x408   : > { %v2981_v6 = vrot.slane %v2967_v63, %v8359_v56  ;;  %v2982_v15 = vcombine.high %v2974_v3, %v7623_v47  ;;  %v2986_v7 = vpack.i.b16 %v2974_v3, %v2949_v62  ;;  %v2989_v8 = vshrl.u32 %v2974_v3, 16 }
 0x409   : > { %v2958_v50 = vcombine.high %v2956_v52, %v7623_v47  ;;  %v2996_v9 = vshrl.u32 %v2957_v4, 16  ;;  %v3004_v10 = vshrl.u32 %v2956_v52, 16 }
 0x40a   : > { %v2983_v12 = vcombine.high %v2981_v6, %v7623_v47  ;;  %v2990_v18 = vpack.i.b16 %v2989_v8, %v2988_v5  ;;  %v2994_v13 = vpack.i.b16 %v2982_v15, %v2957_v4  ;;  %v2997_v14 = vshrl.u32 %v2982_v15, 16 }
 0x40b   : > { %v3012_v16 = vshrl.u32 %v2958_v50, 16  ;;  %v3002_v17 = vpack.i.b16 %v2981_v6, %v2956_v52  ;;  %v3005_v19 = vshrl.u32 %v2981_v6, 16 }
 0x40c   : > { %v2998_v21 = vpack.i.b16 %v2997_v14, %v2996_v9  ;;  %v3010_v11 = vpack.i.b16 %v2983_v12, %v2958_v50  ;;  %v3013_v20 = vshrl.u32 %v2983_v12, 16 }
 0x40d   : > { %v3006_v22 = vpack.i.b16 %v3005_v19, %v3004_v10  ;;  %v3016_v23 = vcombine.low %v2986_v7, %v3002_v17 }
 0x40e   : > { %v3014_v24 = vpack.i.b16 %v3013_v20, %v3012_v16  ;;  %v3024_v25 = vcombine.low %v2994_v13, %v3010_v11  ;;  %v3075_v13 = vld [vmem:[#allocation2 + $0x10] sm:$0xff]  ;;  %v3076_v11 = vld [vmem:[#allocation2 + $0x18] sm:$0xff] }
 0x40f   : > { %v3040_v26 = vcombine.low %v2990_v18, %v3006_v22  ;;  %v3023_v27 = vrot.slane %v3016_v23, %v8356_v48  ;;  %v6845_v20 = vld [vmem:[#allocation13 + $0x304] ss:$8 sps:$4 sm:$0xff]  }
 0x410   : > { %v3031_v28 = vrot.slane %v3024_v25, %v8356_v48  ;;  %v3048_v49 = vcombine.low %v2998_v21, %v3014_v24  ;;  %v6843_v24 = vld [vmem:[#allocation13 + $0x300] ss:$8 sps:$4 sm:$0xff]  }
 0x411   : > { %v3047_v30 = vrot.slane %v3040_v26, %v8356_v48  ;;  %v6848_v26 = vld [vmem:[#allocation13 + $0x314] ss:$8 sps:$4 sm:$0xff]  }
 0x412   : > { %v3032_v29 = vcombine.low %v3023_v27, %v3031_v28  ;;  %v3055_v35 = vrot.slane %v3048_v49, %v8356_v48  ;;  %v6846_v27 = vld [vmem:[#allocation13 + $0x310] ss:$8 sps:$4 sm:$0xff]   ;;  %v6851_v28 = vld [vmem:[#allocation13 + $0x324] ss:$8 sps:$4 sm:$0xff]   ;;  %v6849_v49 = vld [vmem:[#allocation13 + $0x320] ss:$8 sps:$4 sm:$0xff]  }
 0x414   : > { %v3039_v36 = vrot.slane %v3032_v29, %v8359_v56  ;;  %v3056_v37 = vcombine.low %v3047_v30, %v3055_v35  ;;  %v6854_v29 = vld [vmem:[#allocation13 + $0x334] ss:$8 sps:$4 sm:$0xff]   ;;  %v6852_v30 = vld [vmem:[#allocation13 + $0x330] ss:$8 sps:$4 sm:$0xff]   ;;  %v6857_v35 = vld [vmem:[#allocation13 + $0x344] ss:$8 sps:$4 sm:$0xff]  }
 0x416   : > { %v3063_v39 = vrot.slane %v3056_v37, %v8359_v56  ;;  %v3068_v41 = vshrl.u32 %v3039_v36, 16  ;;  %v6860_v37 = vld [vmem:[#allocation13 + $0x354] ss:$8 sps:$4 sm:$0xff]  }
 0x418   : > { %v3066_v40 = vpack.i.b16 %v3063_v39, %v3039_v36  ;;  %v3069_v42 = vshrl.u32 %v3063_v39, 16  ;;  %v6855_v36 = vld [vmem:[#allocation13 + $0x340] ss:$8 sps:$4 sm:$0xff]   ;;  %v6858_v39 = vld [vmem:[#allocation13 + $0x350] ss:$8 sps:$4 sm:$0xff]  }
 0x41a   : > { %6376 = vmatmul.mubr.bf16.vlgmr.msra.gmra.mrb[0].mxu1 %v3066_v40  ;;  %v3070_v44 = vpack.i.b16 %v3069_v42, %v3068_v41  ;;  %v6863_v40 = vld [vmem:[#allocation13 + $0x364] ss:$8 sps:$4 sm:$0xff]   ;;  %v6861_v41 = vld [vmem:[#allocation13 + $0x360] ss:$8 sps:$4 sm:$0xff]   ;;  %v6866_v42 = vld [vmem:[#allocation13 + $0x374] ss:$8 sps:$4 sm:$0xff]  }
 0x41b   : > { %6380 = vmatpush3.bf16.xpose.msra.mxu1 %v3073_v43  ;;  %6381 = vmatprep.mubr.msk.bf16.mxu1 %vm7620_vm0, %v7619_v32  ;;  %v6864_v43 = vld [vmem:[#allocation13 + $0x370] ss:$8 sps:$4 sm:$0xff]  }
 0x41c   : > { %6385 = vmatprep.subr.bf16.mxu1 %v7619_v32 }
 0x422   : > { %6382 = vmatmul.mubr.bf16.vlgmr.msra.gmra.mrb[4].mxu1 %v3070_v44  ;;  %v6869_v44 = vld [vmem:[#allocation13 + $0x384] ss:$8 sps:$4 sm:$0xff]  }
 0x423   : > { %6387 = vmatprep.mubr.msk.bf16.mxu1 %vm7620_vm0, %v7619_v32  ;;  %6386 = vmatpush3.bf16.msra.mxu1 %v3075_v13 }
 0x424   : > { %6391 = vmatprep.subr.bf16.mxu1 %v7619_v32 }
 0x4ed   : > { %v3111_v57 = vpop.f32.mrb[0].mxu1 }
 0x4ee   : > { %v3112_v58 = vadd.f32 %v3111_v57, %v2644_v55  ;;  %v6377_v59 = vpop.f32.mrb[1].mxu1  ;;  %v6876_v57 = vld [vmem:[#allocation13 + $0x3b0] ss:$8 sps:$4 sm:$0xff]  }
 0x4ef   : > { %v3114_v60 = vpop.f32.mrb[2].mxu1  ;;  %v6879_v59 = vld [vmem:[#allocation13 + $0x3c0] ss:$8 sps:$4 sm:$0xff]  }
 0x4f0   : > { %v6378_v61 = vpop.f32.mrb[3].mxu1  ;;  %v3158_v62 = vsel %vm3157_vm2, %v3112_v58, -inf  ;;  %v6882_v60 = vld [vmem:[#allocation13 + $0x3d0] ss:$8 sps:$4 sm:$0xff]  }
 0x4f1   : > { %3159 = vmax.xlane.f32.xlu0 %v3158_v62  ;;  %v6884_v61 = vld [vmem:[#allocation13 + $0x3d4] ss:$8 sps:$4 sm:$0xff]   ;;  %v6887_v62 = vld [vmem:[#allocation13 + $0x3e4] ss:$8 sps:$4 sm:$0xff]  }
 0x4f5   : > { %v3151_v63 = vpop.f32.mrb[4].mxu1 }
 0x4f6   : > { %v3152_v3 = vadd.f32 %v3151_v63, %v2644_v55  ;;  %v6383_v52 = vpop.f32.mrb[5].mxu1  ;;  %v6878_v55 = vld [vmem:[#allocation13 + $0x3b4] ss:$8 sps:$4 sm:$0xff]   ;;  %v6885_v63 = vld [vmem:[#allocation13 + $0x3e0] ss:$8 sps:$4 sm:$0xff]  }
 0x4f7   : > { %v3154_v4 = vpop.f32.mrb[6].mxu1  ;;  %v6888_v52 = vld [vmem:[#allocation13 + $0x3f0] ss:$8 sps:$4 sm:$0xff]  }
 0x4f8   : > { %v6384_v5 = vpop.f32.mrb[7].mxu1  ;;  %v3161_v33 = vsel %vm3157_vm2, %v3152_v3, -inf }
 0x4f9   : > { %3162 = vmax.xlane.f32.xlu0 %v3161_v33 }
 0x57e   : > { %v3160_v6 = vpop.xlane.xlu0 %3159 }
 0x57f   : > { %v3164_v15 = vsub.f32 %v3112_v58, %v3160_v6  ;;  %v6881_v58 = vld [vmem:[#allocation13 + $0x3c4] ss:$8 sps:$4 sm:$0xff]  }
 0x581   : > { %v3166_v1 = vmul.f32 1.442695, %v3164_v15 }
 0x583   : > { %7179 = vpow2.f32 %v3166_v1 }
 0x586   : > { %v3163_v7 = vpop.xlane.xlu0 %3162 }
 0x587   : > { %v3165_v8 = vsub.f32 %v3152_v3, %v3163_v7  ;;  %v6890_v3 = vld [vmem:[#allocation13 + $0x3f4] ss:$8 sps:$4 sm:$0xff]  }
 0x589   : > { %v3168_v50 = vmul.f32 1.442695, %v3165_v8 }
 0x58b   : > { %7181 = vpow2.f32 %v3168_v50 }
 0x58d   : > { %v7180_v9 = vpop.eup %7179 }
 0x58e   : > { %v3170_v10 = vsel %vm3157_vm2, %v7180_v9, 0.0 }
 0x58f   : > { %3171 = vadd.xlane.f32.xlu1 %v3170_v10 }
 0x595   : > { %v7182_v12 = vpop.eup %7181 }
 0x596   : > { %v3173_v18 = vsel %vm3157_vm2, %v7182_v12, 0.0 }
 0x597   : > { %3174 = vadd.xlane.f32.xlu1 %v3173_v18 }
 0x61c   : > { %v3172_v14 = vpop.xlane.xlu1 %3171 }
 0x61d   : > { %7183 = vrcp.f32 %v3172_v14 }
 0x624   : > { %v3175_v16 = vpop.xlane.xlu1 %3174 }
 0x625   : > { %7185 = vrcp.f32 %v3175_v16 }
 0x627   : > { %v7184_v17 = vpop.eup %7183 }
 0x628   : > { %v3178_v19 = vmul.f32 %v7184_v17, %v7180_v9 }
 0x62a   : > { %v3180_v21 = vpack.c.bf16 %v3178_v19, %v3178_v19 }
 0x62c   : > { %6388 = vmatmul.mubr.msk.bf16.vlgmr.msra.gmra.mrb[8].mxu1 %vm3157_vm2, %v3180_v21 }
 0x62d   : > { %6392 = vmatpush3.bf16.msra.mxu1 %v3076_v11  ;;  %6393 = vmatprep.mubr.msk.bf16.mxu1 %vm7620_vm0, %v7619_v32 }
 0x62e   : > { %3557 = vmatprep.subr.bf16.mxu1 %v6845_v20 }
 0x62f   : > { %v7186_v22 = vpop.eup %7185 }
 0x630   : > { %v3179_v23 = vmul.f32 %v7186_v22, %v7182_v12 }
 0x632   : > { %v3181_v25 = vpack.c.bf16 %v3179_v23, %v3179_v23 }
 0x634   : > { %6394 = vmatmul.mubr.msk.bf16.vlgmr.msra.gmra.mrb[12].mxu1 %vm3157_vm2, %v3181_v25 }
 0x635   : > { %3558 = vmatpush1.bf16.msra.mxu1 %v6843_v24 }
 0x636   : > { %3559 = vmatprep.subr.bf16.mxu1 %v6848_v26 }
 0x639   : > { %3560 = vmatpush1.bf16.msra.mxu1 %v6846_v27 }
 0x63a   : > { %3561 = vmatprep.subr.bf16.mxu1 %v6851_v28 }
 0x63d   : > { %3562 = vmatpush1.bf16.msra.mxu1 %v6849_v49 }
 0x63e   : > { %3563 = vmatprep.subr.bf16.mxu1 %v6854_v29 }
 0x641   : > { %3564 = vmatpush1.bf16.msra.mxu1 %v6852_v30 }
 0x642   : > { %3565 = vmatprep.subr.bf16.mxu1 %v6857_v35 }
 0x645   : > { %3566 = vmatpush1.bf16.msra.mxu1 %v6855_v36 }
 0x646   : > { %3567 = vmatprep.subr.bf16.mxu1 %v6860_v37 }
 0x649   : > { %3568 = vmatpush1.bf16.msra.mxu1 %v6858_v39 }
 0x64a   : > { %3569 = vmatprep.subr.bf16.mxu1 %v6863_v40 }
 0x64d   : > { %3570 = vmatpush1.bf16.msra.mxu1 %v6861_v41 }
 0x64e   : > { %3571 = vmatprep.subr.bf16.mxu1 %v6866_v42 }
 0x651   : > { %3572 = vmatpush1.bf16.msra.mxu1 %v6864_v43  ;;  %v6076_v43 = vld [vmem:[%s8784_s9 + $0x6] sm:$0x3]  ;;  %s8794_s9 = smov %s8793_s19 }
 0x652   : > { %3573 = vmatprep.subr.bf16.mxu1 %v6869_v44  ;;  %v3390_v44 = vrot.slane %v6076_v43, %v8345_v31 }
 0x655   : > { %3574 = vmatpush1.bf16.msra.mxu1 %v6867_v45  ;;  %v3394_v45 = vrot.slane %v6076_v43, %v8351_v38  ;;  %v3600_v43 = vld [vmem:[%s8786_s15] sm:$0x3] }
 0x656   : > { %3575 = vmatprep.subr.bf16.mxu1 %v6872_v46  ;;  %v2645_v46 = vunpack.c.l.bf16 %v8168_v0 }
 0x659   : > { %3576 = vmatpush1.bf16.msra.mxu1 %v6870_v51 }
 0x65a   : > { %3577 = vmatprep.subr.bf16.mxu1 %v6875_v53  ;;  %v2646_v53 = vunpack.c.h.bf16 %v8168_v0  ;;  %v6902_v0 = vld [vmem:[#allocation15 + $0x34] ss:$8 sps:$4 sm:$0xff]  }
 0x65d   : > { %3578 = vmatpush1.bf16.msra.mxu1 %v6873_v54 }
 0x65e   : > { %3579 = vmatprep.subr.bf16.mxu1 %v6878_v55 }
 0x661   : > { %3580 = vmatpush1.bf16.msra.mxu1 %v6876_v57 }
 0x662   : > { %3581 = vmatprep.subr.bf16.mxu1 %v6881_v58 }
 0x665   : > { %3582 = vmatpush1.bf16.msra.mxu1 %v6879_v59 }
 0x666   : > { %3583 = vmatprep.subr.bf16.mxu1 %v6884_v61 }
 0x669   : > { %3584 = vmatpush1.bf16.msra.mxu1 %v6882_v60 }
 0x66a   : > { %3585 = vmatprep.subr.bf16.mxu1 %v6887_v62 }
 0x66d   : > { %3586 = vmatpush1.bf16.msra.mxu1 %v6885_v63  ;;  %v6891_v63 = vld [vmem:[#allocation15] ss:$8 sps:$4 sm:$0xff]  }
 0x66e   : > { %3587 = vmatprep.subr.bf16.mxu1 %v6890_v3  ;;  %v6893_v3 = vld [vmem:[#allocation15 + $0x4] ss:$8 sps:$4 sm:$0xff]  }
 0x66f   : > { %3886 = vmatprep.subr.bf16.mxu0 %v6893_v3  ;;  %v4065_v3 = vld [vmem:[#allocation3] sm:$0xff] }
 0x670   : > { %3887 = vmatpush1.bf16.msra.mxu0 %v6891_v63 }
 0x671   : > { %3588 = vmatpush1.bf16.msra.mxu1 %v6888_v52  ;;  %v6896_v52 = vld [vmem:[#allocation15 + $0x14] ss:$8 sps:$4 sm:$0xff]  }
 0x672   : > { %6397 = vmatprep.subr.bf16.mxu1 %v7619_v32  ;;  %3888 = vmatprep.subr.bf16.mxu0 %v6896_v52  ;;  %v3679_v52 = vld [vmem:[%s8788_s12] sm:$0x3] }
 0x6ff   : > { %v3219_v4 = vpop.f32.mrb[8].mxu1 }
 0x700   : > { %v6389_v5 = vpop.f32.mrb[9].mxu1  ;;  %v3268_v15 = vcombine.high %v3219_v4, %v7619_v32  ;;  %v3275_v7 = vrot.slane %v3219_v4, %v8356_v48  ;;  %v6894_v4 = vld [vmem:[#allocation15 + $0x10] ss:$8 sps:$4 sm:$0xff]  }
 0x701   : > { %v3222_v33 = vpop.f32.mrb[10].mxu1  ;;  %v6899_v5 = vld [vmem:[#allocation15 + $0x24] ss:$8 sps:$4 sm:$0xff]   ;;  %3889 = vmatpush1.bf16.msra.mxu0 %v6894_v4  ;;  %v3719_v4 = vrot.slane %v3679_v52, %v8345_v31 }
 0x702   : > { %v6390_v6 = vpop.f32.mrb[11].mxu1  ;;  %v3282_v12 = vrot.slane %v3268_v15, %v8356_v48  ;;  %v6897_v33 = vld [vmem:[#allocation15 + $0x20] ss:$8 sps:$4 sm:$0xff]   ;;  %3890 = vmatprep.subr.bf16.mxu0 %v6899_v5  ;;  %v6905_v15 = vld [vmem:[#allocation15 + $0x44] ss:$8 sps:$4 sm:$0xff]   ;;  %v3723_v5 = vrot.slane %v3679_v52, %v8351_v38 }
 0x703   : > { %v6900_v6 = vld [vmem:[#allocation15 + $0x30] ss:$8 sps:$4 sm:$0xff]  }
 0x705   : > { %3891 = vmatpush1.bf16.msra.mxu0 %v6897_v33 }
 0x706   : > { %3892 = vmatprep.subr.bf16.mxu0 %v6902_v0 }
 0x707   : > { %v3262_v1 = vpop.f32.mrb[12].mxu1 }
 0x708   : > { %v3283_v8 = vcombine.high %v3262_v1, %v7619_v32  ;;  %v3290_v50 = vrot.slane %v3262_v1, %v8356_v48  ;;  %v6395_v9 = vpop.f32.mrb[13].mxu1  ;;  %v6903_v1 = vld [vmem:[#allocation15 + $0x40] ss:$8 sps:$4 sm:$0xff]  }
 0x709   : > { %v3265_v10 = vpop.f32.mrb[14].mxu1  ;;  %3893 = vmatpush1.bf16.msra.mxu0 %v6900_v6  ;;  %v6909_v9 = vld [vmem:[#allocation15 + $0x60] ss:$8 sps:$4 sm:$0xff]  }
 0x70a   : > { %v3297_v18 = vrot.slane %v3283_v8, %v8356_v48  ;;  %v3298_v13 = vcombine.low %v3275_v7, %v3290_v50  ;;  %v3299_v14 = vcombine.high %v3275_v7, %v3290_v50  ;;  %v6396_v16 = vpop.f32.mrb[15].mxu1  ;;  %3894 = vmatprep.subr.bf16.mxu0 %v6905_v15  ;;  %v6908_v7 = vld [vmem:[#allocation15 + $0x54] ss:$8 sps:$4 sm:$0xff]   ;;  %v6906_v8 = vld [vmem:[#allocation15 + $0x50] ss:$8 sps:$4 sm:$0xff]  }
 0x70b   : > { %v6911_v50 = vld [vmem:[#allocation15 + $0x64] ss:$8 sps:$4 sm:$0xff]   ;;  %v6914_v10 = vld [vmem:[#allocation15 + $0x74] ss:$8 sps:$4 sm:$0xff]   ;;  %v6918_v16 = vld [vmem:[#allocation15 + $0x90] ss:$8 sps:$4 sm:$0xff]  }
 0x70c   : > { %v3306_v17 = vrot.slane %v3298_v13, %v8359_v56  ;;  %v3313_v19 = vrot.slane %v3299_v14, %v8359_v56  ;;  %v3314_v21 = vcombine.low %v3282_v12, %v3297_v18  ;;  %v3315_v11 = vcombine.high %v3282_v12, %v3297_v18  ;;  %v6912_v12 = vld [vmem:[#allocation15 + $0x70] ss:$8 sps:$4 sm:$0xff]   ;;  %v6917_v18 = vld [vmem:[#allocation15 + $0x84] ss:$8 sps:$4 sm:$0xff]   ;;  %v6915_v13 = vld [vmem:[#allocation15 + $0x80] ss:$8 sps:$4 sm:$0xff]  }
 0x70d   : > { %3895 = vmatpush1.bf16.msra.mxu0 %v6903_v1  ;;  %v6920_v14 = vld [vmem:[#allocation15 + $0x94] ss:$8 sps:$4 sm:$0xff]  }
 0x70e   : > { %v3322_v20 = vrot.slane %v3314_v21, %v8359_v56  ;;  %v3329_v22 = vrot.slane %v3315_v11, %v8359_v56  ;;  %v3334_v23 = vcombine.low %v3306_v17, %v3313_v19  ;;  %v6113_v24 = vcombine.high %v3306_v17, %v3313_v19  ;;  %3896 = vmatprep.subr.bf16.mxu0 %v6908_v7 }
 0x710   : > { %v3341_v25 = vrot.slane %v3334_v23, %v8356_v48  ;;  %v3349_v26 = vrot.slane %v6113_v24, %v8356_v48  ;;  %v3350_v27 = vcombine.low %v3322_v20, %v3329_v22  ;;  %v6114_v28 = vcombine.high %v3322_v20, %v3329_v22  ;;  %v6923_v24 = vld [vmem:[#allocation15 + $0xa4] ss:$8 sps:$4 sm:$0xff]  }
 0x711   : > { %3897 = vmatpush1.bf16.msra.mxu0 %v6906_v8 }
 0x712   : > { %v3357_v49 = vrot.slane %v3350_v27, %v8356_v48  ;;  %v3365_v29 = vrot.slane %v6114_v28, %v8356_v48  ;;  %v3366_v30 = vcombine.low %v3341_v25, %v3349_v26  ;;  %3898 = vmatprep.subr.bf16.mxu0 %v6911_v50  ;;  %v6921_v25 = vld [vmem:[#allocation15 + $0xa0] ss:$8 sps:$4 sm:$0xff]   ;;  %v6926_v26 = vld [vmem:[#allocation15 + $0xb4] ss:$8 sps:$4 sm:$0xff]   ;;  %v6924_v27 = vld [vmem:[#allocation15 + $0xb0] ss:$8 sps:$4 sm:$0xff]  }
 0x713   : > { %v6929_v28 = vld [vmem:[#allocation15 + $0xc4] ss:$8 sps:$4 sm:$0xff]  }
 0x714   : > { %v3374_v35 = vcombine.low %v3357_v49, %v3365_v29  ;;  %v3373_v36 = vrot.slane %v3366_v30, %v8359_v56  ;;  %v6927_v49 = vld [vmem:[#allocation15 + $0xc0] ss:$8 sps:$4 sm:$0xff]   ;;  %v6932_v29 = vld [vmem:[#allocation15 + $0xd4] ss:$8 sps:$4 sm:$0xff]   ;;  %v6930_v30 = vld [vmem:[#allocation15 + $0xd0] ss:$8 sps:$4 sm:$0xff]  }
 0x715   : > { %3899 = vmatpush1.bf16.msra.mxu0 %v6909_v9 }
 0x716   : > { %v3381_v37 = vrot.slane %v3374_v35, %v8359_v56  ;;  %3900 = vmatprep.subr.bf16.mxu0 %v6914_v10  ;;  %v6933_v35 = vld [vmem:[#allocation15 + $0xe0] ss:$8 sps:$4 sm:$0xff]  }
 0x718   : > { %v3383_v39 = vcombine.high %v3373_v36, %v3381_v37  ;;  %v3382_v40 = vcombine.low %v3373_v36, %v3381_v37  ;;  %v6935_v36 = vld [vmem:[#allocation15 + $0xe4] ss:$8 sps:$4 sm:$0xff]   ;;  %v6938_v37 = vld [vmem:[#allocation15 + $0xf4] ss:$8 sps:$4 sm:$0xff]  }
 0x719   : > { %3901 = vmatpush1.bf16.msra.mxu0 %v6912_v12 }
 0x71a   : > { %v3385_v41 = vpack.c.bf16 %v3383_v39, %v3383_v39  ;;  %v3384_v42 = vpack.c.bf16 %v3382_v40, %v3382_v40  ;;  %3902 = vmatprep.subr.bf16.mxu0 %v6917_v18  ;;  %v6936_v39 = vld [vmem:[#allocation15 + $0xf0] ss:$8 sps:$4 sm:$0xff]  }
 0x71c   : > { %3589 = vmatprep.mubr.bf16.mxu1 %v3385_v41 }
 0x71d   : > { %3590 = vmatmul.mubr.bf16.vlgmr.msra.gmra.mrb[16].mxu1 %v3384_v42  ;;  %3903 = vmatpush1.bf16.msra.mxu0 %v6915_v13 }
 0x71e   : > { %6399 = vmatprep.mubr.msk.bf16.mxu1 %vm7620_vm0, %v7619_v32  ;;  %3904 = vmatprep.subr.bf16.mxu0 %v6920_v14 }
 0x71f   : > { %6398 = vmatpush3.bf16.xpose.msra.mxu1 %v4065_v3 }
 0x720   : > { %6403 = vmatprep.subr.bf16.mxu1 %v7619_v32 }
 0x721   : > { %3905 = vmatpush1.bf16.msra.mxu0 %v6918_v16 }
 0x722   : > { %3906 = vmatprep.subr.bf16.mxu0 %v6923_v24 }
 0x725   : > { %3907 = vmatpush1.bf16.msra.mxu0 %v6921_v25 }
 0x726   : > { %3908 = vmatprep.subr.bf16.mxu0 %v6926_v26 }
 0x729   : > { %3909 = vmatpush1.bf16.msra.mxu0 %v6924_v27 }
 0x72a   : > { %3910 = vmatprep.subr.bf16.mxu0 %v6929_v28 }
 0x72d   : > { %3911 = vmatpush1.bf16.msra.mxu0 %v6927_v49 }
 0x72e   : > { %3912 = vmatprep.subr.bf16.mxu0 %v6932_v29 }
 0x731   : > { %3913 = vmatpush1.bf16.msra.mxu0 %v6930_v30 }
 0x732   : > { %3914 = vmatprep.subr.bf16.mxu0 %v6935_v36 }
 0x735   : > { %3915 = vmatpush1.bf16.msra.mxu0 %v6933_v35 }
 0x736   : > { %3916 = vmatprep.subr.bf16.mxu0 %v6938_v37 }
 0x739   : > { %3917 = vmatpush1.bf16.msra.mxu0 %v6936_v39 }
 0x7f0   : > { %v3591_v51 = vpop.f32.mrb[16].mxu1 }
 0x7f1   : > { %v3592_v54 = vadd.f32 %v3591_v51, %v3390_v44  ;;  %v3593_v55 = vpop.f32.mrb[17].mxu1  ;;  %v3601_v44 = vld [vmem:[%s8787_s8] sm:$0x3] }
 0x7f2   : > { %v3594_v57 = vadd.f32 %v3593_v55, %v3394_v45  ;;  %v3595_v58 = vpop.f32.mrb[18].mxu1  ;;  %v3623_v45 = vrot.slane %v3600_v43, %v8345_v31  ;;  %v3636_v55 = vrot.slane %v3601_v44, %v8345_v31 }
 0x7f3   : > { %v3598_v59 = vadd.f32 %v3592_v54, %v2645_v46  ;;  %v3596_v60 = vpop.f32.mrb[19].mxu1  ;;  %v3627_v46 = vrot.slane %v3600_v43, %v8351_v38 }
 0x7f4   : > { %v3599_v61 = vadd.f32 %v3594_v57, %v2646_v53  ;;  %v3640_v57 = vrot.slane %v3601_v44, %v8351_v38 }
 0x7f6   : > { %v3602_v62 = vadd.f32 %v3599_v61, %v3598_v59 }
 0x7f8   : > { %3603 = vadd.xlane.f32.xlu0 %v3602_v62 }
 0x885   : > { %v3604_v17 = vpop.xlane.xlu0 %3603 }
 0x886   : > { %v3606_v19 = vmul.f32 0.00390625, %v3604_v17 }
 0x888   : > { %v3607_v21 = vsub.f32 %v3598_v59, %v3606_v19  ;;  %v3608_v11 = vsub.f32 %v3599_v61, %v3606_v19 }
 0x88a   : > { %v3609_v20 = vmul.f32 %v3607_v21, %v3607_v21  ;;  %v3610_v22 = vmul.f32 %v3608_v11, %v3608_v11 }
 0x88c   : > { %v3611_v23 = vadd.f32 %v3610_v22, %v3609_v20 }
 0x88e   : > { %3612 = vadd.xlane.f32.xlu1 %v3611_v23 }
 0x91b   : > { %v3613_v40 = vpop.xlane.xlu1 %3612 }
 0x91c   : > { %v3614_v41 = vmul.f32 0.00390625, %v3613_v40 }
 0x91e   : > { %v3615_v42 = vadd.f32 1e-05, %v3614_v41 }
 0x920   : > { %7187 = vrsqrt.f32 %v3615_v42 }
 0x92a   : > { %v7188_v51 = vpop.eup %7187 }
 0x92b   : > { %v3617_v53 = vmul.f32 %v7188_v51, %v3607_v21  ;;  %v3618_v54 = vmul.f32 %v7188_v51, %v3608_v11 }
 0x92d   : > { %v3631_v58 = vmul.f32 %v3627_v46, %v3618_v54  ;;  %v3630_v59 = vmul.f32 %v3623_v45, %v3617_v53 }
 0x92f   : > { %v8433_v60 = vadd.f32 %v3640_v57, %v3631_v58  ;;  %v8435_v61 = vadd.f32 %v3636_v55, %v3630_v59 }
 0x931   : > { %v3646_v62 = vpack.c.bf16 %v8433_v60, %v8433_v60  ;;  %v3645_v63 = vpack.c.bf16 %v8435_v61, %v8435_v61 }
 0x933   : > { %3918 = vmatprep.mubr.bf16.mxu0 %v3646_v62  ;;  %v4066_v62 = vld [vmem:[#allocation3 + $0x8] sm:$0xff] }
 0x934   : > { %3919 = vmatmul.mubr.bf16.vlgmr.msra.gmra.mrb[4].mxu0 %v3645_v63 }
 0xa07   : > { %v3920_v33 = vpop.f32.mrb[4].mxu0 }
 0xa08   : > { %v3921_v0 = vadd.f32 %v3920_v33, %v3719_v4  ;;  %v3922_v6 = vpop.f32.mrb[5].mxu0 }
 0xa09   : > { %v3923_v15 = vadd.f32 %v3922_v6, %v3723_v5  ;;  %v3924_v1 = vpop.f32.mrb[6].mxu0 }
 0xa0a   : > { %v3927_v7 = vpack.c.bf16 %v3921_v0, %v3921_v0  ;;  %v3925_v8 = vpop.f32.mrb[7].mxu0 }
 0xa0b   : > { %v3952_v50 = vpack.c.bf16 %v3923_v15, %v3923_v15 }
 0xa0c   : > { %v3934_v9 = vrot.slane %v3927_v7, %v8356_v48 }
 0xa0d   : > { %v3959_v10 = vrot.slane %v3952_v50, %v8356_v48 }
 0xa0e   : > { %v3935_v12 = vcombine.high %v3934_v9, %v7623_v47  ;;  %v3942_v18 = vrot.slane %v3934_v9, %v8359_v56 }
 0xa0f   : > { %v3960_v13 = vcombine.high %v3959_v10, %v7623_v47  ;;  %v3967_v14 = vrot.slane %v3959_v10, %v8359_v56 }
 0xa10   : > { %v3949_v16 = vrot.slane %v3935_v12, %v8359_v56  ;;  %v3950_v17 = vcombine.high %v3942_v18, %v7623_v47  ;;  %v3981_v19 = vshrl.u32 %v3942_v18, 16 }
 0xa11   : > { %v3974_v21 = vrot.slane %v3960_v13, %v8359_v56  ;;  %v3975_v11 = vcombine.high %v3967_v14, %v7623_v47  ;;  %v3979_v20 = vpack.i.b16 %v3967_v14, %v3942_v18  ;;  %v3982_v22 = vshrl.u32 %v3967_v14, 16 }
 0xa12   : > { %v3951_v23 = vcombine.high %v3949_v16, %v7623_v47  ;;  %v3989_v24 = vshrl.u32 %v3950_v17, 16  ;;  %v3997_v25 = vshrl.u32 %v3949_v16, 16 }
 0xa13   : > { %v3976_v26 = vcombine.high %v3974_v21, %v7623_v47  ;;  %v3983_v27 = vpack.i.b16 %v3982_v22, %v3981_v19  ;;  %v3987_v28 = vpack.i.b16 %v3975_v11, %v3950_v17  ;;  %v3990_v49 = vshrl.u32 %v3975_v11, 16  ;;  %v6939_v22 = vld [vmem:[#allocation15 + $0x300] ss:$8 sps:$4 sm:$0xff]  }
 0xa14   : > { %v4005_v29 = vshrl.u32 %v3951_v23, 16  ;;  %v3995_v30 = vpack.i.b16 %v3974_v21, %v3949_v16  ;;  %v3998_v35 = vshrl.u32 %v3974_v21, 16 }
 0xa15   : > { %v3991_v36 = vpack.i.b16 %v3990_v49, %v3989_v24  ;;  %v4003_v37 = vpack.i.b16 %v3976_v26, %v3951_v23  ;;  %v4006_v39 = vshrl.u32 %v3976_v26, 16  ;;  %v6941_v23 = vld [vmem:[#allocation15 + $0x304] ss:$8 sps:$4 sm:$0xff]   ;;  %v6944_v24 = vld [vmem:[#allocation15 + $0x314] ss:$8 sps:$4 sm:$0xff]  }
 0xa16   : > { %v3999_v40 = vpack.i.b16 %v3998_v35, %v3997_v25  ;;  %v4009_v41 = vcombine.low %v3979_v20, %v3995_v30  ;;  %v4068_v20 = vld [vmem:[#allocation3 + $0x10] sm:$0xff]  ;;  %4555 = vmatprep.subr.bf16.mxu0 %v6941_v23  ;;  %v6942_v25 = vld [vmem:[#allocation15 + $0x310] ss:$8 sps:$4 sm:$0xff]   ;;  %v6947_v26 = vld [vmem:[#allocation15 + $0x324] ss:$8 sps:$4 sm:$0xff]  }
 0xa17   : > { %v4007_v42 = vpack.i.b16 %v4006_v39, %v4005_v29  ;;  %v4017_v43 = vcombine.low %v3987_v28, %v4003_v37  ;;  %4556 = vmatpush1.bf16.msra.mxu0 %v6939_v22  ;;  %v6950_v28 = vld [vmem:[#allocation15 + $0x334] ss:$8 sps:$4 sm:$0xff]   ;;  %v6948_v49 = vld [vmem:[#allocation15 + $0x330] ss:$8 sps:$4 sm:$0xff]   ;;  %v6953_v29 = vld [vmem:[#allocation15 + $0x344] ss:$8 sps:$4 sm:$0xff]  }
 0xa18   : > { %v4033_v44 = vcombine.low %v3983_v27, %v3999_v40  ;;  %v4016_v45 = vrot.slane %v4009_v41, %v8356_v48  ;;  %4557 = vmatprep.subr.bf16.mxu0 %v6944_v24  ;;  %v6945_v27 = vld [vmem:[#allocation15 + $0x320] ss:$8 sps:$4 sm:$0xff]   ;;  %v6956_v35 = vld [vmem:[#allocation15 + $0x354] ss:$8 sps:$4 sm:$0xff]   ;;  %v6959_v37 = vld [vmem:[#allocation15 + $0x364] ss:$8 sps:$4 sm:$0xff]  }
 0xa19   : > { %v4024_v46 = vrot.slane %v4017_v43, %v8356_v48  ;;  %v4041_v51 = vcombine.low %v3991_v36, %v4007_v42  ;;  %v6951_v30 = vld [vmem:[#allocation15 + $0x340] ss:$8 sps:$4 sm:$0xff]   ;;  %v6954_v36 = vld [vmem:[#allocation15 + $0x350] ss:$8 sps:$4 sm:$0xff]   ;;  %v6962_v40 = vld [vmem:[#allocation15 + $0x374] ss:$8 sps:$4 sm:$0xff]  }
 0xa1a   : > { %v4040_v53 = vrot.slane %v4033_v44, %v8356_v48  ;;  %v6957_v39 = vld [vmem:[#allocation15 + $0x360] ss:$8 sps:$4 sm:$0xff]   ;;  %v6960_v41 = vld [vmem:[#allocation15 + $0x370] ss:$8 sps:$4 sm:$0xff]   ;;  %v6965_v42 = vld [vmem:[#allocation15 + $0x384] ss:$8 sps:$4 sm:$0xff]  }
 0xa1b   : > { %v4025_v47 = vcombine.low %v4016_v45, %v4024_v46  ;;  %v4048_v54 = vrot.slane %v4041_v51, %v8356_v48  ;;  %4558 = vmatpush1.bf16.msra.mxu0 %v6942_v25  ;;  %v6963_v43 = vld [vmem:[#allocation15 + $0x380] ss:$8 sps:$4 sm:$0xff]  }
 0xa1c   : > { %4559 = vmatprep.subr.bf16.mxu0 %v6947_v26 }
 0xa1d   : > { %v4032_v55 = vrot.slane %v4025_v47, %v8359_v56  ;;  %v4049_v57 = vcombine.low %v4040_v53, %v4048_v54  ;;  %v4069_v53 = vld [vmem:[#allocation3 + $0x18] sm:$0xff] }
 0xa1f   : > { %v4056_v58 = vrot.slane %v4049_v57, %v8359_v56  ;;  %v4061_v63 = vshrl.u32 %v4032_v55, 16  ;;  %4560 = vmatpush1.bf16.msra.mxu0 %v6945_v27 }
 0xa20   : > { %4561 = vmatprep.subr.bf16.mxu0 %v6950_v28 }
 0xa21   : > { %v4059_v59 = vpack.i.b16 %v4056_v58, %v4032_v55  ;;  %v4062_v3 = vshrl.u32 %v4056_v58, 16  ;;  %v6968_v58 = vld [vmem:[#allocation15 + $0x394] ss:$8 sps:$4 sm:$0xff]  }
 0xa23   : > { %6400 = vmatmul.mubr.bf16.vlgmr.msra.gmra.mrb[20].mxu1 %v4059_v59  ;;  %v4063_v52 = vpack.i.b16 %v4062_v3, %v4061_v63  ;;  %4562 = vmatpush1.bf16.msra.mxu0 %v6948_v49  ;;  %v6966_v59 = vld [vmem:[#allocation15 + $0x390] ss:$8 sps:$4 sm:$0xff]   ;;  %v6969_v63 = vld [vmem:[#allocation15 + $0x3a0] ss:$8 sps:$4 sm:$0xff]   ;;  %v6974_v3 = vld [vmem:[#allocation15 + $0x3b4] ss:$8 sps:$4 sm:$0xff]  }
 0xa24   : > { %6404 = vmatpush3.bf16.xpose.msra.mxu1 %v4066_v62  ;;  %6405 = vmatprep.mubr.msk.bf16.mxu1 %vm7620_vm0, %v7619_v32  ;;  %v6971_v62 = vld [vmem:[#allocation15 + $0x3a4] ss:$8 sps:$4 sm:$0xff]  }
 0xa25   : > { %6409 = vmatprep.subr.bf16.mxu1 %v7619_v32  ;;  %4563 = vmatprep.subr.bf16.mxu0 %v6953_v29 }
 0xa27   : > { %4564 = vmatpush1.bf16.msra.mxu0 %v6951_v30 }
 0xa28   : > { %4565 = vmatprep.subr.bf16.mxu0 %v6956_v35 }
 0xa2b   : > { %6406 = vmatmul.mubr.bf16.vlgmr.msra.gmra.mrb[24].mxu1 %v4063_v52  ;;  %4566 = vmatpush1.bf16.msra.mxu0 %v6954_v36  ;;  %v6972_v52 = vld [vmem:[#allocation15 + $0x3b0] ss:$8 sps:$4 sm:$0xff]  }
 0xa2c   : > { %6411 = vmatprep.mubr.msk.bf16.mxu1 %vm7620_vm0, %v7619_v32  ;;  %6410 = vmatpush3.bf16.msra.mxu1 %v4068_v20 }
 0xa2d   : > { %6415 = vmatprep.subr.bf16.mxu1 %v7619_v32  ;;  %4567 = vmatprep.subr.bf16.mxu0 %v6959_v37 }
 0xa2f   : > { %4568 = vmatpush1.bf16.msra.mxu0 %v6957_v39 }
 0xa30   : > { %4569 = vmatprep.subr.bf16.mxu0 %v6962_v40 }
 0xa33   : > { %4570 = vmatpush1.bf16.msra.mxu0 %v6960_v41 }
 0xa34   : > { %4571 = vmatprep.subr.bf16.mxu0 %v6965_v42 }
 0xa37   : > { %4572 = vmatpush1.bf16.msra.mxu0 %v6963_v43 }
 0xa38   : > { %4573 = vmatprep.subr.bf16.mxu0 %v6968_v58 }
 0xa3b   : > { %4574 = vmatpush1.bf16.msra.mxu0 %v6966_v59 }
 0xa3c   : > { %4575 = vmatprep.subr.bf16.mxu0 %v6971_v62 }
 0xa3f   : > { %4576 = vmatpush1.bf16.msra.mxu0 %v6969_v63 }
 0xa40   : > { %4577 = vmatprep.subr.bf16.mxu0 %v6974_v3 }
 0xa43   : > { %4578 = vmatpush1.bf16.msra.mxu0 %v6972_v52  ;;  %v6987_v52 = vld [vmem:[#allocation16] ss:$16 sps:$4 sm:$0xff]  }
 0xaf6   : > { %v4110_v4 = vpop.f32.mrb[20].mxu1 }
 0xaf7   : > { %v4111_v5 = vadd.f32 %v8172_v2, %v4110_v4  ;;  %v6401_v33 = vpop.f32.mrb[21].mxu1  ;;  %v6977_v4 = vld [vmem:[#allocation15 + $0x3c4] ss:$8 sps:$4 sm:$0xff]  }
 0xaf8   : > { %v4113_v0 = vpop.f32.mrb[22].mxu1  ;;  %4579 = vmatprep.subr.bf16.mxu0 %v6977_v4  ;;  %v6978_v33 = vld [vmem:[#allocation15 + $0x3d0] ss:$8 sps:$4 sm:$0xff]   ;;  %v6989_v4 = vld [vmem:[#allocation16 + $0x4] ss:$16 sps:$4 sm:$0xff]  }
 0xaf9   : > { %v6402_v6 = vpop.f32.mrb[23].mxu1  ;;  %v4156_v15 = vsel %vm3157_vm2, %v4111_v5, -inf  ;;  %v6980_v0 = vld [vmem:[#allocation15 + $0x3d4] ss:$8 sps:$4 sm:$0xff]  }
 0xafa   : > { %4157 = vmax.xlane.f32.xlu0 %v4156_v15  ;;  %v6983_v6 = vld [vmem:[#allocation15 + $0x3e4] ss:$8 sps:$4 sm:$0xff]   ;;  %v6981_v15 = vld [vmem:[#allocation15 + $0x3e0] ss:$8 sps:$4 sm:$0xff]  }
 0xafe   : > { %v4150_v1 = vpop.f32.mrb[24].mxu1 }
 0xaff   : > { %v4151_v7 = vadd.f32 %v8172_v2, %v4150_v1  ;;  %v6407_v8 = vpop.f32.mrb[25].mxu1  ;;  %v6986_v1 = vld [vmem:[#allocation15 + $0x3f4] ss:$8 sps:$4 sm:$0xff]  }
 0xb00   : > { %v4153_v50 = vpop.f32.mrb[26].mxu1 }
 0xb01   : > { %v6408_v9 = vpop.f32.mrb[27].mxu1  ;;  %v4159_v10 = vsel %vm3157_vm2, %v4151_v7, -inf }
 0xb02   : > { %4160 = vmax.xlane.f32.xlu1 %v4159_v10 }
 0xb87   : > { %v4158_v12 = vpop.xlane.xlu0 %4157 }
 0xb88   : > { %v4162_v18 = vsub.f32 %v4111_v5, %v4158_v12  ;;  %v6975_v5 = vld [vmem:[#allocation15 + $0x3c0] ss:$8 sps:$4 sm:$0xff]  }
 0xb89   : > { %4580 = vmatpush1.bf16.msra.mxu0 %v6975_v5  ;;  %v6990_v5 = vld [vmem:[#allocation16 + $0x8] ss:$16 sps:$4 sm:$0xff]  }
 0xb8a   : > { %v4164_v13 = vmul.f32 1.442695, %v4162_v18  ;;  %4581 = vmatprep.subr.bf16.mxu0 %v6980_v0  ;;  %v6995_v0 = vld [vmem:[#allocation16 + $0x24] ss:$16 sps:$4 sm:$0xff]  }
 0xb8c   : > { %7189 = vpow2.f32 %v4164_v13 }
 0xb8d   : > { %4582 = vmatpush1.bf16.msra.mxu0 %v6978_v33  ;;  %v6992_v33 = vld [vmem:[#allocation16 + $0xc] ss:$16 sps:$4 sm:$0xff]  }
 0xb8e   : > { %4583 = vmatprep.subr.bf16.mxu0 %v6983_v6  ;;  %v6998_v6 = vld [vmem:[#allocation16 + $0x2c] ss:$16 sps:$4 sm:$0xff]  }
 0xb8f   : > { %v4161_v14 = vpop.xlane.xlu1 %4160 }
 0xb90   : > { %v4163_v16 = vsub.f32 %v4151_v7, %v4161_v14  ;;  %v6984_v7 = vld [vmem:[#allocation15 + $0x3f0] ss:$8 sps:$4 sm:$0xff]  }
 0xb91   : > { %4584 = vmatpush1.bf16.msra.mxu0 %v6981_v15  ;;  %v6993_v15 = vld [vmem:[#allocation16 + $0x20] ss:$16 sps:$4 sm:$0xff]  }
 0xb92   : > { %v4166_v17 = vmul.f32 1.442695, %v4163_v16  ;;  %4585 = vmatprep.subr.bf16.mxu0 %v6986_v1  ;;  %v7001_v1 = vld [vmem:[#allocation16 + $0x44] ss:$16 sps:$4 sm:$0xff]  }
 0xb94   : > { %7191 = vpow2.f32 %v4166_v17 }
 0xb95   : > { %4586 = vmatpush1.bf16.msra.mxu0 %v6984_v7  ;;  %v6999_v7 = vld [vmem:[#allocation16 + $0x40] ss:$16 sps:$4 sm:$0xff]  }
 0xb96   : > { %v7190_v19 = vpop.eup %7189  ;;  %5093 = vmatprep.subr.bf16.mxu0 %v6992_v33  ;;  %v7073_v33 = vld [vmem:[#allocation16 + $0x1c4] ss:$16 sps:$4 sm:$0xff]  }
 0xb97   : > { %v4168_v21 = vsel %vm3157_vm2, %v7190_v19, 0.0 }
 0xb98   : > { %4169 = vadd.xlane.f32.xlu0 %v4168_v21 }
 0xb9e   : > { %v7192_v11 = vpop.eup %7191 }
 0xb9f   : > { %v4171_v2 = vsel %vm3157_vm2, %v7192_v11, 0.0 }
 0xba0   : > { %4172 = vadd.xlane.f32.xlu1 %v4171_v2 }
 0xc25   : > { %v4170_v44 = vpop.xlane.xlu0 %4169 }
 0xc26   : > { %7193 = vrcp.f32 %v4170_v44 }
 0xc2d   : > { %v4173_v45 = vpop.xlane.xlu1 %4172 }
 0xc2e   : > { %7195 = vrcp.f32 %v4173_v45 }
 0xc30   : > { %v7194_v46 = vpop.eup %7193 }
 0xc31   : > { %v4176_v51 = vmul.f32 %v7194_v46, %v7190_v19 }
 0xc33   : > { %v4178_v47 = vpack.c.bf16 %v4176_v51, %v4176_v51 }
 0xc35   : > { %6412 = vmatmul.mubr.msk.bf16.vlgmr.msra.gmra.mrb[28].mxu1 %vm3157_vm2, %v4178_v47  ;;  %v6147_v47 = vld [vmem:[%s8788_s12 + $0x6] sm:$0x3] }
 0xc36   : > { %6416 = vmatpush3.bf16.msra.mxu1 %v4069_v53  ;;  %6417 = vmatprep.mubr.msk.bf16.mxu1 %vm7620_vm0, %v7619_v32  ;;  %v4388_v53 = vrot.slane %v6147_v47, %v8345_v31 }
 0xc37   : > { %5052 = vmatprep.subr.bf16.mxu1 %v6989_v4  ;;  %v7068_v4 = vld [vmem:[#allocation16 + $0x1a8] ss:$16 sps:$4 sm:$0xff]  }
 0xc38   : > { %v7196_v54 = vpop.eup %7195 }
 0xc39   : > { %v4177_v55 = vmul.f32 %v7196_v54, %v7192_v11 }
 0xc3b   : > { %v4179_v57 = vpack.c.bf16 %v4177_v55, %v4177_v55 }
 0xc3d   : > { %6418 = vmatmul.mubr.msk.bf16.vlgmr.msra.gmra.mrb[32].mxu1 %vm3157_vm2, %v4179_v57 }
 0xc3e   : > { %5053 = vmatpush1.bf16.msra.mxu1 %v6987_v52  ;;  %v7065_v52 = vld [vmem:[#allocation16 + $0x1a0] ss:$16 sps:$4 sm:$0xff]  }
 0xc3f   : > { %5054 = vmatprep.subr.bf16.mxu1 %v6995_v0  ;;  %v7074_v0 = vld [vmem:[#allocation16 + $0x1c8] ss:$16 sps:$4 sm:$0xff]  }
 0xc42   : > { %5055 = vmatpush1.bf16.msra.mxu1 %v6993_v15  ;;  %v7079_v15 = vld [vmem:[#allocation16 + $0x1e4] ss:$16 sps:$4 sm:$0xff]  }
 0xc43   : > { %5056 = vmatprep.subr.bf16.mxu1 %v7001_v1  ;;  %v7077_v1 = vld [vmem:[#allocation16 + $0x1e0] ss:$16 sps:$4 sm:$0xff]  }
 0xc46   : > { %5057 = vmatpush1.bf16.msra.mxu1 %v6999_v7  ;;  %v7085_v7 = vld [vmem:[#allocation18 + $0x4] ss:$8 sps:$4 sm:$0xff]  }
 0xd08   : > { %v4217_v8 = vpop.f32.mrb[28].mxu1 }
 0xd09   : > { %v6413_v50 = vpop.f32.mrb[29].mxu1  ;;  %v4266_v12 = vcombine.high %v4217_v8, %v7619_v32  ;;  %v4273_v13 = vrot.slane %v4217_v8, %v8356_v48  ;;  %v7002_v8 = vld [vmem:[#allocation16 + $0x48] ss:$16 sps:$4 sm:$0xff]  }
 0xd0a   : > { %v4220_v9 = vpop.f32.mrb[30].mxu1  ;;  %v7007_v50 = vld [vmem:[#allocation16 + $0x64] ss:$16 sps:$4 sm:$0xff]  }
 0xd0b   : > { %v6414_v10 = vpop.f32.mrb[31].mxu1  ;;  %v4280_v21 = vrot.slane %v4266_v12, %v8356_v48  ;;  %v7010_v9 = vld [vmem:[#allocation16 + $0x6c] ss:$16 sps:$4 sm:$0xff]   ;;  %5058 = vmatprep.subr.bf16.mxu1 %v7007_v50  ;;  %v7008_v12 = vld [vmem:[#allocation16 + $0x68] ss:$16 sps:$4 sm:$0xff]  }
 0xd0c   : > { %v7005_v10 = vld [vmem:[#allocation16 + $0x60] ss:$16 sps:$4 sm:$0xff]  }
 0xd0d   : > { %5059 = vmatpush1.bf16.msra.mxu1 %v7005_v10 }
 0xd10   : > { %v4260_v18 = vpop.f32.mrb[32].mxu1 }
 0xd11   : > { %v4281_v14 = vcombine.high %v4260_v18, %v7619_v32  ;;  %v4288_v16 = vrot.slane %v4260_v18, %v8356_v48  ;;  %v6419_v17 = vpop.f32.mrb[33].mxu1  ;;  %v7013_v18 = vld [vmem:[#allocation16 + $0x84] ss:$16 sps:$4 sm:$0xff]  }
 0xd12   : > { %v4263_v19 = vpop.f32.mrb[34].mxu1  ;;  %5060 = vmatprep.subr.bf16.mxu1 %v7013_v18  ;;  %v7019_v17 = vld [vmem:[#allocation16 + $0xa4] ss:$16 sps:$4 sm:$0xff]   ;;  %v6218_v18 = vld [vmem:[%s8787_s8 + $0x2] sm:$0x3] }
 0xd13   : > { %v4295_v11 = vrot.slane %v4281_v14, %v8356_v48  ;;  %v4296_v2 = vcombine.low %v4273_v13, %v4288_v16  ;;  %v4297_v20 = vcombine.high %v4273_v13, %v4288_v16  ;;  %v6420_v22 = vpop.f32.mrb[35].mxu1  ;;  %v7016_v13 = vld [vmem:[#allocation16 + $0x8c] ss:$16 sps:$4 sm:$0xff]   ;;  %v7011_v14 = vld [vmem:[#allocation16 + $0x80] ss:$16 sps:$4 sm:$0xff]  }
 0xd14   : > { %v7014_v16 = vld [vmem:[#allocation16 + $0x88] ss:$16 sps:$4 sm:$0xff]   ;;  %v7022_v19 = vld [vmem:[#allocation16 + $0xac] ss:$16 sps:$4 sm:$0xff]   ;;  %5061 = vmatpush1.bf16.msra.mxu1 %v7011_v14  ;;  %v7023_v22 = vld [vmem:[#allocation16 + $0xc0] ss:$16 sps:$4 sm:$0xff]  }
 0xd15   : > { %v4304_v23 = vrot.slane %v4296_v2, %v8359_v56  ;;  %v4311_v24 = vrot.slane %v4297_v20, %v8359_v56  ;;  %v4312_v25 = vcombine.low %v4280_v21, %v4295_v11  ;;  %v4313_v26 = vcombine.high %v4280_v21, %v4295_v11  ;;  %v7017_v21 = vld [vmem:[#allocation16 + $0xa0] ss:$16 sps:$4 sm:$0xff]   ;;  %5062 = vmatprep.subr.bf16.mxu1 %v7019_v17  ;;  %v7020_v11 = vld [vmem:[#allocation16 + $0xa8] ss:$16 sps:$4 sm:$0xff]   ;;  %v7025_v2 = vld [vmem:[#allocation16 + $0xc4] ss:$16 sps:$4 sm:$0xff]  }
 0xd16   : > { %v7028_v20 = vld [vmem:[#allocation16 + $0xcc] ss:$16 sps:$4 sm:$0xff]  }
 0xd17   : > { %v4320_v27 = vrot.slane %v4312_v25, %v8359_v56  ;;  %v4327_v32 = vrot.slane %v4313_v26, %v8359_v56  ;;  %v4332_v28 = vcombine.low %v4304_v23, %v4311_v24  ;;  %v6183_v49 = vcombine.high %v4304_v23, %v4311_v24  ;;  %v7026_v23 = vld [vmem:[#allocation16 + $0xc8] ss:$16 sps:$4 sm:$0xff]   ;;  %v7031_v24 = vld [vmem:[#allocation16 + $0xe4] ss:$16 sps:$4 sm:$0xff]   ;;  %v7034_v25 = vld [vmem:[#allocation16 + $0xec] ss:$16 sps:$4 sm:$0xff]  }
 0xd18   : > { %5063 = vmatpush1.bf16.msra.mxu1 %v7017_v21  ;;  %v7029_v26 = vld [vmem:[#allocation16 + $0xe0] ss:$16 sps:$4 sm:$0xff]   ;;  %v4635_v21 = vrot.slane %v6218_v18, %v8345_v31 }
 0xd19   : > { %v4339_v29 = vrot.slane %v4332_v28, %v8356_v48  ;;  %v4347_v30 = vrot.slane %v6183_v49, %v8356_v48  ;;  %v4348_v35 = vcombine.low %v4320_v27, %v4327_v32  ;;  %v6184_v36 = vcombine.high %v4320_v27, %v4327_v32  ;;  %5064 = vmatprep.subr.bf16.mxu1 %v7025_v2  ;;  %v7032_v27 = vld [vmem:[#allocation16 + $0xe8] ss:$16 sps:$4 sm:$0xff]   ;;  %v7037_v32 = vld [vmem:[#allocation16 + $0x104] ss:$16 sps:$4 sm:$0xff]   ;;  %v7040_v28 = vld [vmem:[#allocation16 + $0x10c] ss:$16 sps:$4 sm:$0xff]  }
 0xd1a   : > { %v7035_v49 = vld [vmem:[#allocation16 + $0x100] ss:$16 sps:$4 sm:$0xff]  }
 0xd1b   : > { %v4355_v37 = vrot.slane %v4348_v35, %v8356_v48  ;;  %v4363_v39 = vrot.slane %v6184_v36, %v8356_v48  ;;  %v4364_v40 = vcombine.low %v4339_v29, %v4347_v30  ;;  %v4392_v48 = vrot.slane %v6147_v47, %v8351_v38  ;;  %v7038_v29 = vld [vmem:[#allocation16 + $0x108] ss:$16 sps:$4 sm:$0xff]   ;;  %v7043_v30 = vld [vmem:[#allocation16 + $0x124] ss:$16 sps:$4 sm:$0xff]   ;;  %v7046_v35 = vld [vmem:[#allocation16 + $0x12c] ss:$16 sps:$4 sm:$0xff]  }
 0xd1c   : > { %5065 = vmatpush1.bf16.msra.mxu1 %v7023_v22  ;;  %v7041_v36 = vld [vmem:[#allocation16 + $0x120] ss:$16 sps:$4 sm:$0xff]  }
 0xd1d   : > { %v4372_v41 = vcombine.low %v4355_v37, %v4363_v39  ;;  %v4371_v42 = vrot.slane %v4364_v40, %v8359_v56  ;;  %5066 = vmatprep.subr.bf16.mxu1 %v7031_v24  ;;  %v7044_v37 = vld [vmem:[#allocation16 + $0x128] ss:$16 sps:$4 sm:$0xff]   ;;  %v7047_v47 = vld [vmem:[#allocation16 + $0x140] ss:$16 sps:$4 sm:$0xff]  }
 0xd1f   : > { %v4379_v43 = vrot.slane %v4372_v41, %v8359_v56 }
 0xd20   : > { %5067 = vmatpush1.bf16.msra.mxu1 %v7029_v26  ;;  %v7083_v26 = vld [vmem:[#allocation18] ss:$8 sps:$4 sm:$0xff]  }
 0xd21   : > { %v4381_v44 = vcombine.high %v4371_v42, %v4379_v43  ;;  %v4380_v45 = vcombine.low %v4371_v42, %v4379_v43  ;;  %5068 = vmatprep.subr.bf16.mxu1 %v7037_v32  ;;  %v7091_v32 = vld [vmem:[#allocation18 + $0x14] ss:$8 sps:$4 sm:$0xff]  }
 0xd23   : > { %v4383_v46 = vpack.c.bf16 %v4381_v44, %v4381_v44  ;;  %v4382_v51 = vpack.c.bf16 %v4380_v45, %v4380_v45 }
 0xd24   : > { %5069 = vmatpush1.bf16.msra.mxu1 %v7035_v49  ;;  %v7089_v49 = vld [vmem:[#allocation18 + $0x10] ss:$8 sps:$4 sm:$0xff]  }
 0xd25   : > { %4587 = vmatprep.mubr.bf16.mxu0 %v4383_v46  ;;  %5070 = vmatprep.subr.bf16.mxu1 %v7043_v30  ;;  %v7049_v46 = vld [vmem:[#allocation16 + $0x144] ss:$16 sps:$4 sm:$0xff]  }
 0xd26   : > { %4588 = vmatmul.mubr.bf16.vlgmr.msra.gmra.mrb[8].mxu0 %v4382_v51  ;;  %v7052_v51 = vld [vmem:[#allocation16 + $0x14c] ss:$16 sps:$4 sm:$0xff]  }
 0xd27   : > { %5094 = vmatpush1.bf16.msra.mxu0 %v6990_v5  ;;  %v7071_v5 = vld [vmem:[#allocation16 + $0x1c0] ss:$16 sps:$4 sm:$0xff]   ;;  %v7097_v30 = vld [vmem:[#allocation18 + $0x24] ss:$8 sps:$4 sm:$0xff]  }
 0xd28   : > { %5095 = vmatprep.subr.bf16.mxu0 %v6998_v6  ;;  %5071 = vmatpush1.bf16.msra.mxu1 %v7041_v36  ;;  %v7076_v6 = vld [vmem:[#allocation16 + $0x1cc] ss:$16 sps:$4 sm:$0xff]   ;;  %v7095_v36 = vld [vmem:[#allocation18 + $0x20] ss:$8 sps:$4 sm:$0xff]  }
 0xd29   : > { %5072 = vmatprep.subr.bf16.mxu1 %v7049_v46  ;;  %v7110_v46 = vld [vmem:[#allocation18 + $0x140] ss:$8 sps:$4 sm:$0xff]  }
 0xd2c   : > { %5073 = vmatpush1.bf16.msra.mxu1 %v7047_v47  ;;  %v7118_v47 = vld [vmem:[#allocation18 + $0x154] ss:$8 sps:$4 sm:$0xff]  }
 0xdf9   : > { %v4589_v54 = vpop.f32.mrb[8].mxu0 }
 0xdfa   : > { %v4590_v55 = vadd.f32 %v4589_v54, %v4388_v53  ;;  %v4591_v57 = vpop.f32.mrb[9].mxu0  ;;  %v7050_v53 = vld [vmem:[#allocation16 + $0x148] ss:$16 sps:$4 sm:$0xff]   ;;  %v7058_v54 = vld [vmem:[#allocation16 + $0x16c] ss:$16 sps:$4 sm:$0xff]  }
 0xdfb   : > { %v4592_v58 = vadd.f32 %v4591_v57, %v4392_v48  ;;  %v4593_v59 = vpop.f32.mrb[10].mxu0  ;;  %v7055_v48 = vld [vmem:[#allocation16 + $0x164] ss:$16 sps:$4 sm:$0xff]   ;;  %v7056_v57 = vld [vmem:[#allocation16 + $0x168] ss:$16 sps:$4 sm:$0xff]  }
 0xdfc   : > { %v8503_v56 = vadd.f32 %v4590_v55, %v8435_v61  ;;  %v4594_v62 = vpop.f32.mrb[11].mxu0  ;;  %v6996_v61 = vld [vmem:[#allocation16 + $0x28] ss:$16 sps:$4 sm:$0xff]   ;;  %v7053_v55 = vld [vmem:[#allocation16 + $0x160] ss:$16 sps:$4 sm:$0xff]   ;;  %5074 = vmatprep.subr.bf16.mxu1 %v7055_v48 }
 0xdfd   : > { %v8506_v63 = vadd.f32 %v4592_v58, %v8433_v60  ;;  %v7004_v60 = vld [vmem:[#allocation16 + $0x4c] ss:$16 sps:$4 sm:$0xff]   ;;  %5096 = vmatpush1.bf16.msra.mxu0 %v6996_v61  ;;  %5075 = vmatpush1.bf16.msra.mxu1 %v7053_v55  ;;  %v7061_v58 = vld [vmem:[#allocation16 + $0x184] ss:$16 sps:$4 sm:$0xff]   ;;  %v7062_v62 = vld [vmem:[#allocation16 + $0x188] ss:$16 sps:$4 sm:$0xff]  }
 0xdfe   : > { %5097 = vmatprep.subr.bf16.mxu0 %v7004_v60  ;;  %v7064_v59 = vld [vmem:[#allocation16 + $0x18c] ss:$16 sps:$4 sm:$0xff]   ;;  %5076 = vmatprep.subr.bf16.mxu1 %v7061_v58  ;;  %v7080_v60 = vld [vmem:[#allocation16 + $0x1e8] ss:$16 sps:$4 sm:$0xff]  }
 0xdff   : > { %v4602_v3 = vadd.f32 %v8506_v63, %v8503_v56  ;;  %v7082_v61 = vld [vmem:[#allocation16 + $0x1ec] ss:$16 sps:$4 sm:$0xff]   ;;  %v7116_v48 = vld [vmem:[#allocation18 + $0x150] ss:$8 sps:$4 sm:$0xff]   ;;  %v7122_v58 = vld [vmem:[#allocation18 + $0x160] ss:$8 sps:$4 sm:$0xff]  }
 0xe00   : > { %v7124_v55 = vld [vmem:[#allocation18 + $0x164] ss:$8 sps:$4 sm:$0xff]  }
 0xe01   : > { %4603 = vadd.xlane.f32.xlu0 %v4602_v3  ;;  %5098 = vmatpush1.bf16.msra.mxu0 %v7002_v8  ;;  %v7070_v3 = vld [vmem:[#allocation16 + $0x1ac] ss:$16 sps:$4 sm:$0xff]  }
 0xe02   : > { %5099 = vmatprep.subr.bf16.mxu0 %v7010_v9  ;;  %v7088_v8 = vld [vmem:[#allocation18 + $0x104] ss:$8 sps:$4 sm:$0xff]  }
 0xe05   : > { %5100 = vmatpush1.bf16.msra.mxu0 %v7008_v12  ;;  %v6217_v12 = vld [vmem:[%s8786_s15 + $0x2] sm:$0x3] }
 0xe06   : > { %5101 = vmatprep.subr.bf16.mxu0 %v7016_v13  ;;  %v4622_v13 = vrot.slane %v6217_v12, %v8345_v31  ;;  %v4626_v14 = vrot.slane %v6217_v12, %v8351_v38  ;;  %v7157_v12 = vld [vmem:[#allocation18 + $0xc4] ss:$8 sps:$4 sm:$0xff]  }
 0xe09   : > { %5102 = vmatpush1.bf16.msra.mxu0 %v7014_v16 }
 0xe0a   : > { %5103 = vmatprep.subr.bf16.mxu0 %v7022_v19 }
 0xe0d   : > { %5104 = vmatpush1.bf16.msra.mxu0 %v7020_v11  ;;  %v4639_v11 = vrot.slane %v6218_v18, %v8351_v38  ;;  %v7160_v18 = vld [vmem:[#allocation18 + $0x1c4] ss:$8 sps:$4 sm:$0xff]  }
 0xe0e   : > { %5105 = vmatprep.subr.bf16.mxu0 %v7028_v20 }
 0xe11   : > { %5106 = vmatpush1.bf16.msra.mxu0 %v7026_v23 }
 0xe12   : > { %5107 = vmatprep.subr.bf16.mxu0 %v7034_v25 }
 0xe15   : > { %5108 = vmatpush1.bf16.msra.mxu0 %v7032_v27  ;;  %v7086_v27 = vld [vmem:[#allocation18 + $0x100] ss:$8 sps:$4 sm:$0xff]  }
 0xe16   : > { %5109 = vmatprep.subr.bf16.mxu0 %v7040_v28  ;;  %v7094_v28 = vld [vmem:[#allocation18 + $0x114] ss:$8 sps:$4 sm:$0xff]  }
 0xe19   : > { %5110 = vmatpush1.bf16.msra.mxu0 %v7038_v29  ;;  %v7092_v29 = vld [vmem:[#allocation18 + $0x110] ss:$8 sps:$4 sm:$0xff]  }
 0xe1a   : > { %5111 = vmatprep.subr.bf16.mxu0 %v7046_v35  ;;  %v7100_v35 = vld [vmem:[#allocation18 + $0x124] ss:$8 sps:$4 sm:$0xff]  }
 0xe1d   : > { %5112 = vmatpush1.bf16.msra.mxu0 %v7044_v37  ;;  %v7098_v37 = vld [vmem:[#allocation18 + $0x120] ss:$8 sps:$4 sm:$0xff]  }
 0xe1e   : > { %5113 = vmatprep.subr.bf16.mxu0 %v7052_v51  ;;  %v7115_v51 = vld [vmem:[#allocation18 + $0x54] ss:$8 sps:$4 sm:$0xff]  }
 0xe21   : > { %5114 = vmatpush1.bf16.msra.mxu0 %v7050_v53  ;;  %v7113_v53 = vld [vmem:[#allocation18 + $0x50] ss:$8 sps:$4 sm:$0xff]  }
 0xe22   : > { %5115 = vmatprep.subr.bf16.mxu0 %v7058_v54  ;;  %v7121_v54 = vld [vmem:[#allocation18 + $0x64] ss:$8 sps:$4 sm:$0xff]  }
 0xe25   : > { %5116 = vmatpush1.bf16.msra.mxu0 %v7056_v57  ;;  %v7119_v57 = vld [vmem:[#allocation18 + $0x60] ss:$8 sps:$4 sm:$0xff]  }
 0xe26   : > { %5117 = vmatprep.subr.bf16.mxu0 %v7064_v59  ;;  %v7127_v59 = vld [vmem:[#allocation18 + $0x74] ss:$8 sps:$4 sm:$0xff]  }
 0xe29   : > { %5118 = vmatpush1.bf16.msra.mxu0 %v7062_v62  ;;  %v7125_v62 = vld [vmem:[#allocation18 + $0x70] ss:$8 sps:$4 sm:$0xff]  }
 0xe2a   : > { %5119 = vmatprep.subr.bf16.mxu0 %v7070_v3  ;;  %v7133_v3 = vld [vmem:[#allocation18 + $0x84] ss:$8 sps:$4 sm:$0xff]  }
 0xe2d   : > { %5120 = vmatpush1.bf16.msra.mxu0 %v7068_v4  ;;  %v7131_v4 = vld [vmem:[#allocation18 + $0x80] ss:$8 sps:$4 sm:$0xff]  }
 0xe2e   : > { %5121 = vmatprep.subr.bf16.mxu0 %v7076_v6  ;;  %v7137_v6 = vld [vmem:[#allocation18 + $0x90] ss:$8 sps:$4 sm:$0xff]  }
 0xe31   : > { %5122 = vmatpush1.bf16.msra.mxu0 %v7074_v0  ;;  %v7142_v0 = vld [vmem:[#allocation18 + $0x194] ss:$8 sps:$4 sm:$0xff]  }
 0xe32   : > { %5123 = vmatprep.subr.bf16.mxu0 %v7082_v61  ;;  %v7145_v61 = vld [vmem:[#allocation18 + $0xa4] ss:$8 sps:$4 sm:$0xff]  }
 0xe35   : > { %5124 = vmatpush1.bf16.msra.mxu0 %v7080_v60  ;;  %v7143_v60 = vld [vmem:[#allocation18 + $0xa0] ss:$8 sps:$4 sm:$0xff]  }
 0xe36   : > { %5579 = vmatprep.subr.bf16.mxu0 %v7088_v8  ;;  %v7151_v8 = vld [vmem:[#allocation18 + $0xb4] ss:$8 sps:$4 sm:$0xff]  }
 0xe8e   : > { %v4604_v39 = vpop.xlane.xlu0 %4603 }
 0xe8f   : > { %v4605_v40 = vmul.f32 0.00390625, %v4604_v39  ;;  %v7103_v39 = vld [vmem:[#allocation18 + $0x34] ss:$8 sps:$4 sm:$0xff]  }
 0xe91   : > { %v8511_v41 = vsub.f32 %v8503_v56, %v4605_v40  ;;  %v8514_v42 = vsub.f32 %v8506_v63, %v4605_v40  ;;  %v7059_v56 = vld [vmem:[#allocation16 + $0x180] ss:$16 sps:$4 sm:$0xff]   ;;  %v7067_v63 = vld [vmem:[#allocation16 + $0x1a4] ss:$16 sps:$4 sm:$0xff]  }
 0xe92   : > { %5077 = vmatpush1.bf16.msra.mxu1 %v7059_v56  ;;  %v7106_v40 = vld [vmem:[#allocation18 + $0x134] ss:$8 sps:$4 sm:$0xff]  }
 0xe93   : > { %v4608_v43 = vmul.f32 %v8511_v41, %v8511_v41  ;;  %v4609_v44 = vmul.f32 %v8514_v42, %v8514_v42  ;;  %5078 = vmatprep.subr.bf16.mxu1 %v7067_v63  ;;  %v7130_v56 = vld [vmem:[#allocation18 + $0x174] ss:$8 sps:$4 sm:$0xff]   ;;  %v7128_v63 = vld [vmem:[#allocation18 + $0x170] ss:$8 sps:$4 sm:$0xff]  }
 0xe95   : > { %v4610_v45 = vadd.f32 %v4609_v44, %v4608_v43  ;;  %v7109_v43 = vld [vmem:[#allocation18 + $0x44] ss:$8 sps:$4 sm:$0xff]  }
 0xe96   : > { %5079 = vmatpush1.bf16.msra.mxu1 %v7065_v52  ;;  %v7112_v44 = vld [vmem:[#allocation18 + $0x144] ss:$8 sps:$4 sm:$0xff]  }
 0xe97   : > { %4611 = vadd.xlane.f32.xlu1 %v4610_v45  ;;  %5080 = vmatprep.subr.bf16.mxu1 %v7073_v33  ;;  %v7107_v45 = vld [vmem:[#allocation18 + $0x40] ss:$8 sps:$4 sm:$0xff]   ;;  %v7136_v52 = vld [vmem:[#allocation18 + $0x184] ss:$8 sps:$4 sm:$0xff]   ;;  %v7139_v33 = vld [vmem:[#allocation18 + $0x94] ss:$8 sps:$4 sm:$0xff]  }
 0xe9a   : > { %5081 = vmatpush1.bf16.msra.mxu1 %v7071_v5  ;;  %v7134_v5 = vld [vmem:[#allocation18 + $0x180] ss:$8 sps:$4 sm:$0xff]  }
 0xe9b   : > { %5082 = vmatprep.subr.bf16.mxu1 %v7079_v15  ;;  %v7140_v15 = vld [vmem:[#allocation18 + $0x190] ss:$8 sps:$4 sm:$0xff]  }
 0xe9e   : > { %5083 = vmatpush1.bf16.msra.mxu1 %v7077_v1  ;;  %v7148_v1 = vld [vmem:[#allocation18 + $0x1a4] ss:$8 sps:$4 sm:$0xff]  }
 0xe9f   : > { %5538 = vmatprep.subr.bf16.mxu1 %v7085_v7  ;;  %v7146_v7 = vld [vmem:[#allocation18 + $0x1a0] ss:$8 sps:$4 sm:$0xff]  }
 0xf24   : > { %v4612_v50 = vpop.xlane.xlu1 %4611 }
 0xf25   : > { %v4613_v9 = vmul.f32 0.00390625, %v4612_v50  ;;  %v7154_v50 = vld [vmem:[#allocation18 + $0x1b4] ss:$8 sps:$4 sm:$0xff]  }
 0xf27   : > { %v4614_v10 = vadd.f32 1e-05, %v4613_v9  ;;  %v7149_v9 = vld [vmem:[#allocation18 + $0xb0] ss:$8 sps:$4 sm:$0xff]  }
 0xf29   : > { %7197 = vrsqrt.f32 %v4614_v10  ;;  %v7152_v10 = vld [vmem:[#allocation18 + $0x1b0] ss:$8 sps:$4 sm:$0xff]  }
 0xf33   : > { %v7198_v16 = vpop.eup %7197 }
 0xf34   : > { %v4616_v17 = vmul.f32 %v7198_v16, %v8511_v41  ;;  %v4617_v19 = vmul.f32 %v7198_v16, %v8514_v42  ;;  %v7101_v41 = vld [vmem:[#allocation18 + $0x30] ss:$8 sps:$4 sm:$0xff]   ;;  %v7163_v16 = vld [vmem:[#allocation18 + $0xd4] ss:$8 sps:$4 sm:$0xff]  }
 0xf35   : > { %v7104_v42 = vld [vmem:[#allocation18 + $0x130] ss:$8 sps:$4 sm:$0xff]  }
 0xf36   : > { %v4630_v2 = vmul.f32 %v4626_v14, %v4617_v19  ;;  %v4629_v20 = vmul.f32 %v4622_v13, %v4616_v17  ;;  %v7155_v13 = vld [vmem:[#allocation18 + $0xc0] ss:$8 sps:$4 sm:$0xff]   ;;  %v7166_v17 = vld [vmem:[#allocation18 + $0x1d4] ss:$8 sps:$4 sm:$0xff]   ;;  %v7161_v19 = vld [vmem:[#allocation18 + $0xd0] ss:$8 sps:$4 sm:$0xff]  }
 0xf37   : > { %v7158_v14 = vld [vmem:[#allocation18 + $0x1c0] ss:$8 sps:$4 sm:$0xff]  }
 0xf38   : > { %v8532_v22 = vadd.f32 %v4639_v11, %v4630_v2  ;;  %v8534_v23 = vadd.f32 %v4635_v21, %v4629_v20  ;;  %v7164_v21 = vld [vmem:[#allocation18 + $0x1d0] ss:$8 sps:$4 sm:$0xff]   ;;  %v7169_v11 = vld [vmem:[#allocation18 + $0xe4] ss:$8 sps:$4 sm:$0xff]   ;;  %v7167_v20 = vld [vmem:[#allocation18 + $0xe0] ss:$8 sps:$4 sm:$0xff]  }
 0xf39   : > { %v7172_v2 = vld [vmem:[#allocation18 + $0x1e4] ss:$8 sps:$4 sm:$0xff]  }
 0xf3a   : > { %v4645_v24 = vpack.c.bf16 %v8532_v22, %v8532_v22  ;;  %v4644_v25 = vpack.c.bf16 %v8534_v23, %v8534_v23 }
 0xf3c   : > { %5084 = vmatprep.mubr.bf16.mxu1 %v4645_v24  ;;  %5125 = vmatprep.mubr.bf16.mxu0 %v4645_v24  ;;  %v7170_v24 = vld [vmem:[#allocation18 + $0x1e0] ss:$8 sps:$4 sm:$0xff]  }
 0xf3d   : > { %5085 = vmatmul.mubr.bf16.vlgmr.msra.gmra.mrb[36].mxu1 %v4644_v25  ;;  %5126 = vmatmul.mubr.bf16.vlgmr.msra.gmra.mrb[12].mxu0 %v4644_v25  ;;  %v7175_v25 = vld [vmem:[#allocation18 + $0xf4] ss:$8 sps:$4 sm:$0xff]  }
 0xf3e   : > { %5539 = vmatpush1.bf16.msra.mxu1 %v7083_v26  ;;  %5580 = vmatpush1.bf16.msra.mxu0 %v7086_v27  ;;  %v7178_v26 = vld [vmem:[#allocation18 + $0x1f4] ss:$8 sps:$4 sm:$0xff]   ;;  %v7173_v27 = vld [vmem:[#allocation18 + $0xf0] ss:$8 sps:$4 sm:$0xff]  }
 0xf3f   : > { %5540 = vmatprep.subr.bf16.mxu1 %v7091_v32  ;;  %5581 = vmatprep.subr.bf16.mxu0 %v7094_v28  ;;  %v7176_v32 = vld [vmem:[#allocation18 + $0x1f0] ss:$8 sps:$4 sm:$0xff]   ;;  %v4722_v28 = vsub.s32 2, %v8342_v34 }
 0xf42   : > { %5541 = vmatpush1.bf16.msra.mxu1 %v7089_v49  ;;  %5582 = vmatpush1.bf16.msra.mxu0 %v7092_v29  ;;  %v4710_v49 = vld [vmem:[%s8789_s11] sm:$0xf]  ;;  %v4726_v29 = vsub.s32 3, %v8342_v34  ;;  %s8570_s11 = scalar_lea.hbm %s8793_s19, %s6352_s7 }
 0xf43   : > { %5542 = vmatprep.subr.bf16.mxu1 %v7097_v30  ;;  %5583 = vmatprep.subr.bf16.mxu0 %v7100_v35  ;;  %v4715_v30 = vrot.slane %v4710_v49, %v8345_v31  ;;  %v4723_v35 = vrot.slane %v4710_v49, %v4722_v28 }
 0xf46   : > { %5543 = vmatpush1.bf16.msra.mxu1 %v7095_v36  ;;  %5584 = vmatpush1.bf16.msra.mxu0 %v7098_v37  ;;  %v4719_v36 = vrot.slane %v4710_v49, %v8351_v38  ;;  %v4727_v37 = vrot.slane %v4710_v49, %v4726_v29 }
 0xf47   : > { %5544 = vmatprep.subr.bf16.mxu1 %v7103_v39  ;;  %5585 = vmatprep.subr.bf16.mxu0 %v7106_v40 }
 0xf4a   : > { %5545 = vmatpush1.bf16.msra.mxu1 %v7101_v41  ;;  %5586 = vmatpush1.bf16.msra.mxu0 %v7104_v42 }
 0xf4b   : > { %5546 = vmatprep.subr.bf16.mxu1 %v7109_v43  ;;  %5587 = vmatprep.subr.bf16.mxu0 %v7112_v44 }
 0xf4e   : > { %5547 = vmatpush1.bf16.msra.mxu1 %v7107_v45  ;;  %5588 = vmatpush1.bf16.msra.mxu0 %v7110_v46 }
 0xf4f   : > { %5548 = vmatprep.subr.bf16.mxu1 %v7115_v51  ;;  %5589 = vmatprep.subr.bf16.mxu0 %v7118_v47 }
 0xf52   : > { %5549 = vmatpush1.bf16.msra.mxu1 %v7113_v53  ;;  %5590 = vmatpush1.bf16.msra.mxu0 %v7116_v48 }
 0xf53   : > { %5550 = vmatprep.subr.bf16.mxu1 %v7121_v54  ;;  %5591 = vmatprep.subr.bf16.mxu0 %v7124_v55 }
 0xf56   : > { %5551 = vmatpush1.bf16.msra.mxu1 %v7119_v57  ;;  %5592 = vmatpush1.bf16.msra.mxu0 %v7122_v58 }
 0xf57   : > { %5552 = vmatprep.subr.bf16.mxu1 %v7127_v59  ;;  %5593 = vmatprep.subr.bf16.mxu0 %v7130_v56 }
 0xf5a   : > { %5553 = vmatpush1.bf16.msra.mxu1 %v7125_v62  ;;  %5594 = vmatpush1.bf16.msra.mxu0 %v7128_v63  ;;  %v5206_v63 = vld [vmem:[%s8790_s25] sm:$0x3]  ;;  %s7625_s25 = smov [#allocation19]  }
 0xf5b   : > { %5554 = vmatprep.subr.bf16.mxu1 %v7133_v3  ;;  %5595 = vmatprep.subr.bf16.mxu0 %v7136_v52  ;;  %v5211_v3 = vrot.slane %v5206_v63, %v8345_v31  ;;  %v5215_v52 = vrot.slane %v5206_v63, %v8351_v38  ;;  %s7467_s18 = sshll.u32 %s7625_s25, 4  ;;  %s7468_s18 = int_to_ptr.vmem [resolvable:$false] %s7467_s18 }
 0xf5c   : > { %s7469_s21 = scalar_lea.vmem %s7468_s18, 512  ;;  %p7470_p9 = scmp.lt.s32.totalorder %s8572_s6, %s7468_s18 }
 0xf5d   : > { %p7471_p10 = scmp.lt.s32.totalorder %s7469_s21, %s7463_s4 }
 0xf5e   : > { %5555 = vmatpush1.bf16.msra.mxu1 %v7131_v4  ;;  %5596 = vmatpush1.bf16.msra.mxu0 %v7134_v5 }
 0xf5f   : > { %5556 = vmatprep.subr.bf16.mxu1 %v7139_v33  ;;  %5597 = vmatprep.subr.bf16.mxu0 %v7142_v0  ;;  %p7472_p8 = por %p7471_p10, %p7470_p9 }
 0xf61   : > { %p7473_p12 = pnand %p7472_p8, %p7466_p13 }
 0xf62   : > { %5557 = vmatpush1.bf16.msra.mxu1 %v7137_v6  ;;  %5598 = vmatpush1.bf16.msra.mxu0 %v7140_v15 }
 0xf63   : > { %5558 = vmatprep.subr.bf16.mxu1 %v7145_v61  ;;  %5599 = vmatprep.subr.bf16.mxu0 %v7148_v1 }
 0xf66   : > { %5559 = vmatpush1.bf16.msra.mxu1 %v7143_v60  ;;  %5600 = vmatpush1.bf16.msra.mxu0 %v7146_v7 }
 0xf67   : > { %5560 = vmatprep.subr.bf16.mxu1 %v7151_v8  ;;  %5601 = vmatprep.subr.bf16.mxu0 %v7154_v50 }
 0xf6a   : > { %5561 = vmatpush1.bf16.msra.mxu1 %v7149_v9  ;;  %5602 = vmatpush1.bf16.msra.mxu0 %v7152_v10 }
 0xf6b   : > { %5562 = vmatprep.subr.bf16.mxu1 %v7157_v12  ;;  %5603 = vmatprep.subr.bf16.mxu0 %v7160_v18 }
 0xf6e   : > { %5563 = vmatpush1.bf16.msra.mxu1 %v7155_v13  ;;  %5604 = vmatpush1.bf16.msra.mxu0 %v7158_v14 }
 0xf6f   : > { %5564 = vmatprep.subr.bf16.mxu1 %v7163_v16  ;;  %5605 = vmatprep.subr.bf16.mxu0 %v7166_v17 }
 0xf72   : > { %5565 = vmatpush1.bf16.msra.mxu1 %v7161_v19  ;;  %5606 = vmatpush1.bf16.msra.mxu0 %v7164_v21 }
 0xf73   : > { %5566 = vmatprep.subr.bf16.mxu1 %v7169_v11  ;;  %5607 = vmatprep.subr.bf16.mxu0 %v7172_v2 }
 0xf76   : > { %5567 = vmatpush1.bf16.msra.mxu1 %v7167_v20  ;;  %5608 = vmatpush1.bf16.msra.mxu0 %v7170_v24 }
 0xf77   : > { %5568 = vmatprep.subr.bf16.mxu1 %v7175_v25  ;;  %5609 = vmatprep.subr.bf16.mxu0 %v7178_v26 }
 0xf7a   : > { %5569 = vmatpush1.bf16.msra.mxu1 %v7173_v27  ;;  %5610 = vmatpush1.bf16.msra.mxu0 %v7176_v32 }
0x1010   : > { %v5086_v39 = vpop.f32.mrb[36].mxu1  ;;  %v5127_v40 = vpop.f32.mrb[12].mxu0 }
0x1011   : > { %v5087_v41 = vadd.f32 %v5086_v39, %v4715_v30  ;;  %v5128_v42 = vadd.f32 %v5127_v40, %v4723_v35  ;;  %v5088_v43 = vpop.f32.mrb[37].mxu1  ;;  %v5129_v44 = vpop.f32.mrb[13].mxu0 }
0x1012   : > { %v5089_v45 = vadd.f32 %v5088_v43, %v4719_v36  ;;  %v5130_v46 = vadd.f32 %v5129_v44, %v4727_v37  ;;  %v5090_v51 = vpop.f32.mrb[38].mxu1  ;;  %v5131_v47 = vpop.f32.mrb[14].mxu0 }
0x1013   : > { %v5134_v53 = vmax.f32 %v5087_v41, 0.0  ;;  %v5136_v48 = vmax.f32 %v5128_v42, 0.0  ;;  %v5091_v54 = vpop.f32.mrb[39].mxu1  ;;  %v5132_v34 = vpop.f32.mrb[15].mxu0 }
0x1014   : > { %v5135_v55 = vmax.f32 %v5089_v45, 0.0  ;;  %v5137_v57 = vmax.f32 %v5130_v46, 0.0 }
0x1015   : > { %v5138_v56 = vpack.c.bf16 %v5134_v53, %v5134_v53  ;;  %v5140_v62 = vpack.c.bf16 %v5136_v48, %v5136_v48 }
0x1016   : > { %v5139_v58 = vpack.c.bf16 %v5135_v55, %v5135_v55  ;;  %v5141_v59 = vpack.c.bf16 %v5137_v57, %v5137_v57 }
0x1018   : > { %5570 = vmatprep.mubr.bf16.mxu1 %v5139_v58  ;;  %5611 = vmatprep.mubr.bf16.mxu0 %v5141_v59 }
0x1019   : > { %5571 = vmatmul.mubr.bf16.vlgmr.msra.gmra.mrb[40].mxu1 %v5138_v56  ;;  %5612 = vmatmul.mubr.bf16.vlgmr.msra.gmra.mrb[16].mxu0 %v5140_v62 }
0x10ec   : > { %v5572_v4 = vpop.f32.mrb[40].mxu1  ;;  %v5613_v5 = vpop.f32.mrb[16].mxu0 }
0x10ed   : > { %v5573_v33 = vadd.f32 %v5572_v4, %v5211_v3  ;;  %v5574_v0 = vpop.f32.mrb[41].mxu1  ;;  %v5615_v6 = vpop.f32.mrb[17].mxu0 }
0x10ee   : > { %v5575_v15 = vadd.f32 %v5574_v0, %v5215_v52  ;;  %v5576_v61 = vpop.f32.mrb[42].mxu1  ;;  %v5617_v1 = vpop.f32.mrb[18].mxu0 }
0x10ef   : > { %v5614_v60 = vadd.f32 %v5613_v5, %v5573_v33  ;;  %v5577_v7 = vpop.f32.mrb[43].mxu1  ;;  %v5618_v8 = vpop.f32.mrb[19].mxu0 }
0x10f0   : > { %v5616_v50 = vadd.f32 %v5615_v6, %v5575_v15 }
0x10f1   : > { %v5620_v9 = vadd.f32 %v5614_v60, %v8534_v23  ;;  %v6348_v23 = vld [vmem:[%s8787_s8 + $0x4] sm:$0x3] }
0x10f2   : > { %v5621_v10 = vadd.f32 %v5616_v50, %v8532_v22  ;;  %v6347_v22 = vld [vmem:[%s8786_s15 + $0x4] sm:$0x3]  ;;  %v5659_v28 = vrot.slane %v6348_v23, %v8345_v31  ;;  %v5663_v49 = vrot.slane %v6348_v23, %v8351_v38 }
0x10f3   : > { %v5646_v24 = vrot.slane %v6347_v22, %v8345_v31  ;;  %v5650_v25 = vrot.slane %v6347_v22, %v8351_v38 }
0x10f4   : > { %v5626_v12 = vadd.f32 %v5621_v10, %v5620_v9 }
0x10f6   : > { %5627 = vadd.xlane.f32.xlu0 %v5626_v12 }
0x1183   : > { %v5628_v18 = vpop.xlane.xlu0 %5627 }
0x1184   : > { %v5629_v13 = vmul.f32 0.00390625, %v5628_v18 }
0x1186   : > { %v5630_v14 = vsub.f32 %v5620_v9, %v5629_v13  ;;  %v5631_v16 = vsub.f32 %v5621_v10, %v5629_v13 }
0x1188   : > { %v5632_v17 = vmul.f32 %v5630_v14, %v5630_v14  ;;  %v5633_v19 = vmul.f32 %v5631_v16, %v5631_v16 }
0x118a   : > { %v5634_v21 = vadd.f32 %v5633_v19, %v5632_v17 }
0x118c   : > { %5635 = vadd.xlane.f32.xlu1 %v5634_v21 }
0x1219   : > { %v5636_v11 = vpop.xlane.xlu1 %5635 }
0x121a   : > { %v5637_v2 = vmul.f32 0.00390625, %v5636_v11 }
0x121c   : > { %v5638_v20 = vadd.f32 1e-05, %v5637_v2 }
0x121e   : > { %7199 = vrsqrt.f32 %v5638_v20 }
0x1228   : > { %v7200_v26 = vpop.eup %7199 }
0x1229   : > { %v5640_v27 = vmul.f32 %v7200_v26, %v5630_v14  ;;  %v5641_v32 = vmul.f32 %v7200_v26, %v5631_v16 }
0x122b   : > { %v5653_v29 = vmul.f32 %v5646_v24, %v5640_v27  ;;  %v5654_v30 = vmul.f32 %v5650_v25, %v5641_v32 }
0x122d   : > { %v5666_v35 = vadd.f32 %v5659_v28, %v5653_v29  ;;  %v5667_v36 = vadd.f32 %v5663_v49, %v5654_v30 }
0x122f   : > { %5668 = vst [vmem:[%s8174_s29] sm:$0xff] %v5666_v35  ;;  %5669 = vst [vmem:[%s8174_s29 + $0x8] sm:$0xff] %v5667_v36 }
0x1230   : > { %7476 = shalt.err (!%p7473_p12)
}
0x1231   : > { %s7477_s24 = scalar_lea.hbm %s8570_s11, 256  ;;  %s7481_s13 = scalar_lea.hbm %s8794_s9, 1024 }
0x1232   : > { %p7478_p3 = scmp.ne.s32.totalorder %s8570_s11, %s7477_s24  ;;  %p7482_p2 = scmp.lt.u32.totalorder %s8570_s11, %s8794_s9 }
0x1233   : > { %p7483_p7 = scmp.lt.u32.totalorder %s7481_s13, %s7477_s24  ;;  %p7485_p1 = scmp.lt.u32.totalorder %s7477_s24, %s8570_s11 }
0x1234   : > { %p7479_p6 = pnand %p7478_p3, %p8795_p0 }
0x1235   : > { %p7484_p11 = por %p7483_p7, %p7482_p2 }
0x1236   : > { %p7480_p4 = pneg %p7479_p6 }
0x1237   : > { %p7486_p5 = por %p7485_p1, %p7484_p11 }
0x1239   : > { %p7487_p13 = pnand %p7486_p5, %p7480_p4 }
0x123b   : > { %7490 = shalt.err (!%p7487_p13)
}
0x123c   : > { %6447 = dma.vmem_to_hbm [thread:$0]  (%p8795_p0), %s8572_s6, 256, %s8570_s11, %s5671_s10  }
0x123d PF: > { %s8796_s5 = sld [smem:[#allocation28_spill]]  ;;  %s8797_s1 = sld [smem:[#allocation40_spill]] }
0x123e   : > { %p6491_p9 = scmp.ge.s32.totalorder %s7601_s28, 2 }
0x1243   : > { %s5699_s7 = sand.u32 1, %s8796_s5   ;;  %p8798_p10 = scmp.ne.s32.totalorder %s8797_s1, 0 }
0x1244   : > { %s5700_s14 = scalar_lea.sflag [#allocation6], %s5699_s7 }
0x1245   : > { %p6479_p8 = pnand %p6491_p9, %p8798_p10 }
0x1247   : > { %7556 = dma.done.wait (!%p6479_p8), %s5700_s14, 256  }
0x1248   : > { %7558 = vsyncadd (!%p6479_p8), %s5700_s14, 4294967040  ;;  %s39_s28 = sadd.s32 1, %s7601_s28   ;;  %s8799_s18 = sld [smem:[#allocation26_spill]] }
0x1249   : > { %p36_p12 = scmp.ge.s32.totalorder %s39_s28, 6   ;;  %s8800_s19 = sld [smem:[#allocation27_spill]] }
0x124a   : > { %s8801_s21 = sld [smem:[#allocation29_spill]]  ;;  %s8802_s6 = sld [smem:[#allocation37_spill]] }
0x124b   : > { %s8803_s11 = sld [smem:[#allocation38_spill]]  ;;  %s8804_s20 = smov %s8818_s30 }
0x124c   : > { %s8805_s22 = smov %s7581_s23  ;;  %s8806_s23 = smov %s8042_s3 }
0x124d   : > { %s8807_s24 = smov %s7593_s26  ;;  %s8808_s25 = smov %s7597_s27 }
0x124e   :  { %38 = sbr.rel (!%p36_p12) target bundleno = 31 (0x1f), region = 213 }
0x1250   : > { %s8809_s26 = smov %s8802_s6 }
0x1251   : > { %s8810_s27 = smov %s8803_s11 }
0x1255   :  { %5705 = vsyncpa [#allocation5], 1 }
0x1256   :  { %5707 = vsyncpa [#allocation5 + $0x1], 1 }
0x1257   :  { %5708 = vsyncpa [#allocation8], 1 }
0x1258   :  { %5710 = vsyncpa [#allocation8 + $0x1], 1 }
0x1259   :  { %5711 = vsyncpa [#allocation11], 1 }
0x125a   :  { %5713 = vsyncpa [#allocation11 + $0x1], 1 }
0x125b   :  { %5714 = vsyncpa [#allocation14], 1 }
0x125c   :  { %5715 = vsyncpa [#allocation17], 1 }
0x125d   :  { %5716 = vsyncpa [#allocation6], 1 }
0x125e   :  { %5718 = vsyncpa [#allocation6 + $0x1], 1 }

</bundles_post_ra>
